<compile_context>
chip_gen: v6e
topology: v6e:2x2x1
jax: 0.10.0
libtpu: 0.0.40
codegen_flags: <defaults>
</compile_context>

<pallas_src>
import jax
import jax.numpy as jnp
import numpy as np
from jax.experimental import pallas as pl
from jax.experimental.pallas import tpu as pltpu

HIGHEST = jax.lax.Precision.HIGHEST


# ----------------------------------------------------------------------------
# helpers
# ----------------------------------------------------------------------------
def _pick_tile(n, cap):
    """Largest tile <= cap that divides n and satisfies the (8,128) sublane rule."""
    if n <= cap:
        return n
    for d in range(cap, 0, -1):
        if n % d == 0 and d % 8 == 0:
            return d
    return n


def _dot_bf16(a, b):
    # bf16 x bf16 -> f32 accumulate on the MXU (single-pass, bf16-native path).
    return jnp.dot(a.astype(jnp.bfloat16), b.astype(jnp.bfloat16),
                   preferred_element_type=jnp.float32)


# ----------------------------------------------------------------------------
# Kernel 1: negative squared pairwise distance, tiled over query rows
# ----------------------------------------------------------------------------
def _pdist_kernel(q_ref, p_ref, o_ref):
    q = q_ref[0]                                                    # (TQ, 3)
    p = p_ref[0]                                                    # (N, 3)
    inner = jax.lax.dot_general(q, p, (((1,), (1,)), ((), ())),
                                precision=HIGHEST,
                                preferred_element_type=jnp.float32)  # q @ p.T
    qq = jnp.sum(q * q, axis=-1, keepdims=True)                     # (TQ, 1)
    pp = jnp.sum(p * p, axis=-1, keepdims=True)                     # (N, 1)
    o_ref[0] = (2.0 * inner - qq - jnp.transpose(pp)).astype(o_ref.dtype)


def neg_pairwise_dist(pts, tile_cap=512):
    B, N, C = pts.shape
    tq = _pick_tile(N, tile_cap)
    return pl.pallas_call(
        _pdist_kernel,
        out_shape=jax.ShapeDtypeStruct((B, N, N), jnp.float32),
        grid=(B, N // tq),
        in_specs=[pl.BlockSpec((1, tq, C), lambda b, q: (b, q, 0)),
                  pl.BlockSpec((1, N, C), lambda b, q: (b, 0, 0))],
        out_specs=pl.BlockSpec((1, tq, N), lambda b, q: (b, q, 0)),
        compiler_params=pltpu.CompilerParams(
            dimension_semantics=("parallel", "parallel")),
    )(pts, pts)


# ----------------------------------------------------------------------------
# Kernel 2: local-cov outer product + concat + mlp1 chain (12->64->64->64)
# ----------------------------------------------------------------------------
def _cov_mlp1_kernel(p_ref, n0_ref, n1_ref,
                     w0_ref, b0_ref, w1_ref, b1_ref, w2_ref, b2_ref, o_ref):
    p = p_ref[0]                                                    # (TN, 3)
    n0 = n0_ref[0]                                                  # (TN, 3)
    n1 = n1_ref[0]                                                  # (TN, 3)

    # First layer (Cin=12) as 12 exact-f32 VPU FMAs.  Column order matches
    # torch.cat((pts, cov), dim=1): [p0,p1,p2, n0_i*n1_j for i*3+j].
    cols = [p[:, i:i + 1] for i in range(3)]
    cols += [n0[:, i:i + 1] * n1[:, j:j + 1] for i in range(3) for j in range(3)]
    y = b0_ref[...].astype(jnp.float32)                             # (1, 64)
    for c, col in enumerate(cols):
        y = y + col * w0_ref[c:c + 1, :]                            # (TN, 64)
    y = jnp.maximum(y, 0.0)

    y = jnp.maximum(_dot_bf16(y, w1_ref[...]) + b1_ref[...], 0.0)
    y = jnp.maximum(_dot_bf16(y, w2_ref[...]) + b2_ref[...], 0.0)
    o_ref[0] = y.astype(o_ref.dtype)


def cov_mlp1(pts, n0, n1, params, tile_cap=512):
    B, N, C = pts.shape
    tn = _pick_tile(N, tile_cap)
    w0, b0 = params["mlp1_0"]
    w1, b1 = params["mlp1_1"]
    w2, b2 = params["mlp1_2"]
    cout = w2.shape[1]

    def wspec(a):
        return pl.BlockSpec(a.shape, lambda b, n: (0, 0))

    pt_spec = pl.BlockSpec((1, tn, C), lambda b, n: (b, n, 0))
    return pl.pallas_call(
        _cov_mlp1_kernel,
        out_shape=jax.ShapeDtypeStruct((B, N, cout), jnp.float32),
        grid=(B, N // tn),
        in_specs=[pt_spec, pt_spec, pt_spec,
                  wspec(w0), wspec(b0), wspec(w1), wspec(b1),
                  wspec(w2), wspec(b2)],
        out_specs=pl.BlockSpec((1, tn, cout), lambda b, n: (b, n, 0)),
        compiler_params=pltpu.CompilerParams(
            dimension_semantics=("parallel", "parallel")),
    )(pts, n0, n1, w0, b0, w1, b1, w2, b2)


# ----------------------------------------------------------------------------
# Kernel 3: neighbor max-pool + linear1 + conv1(+ReLU)
# ----------------------------------------------------------------------------
def _graph1_kernel(g_ref, wl_ref, bl_ref, wc_ref, bc_ref, o_ref):
    g = g_ref[0]                                                    # (TN, k, Cin)
    m = jnp.max(g, axis=1)                                          # (TN, Cin)
    y = _dot_bf16(m, wl_ref[...]) + bl_ref[...]                     # linear1
    y = jnp.maximum(_dot_bf16(y, wc_ref[...]) + bc_ref[...], 0.0)   # conv1+relu
    o_ref[0] = y.astype(o_ref.dtype)


def graph_block1(gathered, params, tile_cap=256):
    B, N, k, Cin = gathered.shape
    tn = _pick_tile(N, tile_cap)
    wl, bl = params["linear1"]
    wc, bc = params["conv1"]
    cout = wc.shape[1]

    def wspec(a):
        return pl.BlockSpec(a.shape, lambda b, n: (0, 0))

    return pl.pallas_call(
        _graph1_kernel,
        out_shape=jax.ShapeDtypeStruct((B, N, cout), jnp.float32),
        grid=(B, N // tn),
        in_specs=[pl.BlockSpec((1, tn, k, Cin), lambda b, n: (b, n, 0, 0)),
                  wspec(wl), wspec(bl), wspec(wc), wspec(bc)],
        out_specs=pl.BlockSpec((1, tn, cout), lambda b, n: (b, n, 0)),
        compiler_params=pltpu.CompilerParams(
            dimension_semantics=("parallel", "parallel")),
    )(gathered, wl, bl, wc, bc)


# ----------------------------------------------------------------------------
# Kernel 4: neighbor max-pool + linear2 + conv2 + global max + mlp2 head
# ----------------------------------------------------------------------------
def _graph2_head_kernel(g_ref, wl_ref, bl_ref, wc_ref, bc_ref,
                        wm0_ref, bm0_ref, wm1_ref, bm1_ref, o_ref, acc_ref):
    n = pl.program_id(1)

    g = g_ref[0]                                                    # (TN, k, Cin)
    m = jnp.max(g, axis=1)                                          # (TN, Cin)
    y = _dot_bf16(m, wl_ref[...]) + bl_ref[...]                     # linear2
    z = _dot_bf16(y, wc_ref[...]) + bc_ref[...]                     # conv2 (no relu)
    tile_max = jnp.max(z, axis=0, keepdims=True)                    # (1, 1024)

    @pl.when(n == 0)
    def _():
        acc_ref[...] = jnp.full(acc_ref.shape, -jnp.inf, acc_ref.dtype)

    acc_ref[...] = jnp.maximum(acc_ref[...], tile_max)

    @pl.when(n == pl.num_programs(1) - 1)
    def _():
        h = jnp.maximum(_dot_bf16(acc_ref[...], wm0_ref[...]) + bm0_ref[...], 0.0)
        o_ref[0] = (_dot_bf16(h, wm1_ref[...]) + bm1_ref[...]).astype(o_ref.dtype)


def graph_block2_head(gathered, params, tile_cap=128):
    B, N, k, Cin = gathered.shape
    tn = _pick_tile(N, tile_cap)
    wl, bl = params["linear2"]
    wc, bc = params["conv2"]
    wm0, bm0 = params["mlp2_0"]
    wm1, bm1 = params["mlp2_1"]
    cmid = wc.shape[1]
    feat_dims = wm1.shape[1]

    def wspec(a):
        return pl.BlockSpec(a.shape, lambda b, n: (0, 0))

    return pl.pallas_call(
        _graph2_head_kernel,
        out_shape=jax.ShapeDtypeStruct((B, 1, feat_dims), jnp.float32),
        grid=(B, N // tn),
        in_specs=[pl.BlockSpec((1, tn, k, Cin), lambda b, n: (b, n, 0, 0)),
                  wspec(wl), wspec(bl), wspec(wc), wspec(bc),
                  wspec(wm0), wspec(bm0), wspec(wm1), wspec(bm1)],
        out_specs=pl.BlockSpec((1, 1, feat_dims), lambda b, n: (b, 0, 0)),
        scratch_shapes=[pltpu.VMEM((1, cmid), jnp.float32)],
        compiler_params=pltpu.CompilerParams(
            dimension_semantics=("parallel", "arbitrary")),
    )(gathered, wl, bl, wc, bc, wm0, bm0, wm1, bm1)


# ----------------------------------------------------------------------------
# Plain-JAX glue (data-dependent indexing)
# ----------------------------------------------------------------------------
def gather_neighbors(feats, idx):
    # feats: (B, N, C), idx: (B, N, k) -> (B, N, k, C)
    # TODO(synk): replace with an in-kernel DMA gather (scalar-prefetched idx +
    # make_async_copy) so the (B,N,k,C) intermediate never hits HBM.
    return jax.vmap(lambda f, i: f[i])(feats, idx)


# ----------------------------------------------------------------------------
# Parameters (Conv1d(k=1)/Linear stored as (Cin, Cout) + (1, Cout) bias)
# ----------------------------------------------------------------------------
def make_linear(key, cin, cout):
    kw, kb = jax.random.split(key)
    w = jax.random.normal(kw, (cin, cout), jnp.float32) / jnp.sqrt(float(cin))
    b = jax.random.normal(kb, (1, cout), jnp.float32) * 0.01
    return w, b


def init_params(key, feat_dims):
    ks = jax.random.split(key, 9)
    return {
        "mlp1_0": make_linear(ks[0], 12, 64),
        "mlp1_1": make_linear(ks[1], 64, 64),
        "mlp1_2": make_linear(ks[2], 64, 64),
        "linear1": make_linear(ks[3], 64, 64),
        "conv1": make_linear(ks[4], 64, 128),
        "linear2": make_linear(ks[5], 128, 128),
        "conv2": make_linear(ks[6], 128, 1024),
        "mlp2_0": make_linear(ks[7], 1024, feat_dims),
        "mlp2_1": make_linear(ks[8], feat_dims, feat_dims),
    }


# ----------------------------------------------------------------------------
# Forward pass (Pallas)
# ----------------------------------------------------------------------------
def foldnet_encoder_forward(params, pts, k):
    # pts: (B, N, 3) (torch module input before its internal transpose)
    pd = neg_pairwise_dist(pts)                          # (B, N, N)
    # TODO(synk): top-k neighbor selection has no clean Pallas equivalent; kept in JAX.
    _, idx = jax.lax.top_k(pd, k)                        # (B, N, k), self first

    nb2 = gather_neighbors(pts, idx[:, :, :2])           # (B, N, 2, 3)
    x = cov_mlp1(pts, nb2[:, :, 0, :], nb2[:, :, 1, :], params)      # (B, N, 64)

    g = gather_neighbors(x, idx)                         # (B, N, k, 64)
    x = graph_block1(g, params)                          # (B, N, 128)

    g = gather_neighbors(x, idx)                         # (B, N, k, 128)
    feat = graph_block2_head(g, params)                  # (B, 1, feat_dims)
    return feat


# ----------------------------------------------------------------------------
# Pure-JAX reference (mirrors torch semantics; same matmul precision strategy)
# ----------------------------------------------------------------------------
def reference_forward(params, pts, k):
    def mm(x, w):
        return jnp.matmul(x.astype(jnp.bfloat16), w.astype(jnp.bfloat16),
                          preferred_element_type=jnp.float32)

    B, N, _ = pts.shape
    inner = 2.0 * jnp.einsum("bnc,bmc->bnm", pts, pts, precision=HIGHEST)
    xx = jnp.sum(pts * pts, axis=-1)
    pd = inner - xx[:, :, None] - xx[:, None, :]
    _, idx = jax.lax.top_k(pd, k)

    take = jax.vmap(lambda f, i: f[i])
    neigh = take(pts, idx)
    n0, n1 = neigh[:, :, 0, :], neigh[:, :, 1, :]
    cov9 = (n0[..., :, None] * n1[..., None, :]).reshape(B, N, 9)
    x = jnp.concatenate([pts, cov9], axis=-1)            # (B, N, 12)

    w0, b0 = params["mlp1_0"]
    x = jnp.maximum(jnp.matmul(x, w0, precision=HIGHEST) + b0, 0.0)   # f32 layer
    x = jnp.maximum(mm(x, params["mlp1_1"][0]) + params["mlp1_1"][1], 0.0)
    x = jnp.maximum(mm(x, params["mlp1_2"][0]) + params["mlp1_2"][1], 0.0)

    x = jnp.max(take(x, idx), axis=2)
    x = mm(x, params["linear1"][0]) + params["linear1"][1]
    x = jnp.maximum(mm(x, params["conv1"][0]) + params["conv1"][1], 0.0)
    x = jnp.max(take(x, idx), axis=2)
    x = mm(x, params["linear2"][0]) + params["linear2"][1]
    x = mm(x, params["conv2"][0]) + params["conv2"][1]

    x = jnp.max(x, axis=1, keepdims=True)                # (B, 1, 1024)
    x = jnp.maximum(mm(x, params["mlp2_0"][0]) + params["mlp2_0"][1], 0.0)
    return mm(x, params["mlp2_1"][0]) + params["mlp2_1"][1]


# ----------------------------------------------------------------------------
if __name__ == "__main__":
    key = jax.random.PRNGKey(0)
    kp, kd = jax.random.split(key)

    B, N, K, FEAT_DIMS = 2, 16, 4, 32        # small shapes; args={'k':4,'feat_dims':32}
    params = init_params(kp, FEAT_DIMS)
    pts = jax.random.normal(kd, (B, N, 3), jnp.float32)

    fwd = jax.jit(lambda p, x: foldnet_encoder_forward(p, x, K))
    feat = jax.block_until_ready(fwd(params, pts))
    assert feat.shape == (B, 1, FEAT_DIMS)

    ref = jax.block_until_ready(reference_forward(params, pts, K))
    np.testing.assert_allclose(np.asarray(feat), np.asarray(ref),
                               rtol=1e-2, atol=1e-2)
    print("KERNEL_OK")
</pallas_src>

<mosaic_0001>
module attributes {stable_mosaic.version = 11 : i64} {
  func.func @_pdist_kernel(%arg0: i32, %arg1: i32, %arg2: memref<1x16x3xf32, #tpu.memory_space<vmem>>, %arg3: memref<1x16x3xf32, #tpu.memory_space<vmem>>, %arg4: memref<1x16x16xf32, #tpu.memory_space<vmem>>) attributes {dimension_semantics = [#tpu.dimension_semantics<parallel>, #tpu.dimension_semantics<parallel>], iteration_bounds = array<i64: 2, 1>, scalar_prefetch = 0 : i64, scratch_operands = 0 : i64, tpu.core_type = #tpu.core_type<tc>, window_params = [{transform_indices = @transform_0, window_bounds = array<i64: 1, 16, 3>}, {transform_indices = @transform_1, window_bounds = array<i64: 1, 16, 3>}, {transform_indices = @transform_2, window_bounds = array<i64: 1, 16, 16>}]} {
    %c0 = arith.constant 0 : index
    %c0_0 = arith.constant 0 : index
    %c0_1 = arith.constant 0 : index
    %0 = vector.load %arg2[%c0, %c0_0, %c0_1] : memref<1x16x3xf32, #tpu.memory_space<vmem>>, vector<1x16x3xf32>
    %1 = vector.shape_cast %0 : vector<1x16x3xf32> to vector<16x3xf32>
    %c0_2 = arith.constant 0 : index
    %c0_3 = arith.constant 0 : index
    %c0_4 = arith.constant 0 : index
    %2 = vector.load %arg3[%c0_2, %c0_3, %c0_4] : memref<1x16x3xf32, #tpu.memory_space<vmem>>, vector<1x16x3xf32>
    %3 = vector.shape_cast %2 : vector<1x16x3xf32> to vector<16x3xf32>
    %cst = arith.constant dense<0.000000e+00> : vector<16x16xf32>
    %4 = tpu.matmul %1, %3, %cst {dimension_numbers = #tpu.dot_dimension_numbers<[1], [1], [0], [0], [0, 0, 1, 0], [], []>, precision = #tpu.contract_precision<fp32>} : vector<16x3xf32>, vector<16x3xf32>, vector<16x16xf32> -> vector<16x16xf32>
    %5 = arith.mulf %1, %1 : vector<16x3xf32>
    %cst_5 = arith.constant dense<0.000000e+00> : vector<16xf32>
    %6 = vector.multi_reduction <add>, %5, %cst_5 [1] : vector<16x3xf32> to vector<16xf32>
    %7 = vector.shape_cast %6 : vector<16xf32> to vector<16x1xf32>
    %8 = arith.mulf %3, %3 : vector<16x3xf32>
    %cst_6 = arith.constant dense<0.000000e+00> : vector<16xf32>
    %9 = vector.multi_reduction <add>, %8, %cst_6 [1] : vector<16x3xf32> to vector<16xf32>
    %10 = vector.shape_cast %9 : vector<16xf32> to vector<16x1xf32>
    %cst_7 = arith.constant 2.000000e+00 : f32
    %11 = vector.broadcast %cst_7 : f32 to vector<16x16xf32>
    %12 = arith.mulf %11, %4 : vector<16x16xf32>
    %13 = vector.broadcast %7 : vector<16x1xf32> to vector<16x16xf32>
    %14 = arith.subf %12, %13 : vector<16x16xf32>
    %15 = tpu.transpose %10, [1, 0] : vector<16x1xf32> -> vector<1x16xf32>
    %16 = vector.broadcast %15 : vector<1x16xf32> to vector<16x16xf32>
    %17 = arith.subf %14, %16 : vector<16x16xf32>
    %c0_8 = arith.constant 0 : index
    %c0_9 = arith.constant 0 : index
    %c0_10 = arith.constant 0 : index
    %18 = vector.load %arg4[%c0_8, %c0_9, %c0_10] : memref<1x16x16xf32, #tpu.memory_space<vmem>>, vector<1x16x16xf32>
    %19 = vector.shape_cast %18 : vector<1x16x16xf32> to vector<16x16xf32>
    %20 = vector.shape_cast %17 : vector<16x16xf32> to vector<1x16x16xf32>
    tpu.vector_store %arg4[%c0_8, %c0_9, %c0_10], %20 {strides = array<i32>} : memref<1x16x16xf32, #tpu.memory_space<vmem>>, vector<1x16x16xf32>,
    return
  }
  func.func @transform_0(%arg0: i32, %arg1: i32) -> (i32, i32, i32) {
    %c0_i32 = arith.constant 0 : i32
    %c0_i32_0 = arith.constant 0 : i32
    return %arg0, %arg1, %c0_i32 : i32, i32, i32
  }
  func.func @transform_1(%arg0: i32, %arg1: i32) -> (i32, i32, i32) {
    %c0_i32 = arith.constant 0 : i32
    %c0_i32_0 = arith.constant 0 : i32
    %c0_i32_1 = arith.constant 0 : i32
    return %arg0, %c0_i32, %c0_i32_0 : i32, i32, i32
  }
  func.func @transform_2(%arg0: i32, %arg1: i32) -> (i32, i32, i32) {
    %c0_i32 = arith.constant 0 : i32
    %c0_i32_0 = arith.constant 0 : i32
    return %arg0, %arg1, %c0_i32 : i32, i32, i32
  }
}

module attributes {stable_mosaic.version = 11 : i64} {
  func.func @_cov_mlp1_kernel(%arg0: i32, %arg1: i32, %arg2: memref<1x16x3xf32, #tpu.memory_space<vmem>>, %arg3: memref<1x16x3xf32, #tpu.memory_space<vmem>>, %arg4: memref<1x16x3xf32, #tpu.memory_space<vmem>>, %arg5: memref<12x64xf32, #tpu.memory_space<vmem>>, %arg6: memref<1x64xf32, #tpu.memory_space<vmem>>, %arg7: memref<64x64xf32, #tpu.memory_space<vmem>>, %arg8: memref<1x64xf32, #tpu.memory_space<vmem>>, %arg9: memref<64x64xf32, #tpu.memory_space<vmem>>, %arg10: memref<1x64xf32, #tpu.memory_space<vmem>>, %arg11: memref<1x16x64xf32, #tpu.memory_space<vmem>>) attributes {dimension_semantics = [#tpu.dimension_semantics<parallel>, #tpu.dimension_semantics<parallel>], iteration_bounds = array<i64: 2, 1>, scalar_prefetch = 0 : i64, scratch_operands = 0 : i64, tpu.core_type = #tpu.core_type<tc>, window_params = [{transform_indices = @transform_0, window_bounds = array<i64: 1, 16, 3>}, {transform_indices = @transform_1, window_bounds = array<i64: 1, 16, 3>}, {transform_indices = @transform_2, window_bounds = array<i64: 1, 16, 3>}, {pipeline_mode = #tpu.pipeline_mode<synchronous>, transform_indices = @transform_3, window_bounds = array<i64: 12, 64>}, {pipeline_mode = #tpu.pipeline_mode<synchronous>, transform_indices = @transform_4, window_bounds = array<i64: 1, 64>}, {pipeline_mode = #tpu.pipeline_mode<synchronous>, transform_indices = @transform_5, window_bounds = array<i64: 64, 64>}, {pipeline_mode = #tpu.pipeline_mode<synchronous>, transform_indices = @transform_6, window_bounds = array<i64: 1, 64>}, {pipeline_mode = #tpu.pipeline_mode<synchronous>, transform_indices = @transform_7, window_bounds = array<i64: 64, 64>}, {pipeline_mode = #tpu.pipeline_mode<synchronous>, transform_indices = @transform_8, window_bounds = array<i64: 1, 64>}, {transform_indices = @transform_9, window_bounds = array<i64: 1, 16, 64>}]} {
    %c0 = arith.constant 0 : index
    %c0_0 = arith.constant 0 : index
    %c0_1 = arith.constant 0 : index
    %0 = vector.load %arg2[%c0, %c0_0, %c0_1] : memref<1x16x3xf32, #tpu.memory_space<vmem>>, vector<1x16x3xf32>
    %1 = vector.shape_cast %0 : vector<1x16x3xf32> to vector<16x3xf32>
    %c0_2 = arith.constant 0 : index
    %c0_3 = arith.constant 0 : index
    %c0_4 = arith.constant 0 : index
    %2 = vector.load %arg3[%c0_2, %c0_3, %c0_4] : memref<1x16x3xf32, #tpu.memory_space<vmem>>, vector<1x16x3xf32>
    %3 = vector.shape_cast %2 : vector<1x16x3xf32> to vector<16x3xf32>
    %c0_5 = arith.constant 0 : index
    %c0_6 = arith.constant 0 : index
    %c0_7 = arith.constant 0 : index
    %4 = vector.load %arg4[%c0_5, %c0_6, %c0_7] : memref<1x16x3xf32, #tpu.memory_space<vmem>>, vector<1x16x3xf32>
    %5 = vector.shape_cast %4 : vector<1x16x3xf32> to vector<16x3xf32>
    %6 = vector.extract_strided_slice %1 {offsets = [0, 0], sizes = [16, 1], strides = [1, 1]} : vector<16x3xf32> to vector<16x1xf32>
    %7 = vector.extract_strided_slice %1 {offsets = [0, 1], sizes = [16, 1], strides = [1, 1]} : vector<16x3xf32> to vector<16x1xf32>
    %8 = vector.extract_strided_slice %1 {offsets = [0, 2], sizes = [16, 1], strides = [1, 1]} : vector<16x3xf32> to vector<16x1xf32>
    %9 = vector.extract_strided_slice %3 {offsets = [0, 0], sizes = [16, 1], strides = [1, 1]} : vector<16x3xf32> to vector<16x1xf32>
    %10 = vector.extract_strided_slice %5 {offsets = [0, 0], sizes = [16, 1], strides = [1, 1]} : vector<16x3xf32> to vector<16x1xf32>
    %11 = arith.mulf %9, %10 : vector<16x1xf32>
    %12 = vector.extract_strided_slice %3 {offsets = [0, 0], sizes = [16, 1], strides = [1, 1]} : vector<16x3xf32> to vector<16x1xf32>
    %13 = vector.extract_strided_slice %5 {offsets = [0, 1], sizes = [16, 1], strides = [1, 1]} : vector<16x3xf32> to vector<16x1xf32>
    %14 = arith.mulf %12, %13 : vector<16x1xf32>
    %15 = vector.extract_strided_slice %3 {offsets = [0, 0], sizes = [16, 1], strides = [1, 1]} : vector<16x3xf32> to vector<16x1xf32>
    %16 = vector.extract_strided_slice %5 {offsets = [0, 2], sizes = [16, 1], strides = [1, 1]} : vector<16x3xf32> to vector<16x1xf32>
    %17 = arith.mulf %15, %16 : vector<16x1xf32>
    %18 = vector.extract_strided_slice %3 {offsets = [0, 1], sizes = [16, 1], strides = [1, 1]} : vector<16x3xf32> to vector<16x1xf32>
    %19 = vector.extract_strided_slice %5 {offsets = [0, 0], sizes = [16, 1], strides = [1, 1]} : vector<16x3xf32> to vector<16x1xf32>
    %20 = arith.mulf %18, %19 : vector<16x1xf32>
    %21 = vector.extract_strided_slice %3 {offsets = [0, 1], sizes = [16, 1], strides = [1, 1]} : vector<16x3xf32> to vector<16x1xf32>
    %22 = vector.extract_strided_slice %5 {offsets = [0, 1], sizes = [16, 1], strides = [1, 1]} : vector<16x3xf32> to vector<16x1xf32>
    %23 = arith.mulf %21, %22 : vector<16x1xf32>
    %24 = vector.extract_strided_slice %3 {offsets = [0, 1], sizes = [16, 1], strides = [1, 1]} : vector<16x3xf32> to vector<16x1xf32>
    %25 = vector.extract_strided_slice %5 {offsets = [0, 2], sizes = [16, 1], strides = [1, 1]} : vector<16x3xf32> to vector<16x1xf32>
    %26 = arith.mulf %24, %25 : vector<16x1xf32>
    %27 = vector.extract_strided_slice %3 {offsets = [0, 2], sizes = [16, 1], strides = [1, 1]} : vector<16x3xf32> to vector<16x1xf32>
    %28 = vector.extract_strided_slice %5 {offsets = [0, 0], sizes = [16, 1], strides = [1, 1]} : vector<16x3xf32> to vector<16x1xf32>
    %29 = arith.mulf %27, %28 : vector<16x1xf32>
    %30 = vector.extract_strided_slice %3 {offsets = [0, 2], sizes = [16, 1], strides = [1, 1]} : vector<16x3xf32> to vector<16x1xf32>
    %31 = vector.extract_strided_slice %5 {offsets = [0, 1], sizes = [16, 1], strides = [1, 1]} : vector<16x3xf32> to vector<16x1xf32>
    %32 = arith.mulf %30, %31 : vector<16x1xf32>
    %33 = vector.extract_strided_slice %3 {offsets = [0, 2], sizes = [16, 1], strides = [1, 1]} : vector<16x3xf32> to vector<16x1xf32>
    %34 = vector.extract_strided_slice %5 {offsets = [0, 2], sizes = [16, 1], strides = [1, 1]} : vector<16x3xf32> to vector<16x1xf32>
    %35 = arith.mulf %33, %34 : vector<16x1xf32>
    %c0_8 = arith.constant 0 : index
    %c0_9 = arith.constant 0 : index
    %36 = vector.load %arg6[%c0_8, %c0_9] : memref<1x64xf32, #tpu.memory_space<vmem>>, vector<1x64xf32>
    %c0_10 = arith.constant 0 : index
    %c0_11 = arith.constant 0 : index
    %37 = vector.load %arg5[%c0_10, %c0_11] : memref<12x64xf32, #tpu.memory_space<vmem>>, vector<1x64xf32>
    %38 = vector.broadcast %6 : vector<16x1xf32> to vector<16x64xf32>
    %39 = vector.broadcast %37 : vector<1x64xf32> to vector<16x64xf32>
    %40 = arith.mulf %38, %39 : vector<16x64xf32>
    %41 = vector.broadcast %36 : vector<1x64xf32> to vector<16x64xf32>
    %42 = arith.addf %41, %40 : vector<16x64xf32>
    %c1 = arith.constant 1 : index
    %c0_12 = arith.constant 0 : index
    %43 = vector.load %arg5[%c1, %c0_12] : memref<12x64xf32, #tpu.memory_space<vmem>>, vector<1x64xf32>
    %44 = vector.broadcast %7 : vector<16x1xf32> to vector<16x64xf32>
    %45 = vector.broadcast %43 : vector<1x64xf32> to vector<16x64xf32>
    %46 = arith.mulf %44, %45 : vector<16x64xf32>
    %47 = arith.addf %42, %46 : vector<16x64xf32>
    %c2 = arith.constant 2 : index
    %c0_13 = arith.constant 0 : index
    %48 = vector.load %arg5[%c2, %c0_13] : memref<12x64xf32, #tpu.memory_space<vmem>>, vector<1x64xf32>
    %49 = vector.broadcast %8 : vector<16x1xf32> to vector<16x64xf32>
    %50 = vector.broadcast %48 : vector<1x64xf32> to vector<16x64xf32>
    %51 = arith.mulf %49, %50 : vector<16x64xf32>
    %52 = arith.addf %47, %51 : vector<16x64xf32>
    %c3 = arith.constant 3 : index
    %c0_14 = arith.constant 0 : index
    %53 = vector.load %arg5[%c3, %c0_14] : memref<12x64xf32, #tpu.memory_space<vmem>>, vector<1x64xf32>
    %54 = vector.broadcast %11 : vector<16x1xf32> to vector<16x64xf32>
    %55 = vector.broadcast %53 : vector<1x64xf32> to vector<16x64xf32>
    %56 = arith.mulf %54, %55 : vector<16x64xf32>
    %57 = arith.addf %52, %56 : vector<16x64xf32>
    %c4 = arith.constant 4 : index
    %c0_15 = arith.constant 0 : index
    %58 = vector.load %arg5[%c4, %c0_15] : memref<12x64xf32, #tpu.memory_space<vmem>>, vector<1x64xf32>
    %59 = vector.broadcast %14 : vector<16x1xf32> to vector<16x64xf32>
    %60 = vector.broadcast %58 : vector<1x64xf32> to vector<16x64xf32>
    %61 = arith.mulf %59, %60 : vector<16x64xf32>
    %62 = arith.addf %57, %61 : vector<16x64xf32>
    %c5 = arith.constant 5 : index
    %c0_16 = arith.constant 0 : index
    %63 = vector.load %arg5[%c5, %c0_16] : memref<12x64xf32, #tpu.memory_space<vmem>>, vector<1x64xf32>
    %64 = vector.broadcast %17 : vector<16x1xf32> to vector<16x64xf32>
    %65 = vector.broadcast %63 : vector<1x64xf32> to vector<16x64xf32>
    %66 = arith.mulf %64, %65 : vector<16x64xf32>
    %67 = arith.addf %62, %66 : vector<16x64xf32>
    %c6 = arith.constant 6 : index
    %c0_17 = arith.constant 0 : index
    %68 = vector.load %arg5[%c6, %c0_17] : memref<12x64xf32, #tpu.memory_space<vmem>>, vector<1x64xf32>
    %69 = vector.broadcast %20 : vector<16x1xf32> to vector<16x64xf32>
    %70 = vector.broadcast %68 : vector<1x64xf32> to vector<16x64xf32>
    %71 = arith.mulf %69, %70 : vector<16x64xf32>
    %72 = arith.addf %67, %71 : vector<16x64xf32>
    %c7 = arith.constant 7 : index
    %c0_18 = arith.constant 0 : index
    %73 = vector.load %arg5[%c7, %c0_18] : memref<12x64xf32, #tpu.memory_space<vmem>>, vector<1x64xf32>
    %74 = vector.broadcast %23 : vector<16x1xf32> to vector<16x64xf32>
    %75 = vector.broadcast %73 : vector<1x64xf32> to vector<16x64xf32>
    %76 = arith.mulf %74, %75 : vector<16x64xf32>
    %77 = arith.addf %72, %76 : vector<16x64xf32>
    %c8 = arith.constant 8 : index
    %c0_19 = arith.constant 0 : index
    %78 = vector.load %arg5[%c8, %c0_19] : memref<12x64xf32, #tpu.memory_space<vmem>>, vector<1x64xf32>
    %79 = vector.broadcast %26 : vector<16x1xf32> to vector<16x64xf32>
    %80 = vector.broadcast %78 : vector<1x64xf32> to vector<16x64xf32>
    %81 = arith.mulf %79, %80 : vector<16x64xf32>
    %82 = arith.addf %77, %81 : vector<16x64xf32>
    %c9 = arith.constant 9 : index
    %c0_20 = arith.constant 0 : index
    %83 = vector.load %arg5[%c9, %c0_20] : memref<12x64xf32, #tpu.memory_space<vmem>>, vector<1x64xf32>
    %84 = vector.broadcast %29 : vector<16x1xf32> to vector<16x64xf32>
    %85 = vector.broadcast %83 : vector<1x64xf32> to vector<16x64xf32>
    %86 = arith.mulf %84, %85 : vector<16x64xf32>
    %87 = arith.addf %82, %86 : vector<16x64xf32>
    %c10 = arith.constant 10 : index
    %c0_21 = arith.constant 0 : index
    %88 = vector.load %arg5[%c10, %c0_21] : memref<12x64xf32, #tpu.memory_space<vmem>>, vector<1x64xf32>
    %89 = vector.broadcast %32 : vector<16x1xf32> to vector<16x64xf32>
    %90 = vector.broadcast %88 : vector<1x64xf32> to vector<16x64xf32>
    %91 = arith.mulf %89, %90 : vector<16x64xf32>
    %92 = arith.addf %87, %91 : vector<16x64xf32>
    %c11 = arith.constant 11 : index
    %c0_22 = arith.constant 0 : index
    %93 = vector.load %arg5[%c11, %c0_22] : memref<12x64xf32, #tpu.memory_space<vmem>>, vector<1x64xf32>
    %94 = vector.broadcast %35 : vector<16x1xf32> to vector<16x64xf32>
    %95 = vector.broadcast %93 : vector<1x64xf32> to vector<16x64xf32>
    %96 = arith.mulf %94, %95 : vector<16x64xf32>
    %97 = arith.addf %92, %96 : vector<16x64xf32>
    %cst = arith.constant 0.000000e+00 : f32
    %98 = vector.broadcast %cst : f32 to vector<16x64xf32>
    %99 = arith.maximumf %97, %98 : vector<16x64xf32>
    %c0_23 = arith.constant 0 : index
    %c0_24 = arith.constant 0 : index
    %100 = vector.load %arg7[%c0_23, %c0_24] : memref<64x64xf32, #tpu.memory_space<vmem>>, vector<64x64xf32>
    %101 = arith.truncf %99 : vector<16x64xf32> to vector<16x64xbf16>
    %102 = arith.truncf %100 : vector<64x64xf32> to vector<64x64xbf16>
    %cst_25 = arith.constant dense<0.000000e+00> : vector<16x64xf32>
    %103 = tpu.matmul %101, %102, %cst_25 {dimension_numbers = #tpu.dot_dimension_numbers<[1], [0], [0], [1], [0, 0, 1, 1], [], []>} : vector<16x64xbf16>, vector<64x64xbf16>, vector<16x64xf32> -> vector<16x64xf32>
    %c0_26 = arith.constant 0 : index
    %c0_27 = arith.constant 0 : index
    %104 = vector.load %arg8[%c0_26, %c0_27] : memref<1x64xf32, #tpu.memory_space<vmem>>, vector<1x64xf32>
    %105 = vector.broadcast %104 : vector<1x64xf32> to vector<16x64xf32>
    %106 = arith.addf %103, %105 : vector<16x64xf32>
    %cst_28 = arith.constant 0.000000e+00 : f32
    %107 = vector.broadcast %cst_28 : f32 to vector<16x64xf32>
    %108 = arith.maximumf %106, %107 : vector<16x64xf32>
    %c0_29 = arith.constant 0 : index
    %c0_30 = arith.constant 0 : index
    %109 = vector.load %arg9[%c0_29, %c0_30] : memref<64x64xf32, #tpu.memory_space<vmem>>, vector<64x64xf32>
    %110 = arith.truncf %108 : vector<16x64xf32> to vector<16x64xbf16>
    %111 = arith.truncf %109 : vector<64x64xf32> to vector<64x64xbf16>
    %cst_31 = arith.constant dense<0.000000e+00> : vector<16x64xf32>
    %112 = tpu.matmul %110, %111, %cst_31 {dimension_numbers = #tpu.dot_dimension_numbers<[1], [0], [0], [1], [0, 0, 1, 1], [], []>} : vector<16x64xbf16>, vector<64x64xbf16>, vector<16x64xf32> -> vector<16x64xf32>
    %c0_32 = arith.constant 0 : index
    %c0_33 = arith.constant 0 : index
    %113 = vector.load %arg10[%c0_32, %c0_33] : memref<1x64xf32, #tpu.memory_space<vmem>>, vector<1x64xf32>
    %114 = vector.broadcast %113 : vector<1x64xf32> to vector<16x64xf32>
    %115 = arith.addf %112, %114 : vector<16x64xf32>
    %cst_34 = arith.constant 0.000000e+00 : f32
    %116 = vector.broadcast %cst_34 : f32 to vector<16x64xf32>
    %117 = arith.maximumf %115, %116 : vector<16x64xf32>
    %c0_35 = arith.constant 0 : index
    %c0_36 = arith.constant 0 : index
    %c0_37 = arith.constant 0 : index
    %118 = vector.load %arg11[%c0_35, %c0_36, %c0_37] : memref<1x16x64xf32, #tpu.memory_space<vmem>>, vector<1x16x64xf32>
    %119 = vector.shape_cast %118 : vector<1x16x64xf32> to vector<16x64xf32>
    %120 = vector.shape_cast %117 : vector<16x64xf32> to vector<1x16x64xf32>
    tpu.vector_store %arg11[%c0_35, %c0_36, %c0_37], %120 {strides = array<i32>} : memref<1x16x64xf32, #tpu.memory_space<vmem>>, vector<1x16x64xf32>,
    return
  }
  func.func @transform_0(%arg0: i32, %arg1: i32) -> (i32, i32, i32) {
    %c0_i32 = arith.constant 0 : i32
    %c0_i32_0 = arith.constant 0 : i32
    return %arg0, %arg1, %c0_i32 : i32, i32, i32
  }
  func.func @transform_1(%arg0: i32, %arg1: i32) -> (i32, i32, i32) {
    %c0_i32 = arith.constant 0 : i32
    %c0_i32_0 = arith.constant 0 : i32
    return %arg0, %arg1, %c0_i32 : i32, i32, i32
  }
  func.func @transform_2(%arg0: i32, %arg1: i32) -> (i32, i32, i32) {
    %c0_i32 = arith.constant 0 : i32
    %c0_i32_0 = arith.constant 0 : i32
    return %arg0, %arg1, %c0_i32 : i32, i32, i32
  }
  func.func @transform_3(%arg0: i32, %arg1: i32) -> (i32, i32) {
    %c0_i32 = arith.constant 0 : i32
    %c0_i32_0 = arith.constant 0 : i32
    %c0_i32_1 = arith.constant 0 : i32
    return %c0_i32, %c0_i32_0 : i32, i32
  }
  func.func @transform_4(%arg0: i32, %arg1: i32) -> (i32, i32) {
    %c0_i32 = arith.constant 0 : i32
    %c0_i32_0 = arith.constant 0 : i32
    %c0_i32_1 = arith.constant 0 : i32
    return %c0_i32, %c0_i32_0 : i32, i32
  }
  func.func @transform_5(%arg0: i32, %arg1: i32) -> (i32, i32) {
    %c0_i32 = arith.constant 0 : i32
    %c0_i32_0 = arith.constant 0 : i32
    %c0_i32_1 = arith.constant 0 : i32
    return %c0_i32, %c0_i32_0 : i32, i32
  }
  func.func @transform_6(%arg0: i32, %arg1: i32) -> (i32, i32) {
    %c0_i32 = arith.constant 0 : i32
    %c0_i32_0 = arith.constant 0 : i32
    %c0_i32_1 = arith.constant 0 : i32
    return %c0_i32, %c0_i32_0 : i32, i32
  }
  func.func @transform_7(%arg0: i32, %arg1: i32) -> (i32, i32) {
    %c0_i32 = arith.constant 0 : i32
    %c0_i32_0 = arith.constant 0 : i32
    %c0_i32_1 = arith.constant 0 : i32
    return %c0_i32, %c0_i32_0 : i32, i32
  }
  func.func @transform_8(%arg0: i32, %arg1: i32) -> (i32, i32) {
    %c0_i32 = arith.constant 0 : i32
    %c0_i32_0 = arith.constant 0 : i32
    %c0_i32_1 = arith.constant 0 : i32
    return %c0_i32, %c0_i32_0 : i32, i32
  }
  func.func @transform_9(%arg0: i32, %arg1: i32) -> (i32, i32, i32) {
    %c0_i32 = arith.constant 0 : i32
    %c0_i32_0 = arith.constant 0 : i32
    return %arg0, %arg1, %c0_i32 : i32, i32, i32
  }
}

module attributes {stable_mosaic.version = 11 : i64} {
  func.func @_graph1_kernel(%arg0: i32, %arg1: i32, %arg2: memref<1x16x4x64xf32, #tpu.memory_space<vmem>>, %arg3: memref<64x64xf32, #tpu.memory_space<vmem>>, %arg4: memref<1x64xf32, #tpu.memory_space<vmem>>, %arg5: memref<64x128xf32, #tpu.memory_space<vmem>>, %arg6: memref<1x128xf32, #tpu.memory_space<vmem>>, %arg7: memref<1x16x128xf32, #tpu.memory_space<vmem>>) attributes {dimension_semantics = [#tpu.dimension_semantics<parallel>, #tpu.dimension_semantics<parallel>], iteration_bounds = array<i64: 2, 1>, scalar_prefetch = 0 : i64, scratch_operands = 0 : i64, tpu.core_type = #tpu.core_type<tc>, window_params = [{transform_indices = @transform_0, window_bounds = array<i64: 1, 16, 4, 64>}, {pipeline_mode = #tpu.pipeline_mode<synchronous>, transform_indices = @transform_1, window_bounds = array<i64: 64, 64>}, {pipeline_mode = #tpu.pipeline_mode<synchronous>, transform_indices = @transform_2, window_bounds = array<i64: 1, 64>}, {pipeline_mode = #tpu.pipeline_mode<synchronous>, transform_indices = @transform_3, window_bounds = array<i64: 64, 128>}, {pipeline_mode = #tpu.pipeline_mode<synchronous>, transform_indices = @transform_4, window_bounds = array<i64: 1, 128>}, {transform_indices = @transform_5, window_bounds = array<i64: 1, 16, 128>}]} {
    %c0 = arith.constant 0 : index
    %c0_0 = arith.constant 0 : index
    %c0_1 = arith.constant 0 : index
    %c0_2 = arith.constant 0 : index
    %0 = vector.load %arg2[%c0, %c0_0, %c0_1, %c0_2] : memref<1x16x4x64xf32, #tpu.memory_space<vmem>>, vector<1x16x4x64xf32>
    %1 = vector.shape_cast %0 : vector<1x16x4x64xf32> to vector<16x4x64xf32>
    %cst = arith.constant dense<0xFF800000> : vector<16x64xf32>
    %2 = vector.multi_reduction <maximumf>, %1, %cst [1] : vector<16x4x64xf32> to vector<16x64xf32>
    %c0_3 = arith.constant 0 : index
    %c0_4 = arith.constant 0 : index
    %3 = vector.load %arg3[%c0_3, %c0_4] : memref<64x64xf32, #tpu.memory_space<vmem>>, vector<64x64xf32>
    %4 = arith.truncf %2 : vector<16x64xf32> to vector<16x64xbf16>
    %5 = arith.truncf %3 : vector<64x64xf32> to vector<64x64xbf16>
    %cst_5 = arith.constant dense<0.000000e+00> : vector<16x64xf32>
    %6 = tpu.matmul %4, %5, %cst_5 {dimension_numbers = #tpu.dot_dimension_numbers<[1], [0], [0], [1], [0, 0, 1, 1], [], []>} : vector<16x64xbf16>, vector<64x64xbf16>, vector<16x64xf32> -> vector<16x64xf32>
    %c0_6 = arith.constant 0 : index
    %c0_7 = arith.constant 0 : index
    %7 = vector.load %arg4[%c0_6, %c0_7] : memref<1x64xf32, #tpu.memory_space<vmem>>, vector<1x64xf32>
    %8 = vector.broadcast %7 : vector<1x64xf32> to vector<16x64xf32>
    %9 = arith.addf %6, %8 : vector<16x64xf32>
    %c0_8 = arith.constant 0 : index
    %c0_9 = arith.constant 0 : index
    %10 = vector.load %arg5[%c0_8, %c0_9] : memref<64x128xf32, #tpu.memory_space<vmem>>, vector<64x128xf32>
    %11 = arith.truncf %9 : vector<16x64xf32> to vector<16x64xbf16>
    %12 = arith.truncf %10 : vector<64x128xf32> to vector<64x128xbf16>
    %cst_10 = arith.constant dense<0.000000e+00> : vector<16x128xf32>
    %13 = tpu.matmul %11, %12, %cst_10 {dimension_numbers = #tpu.dot_dimension_numbers<[1], [0], [0], [1], [0, 0, 1, 1], [], []>} : vector<16x64xbf16>, vector<64x128xbf16>, vector<16x128xf32> -> vector<16x128xf32>
    %c0_11 = arith.constant 0 : index
    %c0_12 = arith.constant 0 : index
    %14 = vector.load %arg6[%c0_11, %c0_12] : memref<1x128xf32, #tpu.memory_space<vmem>>, vector<1x128xf32>
    %15 = vector.broadcast %14 : vector<1x128xf32> to vector<16x128xf32>
    %16 = arith.addf %13, %15 : vector<16x128xf32>
    %cst_13 = arith.constant 0.000000e+00 : f32
    %17 = vector.broadcast %cst_13 : f32 to vector<16x128xf32>
    %18 = arith.maximumf %16, %17 : vector<16x128xf32>
    %c0_14 = arith.constant 0 : index
    %c0_15 = arith.constant 0 : index
    %c0_16 = arith.constant 0 : index
    %19 = vector.load %arg7[%c0_14, %c0_15, %c0_16] : memref<1x16x128xf32, #tpu.memory_space<vmem>>, vector<1x16x128xf32>
    %20 = vector.shape_cast %19 : vector<1x16x128xf32> to vector<16x128xf32>
    %21 = vector.shape_cast %18 : vector<16x128xf32> to vector<1x16x128xf32>
    tpu.vector_store %arg7[%c0_14, %c0_15, %c0_16], %21 {strides = array<i32>} : memref<1x16x128xf32, #tpu.memory_space<vmem>>, vector<1x16x128xf32>,
    return
  }
  func.func @transform_0(%arg0: i32, %arg1: i32) -> (i32, i32, i32, i32) {
    %c0_i32 = arith.constant 0 : i32
    %c0_i32_0 = arith.constant 0 : i32
    %c0_i32_1 = arith.constant 0 : i32
    return %arg0, %arg1, %c0_i32, %c0_i32_0 : i32, i32, i32, i32
  }
  func.func @transform_1(%arg0: i32, %arg1: i32) -> (i32, i32) {
    %c0_i32 = arith.constant 0 : i32
    %c0_i32_0 = arith.constant 0 : i32
    %c0_i32_1 = arith.constant 0 : i32
    return %c0_i32, %c0_i32_0 : i32, i32
  }
  func.func @transform_2(%arg0: i32, %arg1: i32) -> (i32, i32) {
    %c0_i32 = arith.constant 0 : i32
    %c0_i32_0 = arith.constant 0 : i32
    %c0_i32_1 = arith.constant 0 : i32
    return %c0_i32, %c0_i32_0 : i32, i32
  }
  func.func @transform_3(%arg0: i32, %arg1: i32) -> (i32, i32) {
    %c0_i32 = arith.constant 0 : i32
    %c0_i32_0 = arith.constant 0 : i32
    %c0_i32_1 = arith.constant 0 : i32
    return %c0_i32, %c0_i32_0 : i32, i32
  }
  func.func @transform_4(%arg0: i32, %arg1: i32) -> (i32, i32) {
    %c0_i32 = arith.constant 0 : i32
    %c0_i32_0 = arith.constant 0 : i32
    %c0_i32_1 = arith.constant 0 : i32
    return %c0_i32, %c0_i32_0 : i32, i32
  }
  func.func @transform_5(%arg0: i32, %arg1: i32) -> (i32, i32, i32) {
    %c0_i32 = arith.constant 0 : i32
    %c0_i32_0 = arith.constant 0 : i32
    return %arg0, %arg1, %c0_i32 : i32, i32, i32
  }
}

module attributes {stable_mosaic.version = 11 : i64} {
  func.func @_graph2_head_kernel(%arg0: i32, %arg1: i32, %arg2: memref<1x16x4x128xf32, #tpu.memory_space<vmem>>, %arg3: memref<128x128xf32, #tpu.memory_space<vmem>>, %arg4: memref<1x128xf32, #tpu.memory_space<vmem>>, %arg5: memref<128x1024xf32, #tpu.memory_space<vmem>>, %arg6: memref<1x1024xf32, #tpu.memory_space<vmem>>, %arg7: memref<1024x32xf32, #tpu.memory_space<vmem>>, %arg8: memref<1x32xf32, #tpu.memory_space<vmem>>, %arg9: memref<32x32xf32, #tpu.memory_space<vmem>>, %arg10: memref<1x32xf32, #tpu.memory_space<vmem>>, %arg11: memref<1x1x32xf32, #tpu.memory_space<vmem>>, %arg12: memref<1x1024xf32, #tpu.memory_space<vmem>>) attributes {dimension_semantics = [#tpu.dimension_semantics<parallel>, #tpu.dimension_semantics<arbitrary>], iteration_bounds = array<i64: 2, 1>, scalar_prefetch = 0 : i64, scratch_operands = 1 : i64, tpu.core_type = #tpu.core_type<tc>, window_params = [{transform_indices = @transform_0, window_bounds = array<i64: 1, 16, 4, 128>}, {pipeline_mode = #tpu.pipeline_mode<synchronous>, transform_indices = @transform_1, window_bounds = array<i64: 128, 128>}, {pipeline_mode = #tpu.pipeline_mode<synchronous>, transform_indices = @transform_2, window_bounds = array<i64: 1, 128>}, {pipeline_mode = #tpu.pipeline_mode<synchronous>, transform_indices = @transform_3, window_bounds = array<i64: 128, 1024>}, {pipeline_mode = #tpu.pipeline_mode<synchronous>, transform_indices = @transform_4, window_bounds = array<i64: 1, 1024>}, {pipeline_mode = #tpu.pipeline_mode<synchronous>, transform_indices = @transform_5, window_bounds = array<i64: 1024, 32>}, {pipeline_mode = #tpu.pipeline_mode<synchronous>, transform_indices = @transform_6, window_bounds = array<i64: 1, 32>}, {pipeline_mode = #tpu.pipeline_mode<synchronous>, transform_indices = @transform_7, window_bounds = array<i64: 32, 32>}, {pipeline_mode = #tpu.pipeline_mode<synchronous>, transform_indices = @transform_8, window_bounds = array<i64: 1, 32>}, {transform_indices = @transform_9, window_bounds = array<i64: 1, 1, 32>}]} {
    %c0 = arith.constant 0 : index
    %c0_0 = arith.constant 0 : index
    %c0_1 = arith.constant 0 : index
    %c0_2 = arith.constant 0 : index
    %0 = vector.load %arg2[%c0, %c0_0, %c0_1, %c0_2] : memref<1x16x4x128xf32, #tpu.memory_space<vmem>>, vector<1x16x4x128xf32>
    %1 = vector.shape_cast %0 : vector<1x16x4x128xf32> to vector<16x4x128xf32>
    %cst = arith.constant dense<0xFF800000> : vector<16x128xf32>
    %2 = vector.multi_reduction <maximumf>, %1, %cst [1] : vector<16x4x128xf32> to vector<16x128xf32>
    %c0_3 = arith.constant 0 : index
    %c0_4 = arith.constant 0 : index
    %3 = vector.load %arg3[%c0_3, %c0_4] : memref<128x128xf32, #tpu.memory_space<vmem>>, vector<128x128xf32>
    %4 = arith.truncf %2 : vector<16x128xf32> to vector<16x128xbf16>
    %5 = arith.truncf %3 : vector<128x128xf32> to vector<128x128xbf16>
    %cst_5 = arith.constant dense<0.000000e+00> : vector<16x128xf32>
    %6 = tpu.matmul %4, %5, %cst_5 {dimension_numbers = #tpu.dot_dimension_numbers<[1], [0], [0], [1], [0, 0, 1, 1], [], []>} : vector<16x128xbf16>, vector<128x128xbf16>, vector<16x128xf32> -> vector<16x128xf32>
    %c0_6 = arith.constant 0 : index
    %c0_7 = arith.constant 0 : index
    %7 = vector.load %arg4[%c0_6, %c0_7] : memref<1x128xf32, #tpu.memory_space<vmem>>, vector<1x128xf32>
    %8 = vector.broadcast %7 : vector<1x128xf32> to vector<16x128xf32>
    %9 = arith.addf %6, %8 : vector<16x128xf32>
    %c0_8 = arith.constant 0 : index
    %c0_9 = arith.constant 0 : index
    %10 = vector.load %arg5[%c0_8, %c0_9] : memref<128x1024xf32, #tpu.memory_space<vmem>>, vector<128x1024xf32>
    %11 = arith.truncf %9 : vector<16x128xf32> to vector<16x128xbf16>
    %12 = arith.truncf %10 : vector<128x1024xf32> to vector<128x1024xbf16>
    %cst_10 = arith.constant dense<0.000000e+00> : vector<16x1024xf32>
    %13 = tpu.matmul %11, %12, %cst_10 {dimension_numbers = #tpu.dot_dimension_numbers<[1], [0], [0], [1], [0, 0, 1, 1], [], []>} : vector<16x128xbf16>, vector<128x1024xbf16>, vector<16x1024xf32> -> vector<16x1024xf32>
    %c0_11 = arith.constant 0 : index
    %c0_12 = arith.constant 0 : index
    %14 = vector.load %arg6[%c0_11, %c0_12] : memref<1x1024xf32, #tpu.memory_space<vmem>>, vector<1x1024xf32>
    %15 = vector.broadcast %14 : vector<1x1024xf32> to vector<16x1024xf32>
    %16 = arith.addf %13, %15 : vector<16x1024xf32>
    %cst_13 = arith.constant dense<0xFF800000> : vector<1024xf32>
    %17 = vector.multi_reduction <maximumf>, %16, %cst_13 [0] : vector<16x1024xf32> to vector<1024xf32>
    %18 = vector.shape_cast %17 : vector<1024xf32> to vector<1x1024xf32>
    %c0_i32 = arith.constant 0 : i32
    %19 = arith.cmpi eq, %arg1, %c0_i32 : i32
    %20 = arith.extui %19 : i1 to i32
    %c0_i32_14 = arith.constant 0 : i32
    %21 = arith.cmpi ne, %20, %c0_i32_14 : i32
    scf.if %21 {
      %cst_21 = arith.constant 0xFF800000 : f32
      %28 = vector.broadcast %cst_21 : f32 to vector<1x1024xf32>
      %c0_22 = arith.constant 0 : index
      %c0_23 = arith.constant 0 : index
      %29 = vector.load %arg12[%c0_22, %c0_23] : memref<1x1024xf32, #tpu.memory_space<vmem>>, vector<1x1024xf32>
      tpu.vector_store %arg12[%c0_22, %c0_23], %28 {strides = array<i32>} : memref<1x1024xf32, #tpu.memory_space<vmem>>, vector<1x1024xf32>,
    } else {
    }
    %c0_15 = arith.constant 0 : index
    %c0_16 = arith.constant 0 : index
    %22 = vector.load %arg12[%c0_15, %c0_16] : memref<1x1024xf32, #tpu.memory_space<vmem>>, vector<1x1024xf32>
    %23 = arith.maximumf %22, %18 : vector<1x1024xf32>
    %c0_17 = arith.constant 0 : index
    %c0_18 = arith.constant 0 : index
    %24 = vector.load %arg12[%c0_17, %c0_18] : memref<1x1024xf32, #tpu.memory_space<vmem>>, vector<1x1024xf32>
    tpu.vector_store %arg12[%c0_17, %c0_18], %23 {strides = array<i32>} : memref<1x1024xf32, #tpu.memory_space<vmem>>, vector<1x1024xf32>,
    %c0_i32_19 = arith.constant 0 : i32
    %25 = arith.cmpi eq, %arg1, %c0_i32_19 : i32
    %26 = arith.extui %25 : i1 to i32
    %c0_i32_20 = arith.constant 0 : i32
    %27 = arith.cmpi ne, %26, %c0_i32_20 : i32
    scf.if %27 {
      %c0_21 = arith.constant 0 : index
      %c0_22 = arith.constant 0 : index
      %28 = vector.load %arg12[%c0_21, %c0_22] : memref<1x1024xf32, #tpu.memory_space<vmem>>, vector<1x1024xf32>
      %c0_23 = arith.constant 0 : index
      %c0_24 = arith.constant 0 : index
      %29 = vector.load %arg7[%c0_23, %c0_24] : memref<1024x32xf32, #tpu.memory_space<vmem>>, vector<1024x32xf32>
      %30 = arith.truncf %28 : vector<1x1024xf32> to vector<1x1024xbf16>
      %31 = arith.truncf %29 : vector<1024x32xf32> to vector<1024x32xbf16>
      %cst_25 = arith.constant dense<0.000000e+00> : vector<1x32xf32>
      %32 = tpu.matmul %30, %31, %cst_25 {dimension_numbers = #tpu.dot_dimension_numbers<[1], [0], [0], [1], [0, 0, 1, 1], [], []>} : vector<1x1024xbf16>, vector<1024x32xbf16>, vector<1x32xf32> -> vector<1x32xf32>
      %c0_26 = arith.constant 0 : index
      %c0_27 = arith.constant 0 : index
      %33 = vector.load %arg8[%c0_26, %c0_27] : memref<1x32xf32, #tpu.memory_space<vmem>>, vector<1x32xf32>
      %34 = arith.addf %32, %33 : vector<1x32xf32>
      %cst_28 = arith.constant 0.000000e+00 : f32
      %35 = vector.broadcast %cst_28 : f32 to vector<1x32xf32>
      %36 = arith.maximumf %34, %35 : vector<1x32xf32>
      %c0_29 = arith.constant 0 : index
      %c0_30 = arith.constant 0 : index
      %37 = vector.load %arg9[%c0_29, %c0_30] : memref<32x32xf32, #tpu.memory_space<vmem>>, vector<32x32xf32>
      %38 = arith.truncf %36 : vector<1x32xf32> to vector<1x32xbf16>
      %39 = arith.truncf %37 : vector<32x32xf32> to vector<32x32xbf16>
      %cst_31 = arith.constant dense<0.000000e+00> : vector<1x32xf32>
      %40 = tpu.matmul %38, %39, %cst_31 {dimension_numbers = #tpu.dot_dimension_numbers<[1], [0], [0], [1], [0, 0, 1, 1], [], []>} : vector<1x32xbf16>, vector<32x32xbf16>, vector<1x32xf32> -> vector<1x32xf32>
      %c0_32 = arith.constant 0 : index
      %c0_33 = arith.constant 0 : index
      %41 = vector.load %arg10[%c0_32, %c0_33] : memref<1x32xf32, #tpu.memory_space<vmem>>, vector<1x32xf32>
      %42 = arith.addf %40, %41 : vector<1x32xf32>
      %c0_34 = arith.constant 0 : index
      %c0_35 = arith.constant 0 : index
      %c0_36 = arith.constant 0 : index
      %43 = vector.load %arg11[%c0_34, %c0_35, %c0_36] : memref<1x1x32xf32, #tpu.memory_space<vmem>>, vector<1x1x32xf32>
      %44 = vector.shape_cast %43 : vector<1x1x32xf32> to vector<1x32xf32>
      %45 = vector.shape_cast %42 : vector<1x32xf32> to vector<1x1x32xf32>
      tpu.vector_store %arg11[%c0_34, %c0_35, %c0_36], %45 {strides = array<i32>} : memref<1x1x32xf32, #tpu.memory_space<vmem>>, vector<1x1x32xf32>,
    } else {
    }
    return
  }
  func.func @transform_0(%arg0: i32, %arg1: i32) -> (i32, i32, i32, i32) {
    %c0_i32 = arith.constant 0 : i32
    %c0_i32_0 = arith.constant 0 : i32
    %c0_i32_1 = arith.constant 0 : i32
    return %arg0, %arg1, %c0_i32, %c0_i32_0 : i32, i32, i32, i32
  }
  func.func @transform_1(%arg0: i32, %arg1: i32) -> (i32, i32) {
    %c0_i32 = arith.constant 0 : i32
    %c0_i32_0 = arith.constant 0 : i32
    %c0_i32_1 = arith.constant 0 : i32
    return %c0_i32, %c0_i32_0 : i32, i32
  }
  func.func @transform_2(%arg0: i32, %arg1: i32) -> (i32, i32) {
    %c0_i32 = arith.constant 0 : i32
    %c0_i32_0 = arith.constant 0 : i32
    %c0_i32_1 = arith.constant 0 : i32
    return %c0_i32, %c0_i32_0 : i32, i32
  }
  func.func @transform_3(%arg0: i32, %arg1: i32) -> (i32, i32) {
    %c0_i32 = arith.constant 0 : i32
    %c0_i32_0 = arith.constant 0 : i32
    %c0_i32_1 = arith.constant 0 : i32
    return %c0_i32, %c0_i32_0 : i32, i32
  }
  func.func @transform_4(%arg0: i32, %arg1: i32) -> (i32, i32) {
    %c0_i32 = arith.constant 0 : i32
    %c0_i32_0 = arith.constant 0 : i32
    %c0_i32_1 = arith.constant 0 : i32
    return %c0_i32, %c0_i32_0 : i32, i32
  }
  func.func @transform_5(%arg0: i32, %arg1: i32) -> (i32, i32) {
    %c0_i32 = arith.constant 0 : i32
    %c0_i32_0 = arith.constant 0 : i32
    %c0_i32_1 = arith.constant 0 : i32
    return %c0_i32, %c0_i32_0 : i32, i32
  }
  func.func @transform_6(%arg0: i32, %arg1: i32) -> (i32, i32) {
    %c0_i32 = arith.constant 0 : i32
    %c0_i32_0 = arith.constant 0 : i32
    %c0_i32_1 = arith.constant 0 : i32
    return %c0_i32, %c0_i32_0 : i32, i32
  }
  func.func @transform_7(%arg0: i32, %arg1: i32) -> (i32, i32) {
    %c0_i32 = arith.constant 0 : i32
    %c0_i32_0 = arith.constant 0 : i32
    %c0_i32_1 = arith.constant 0 : i32
    return %c0_i32, %c0_i32_0 : i32, i32
  }
  func.func @transform_8(%arg0: i32, %arg1: i32) -> (i32, i32) {
    %c0_i32 = arith.constant 0 : i32
    %c0_i32_0 = arith.constant 0 : i32
    %c0_i32_1 = arith.constant 0 : i32
    return %c0_i32, %c0_i32_0 : i32, i32
  }
  func.func @transform_9(%arg0: i32, %arg1: i32) -> (i32, i32, i32) {
    %c0_i32 = arith.constant 0 : i32
    %c0_i32_0 = arith.constant 0 : i32
    %c0_i32_1 = arith.constant 0 : i32
    return %arg0, %c0_i32, %c0_i32_0 : i32, i32, i32
  }
}

</mosaic_0001>

<bundles_post_ra>
// kernel: _lambda_.4
= control target key start
LH: loop header
LB: loop body
LE: loop exit
PB: predicated region body
PF: predicated region fallthrough
CT: control target
= control target key end

     0   :  { %s1028_s9 = smov 0   ;;  %s1030_s10 = smov 0   ;;  %s1086_s0 = inlined_call_operand.vmem [shape: f32[2,16,3], index: 0, kind: input, shape index: {}, may-alias: {0,1}]   ;;  %s1087_s1 = inlined_call_operand.vmem [shape: f32[2,16,3], index: 1, kind: input, shape index: {}, may-alias: {0,1}]   ;;  %s1088_s2 = inlined_call_operand.vmem [shape: f32[2,16,16], index: 2, kind: output, shape index: {}]  }
   0x1   :  { %s1032_s11 = smov 0  }
   0x2 LB: > { %s24_s12 = sadd.s32 1, %s1007_s10  ;;  %p886_p0 = scmp.ge.s32.totalorder %s1011_s11, 1  ;;  %s1011_s11 = sphi %s1032_s11, %s12_s11   ;;  %s1007_s10 = sphi %s1030_s10, %s1090_s10   ;;  %s1003_s9 = sphi %s1028_s9, %s1089_s9  }
   0x3   : > { %p26_p1 = scmp.ge.s32.totalorder %s24_s12, 2  ;;  %p143_p2 = scmp.lt.s32.totalorder %s1011_s11, 3 }
   0x5   : > { %s1092_s12 = smov (%p26_p1, %s24_s12), 0  ;;  %p144_p3 = pnand %p886_p0, %p143_p2 }
   0x6   : > { %p179_p4 = scmp.lt.s32.totalorder (!%p144_p3), %s1003_s9, 1 }
   0x7   : > { %147 = sbr.rel (%p144_p3) target bundleno = 287 (0x11f), region = 28 }
   0xc   : > { %s1094_s9 = smov (!%p179_p4, %s1003_s9), 1  ;;  %vm207_vm0 = vcmask 23552   ;;  %v774_v57 = vlaneseq  ;;  %vm780_vm1 = vcmask 130048  }
   0xd   : > { %s1046_s13 = sshll.u32 %s1094_s9, 4 }
   0xe   : > { %s192_s16 = scalar_lea.vmem %s1087_s1, %s1046_s13  ;;  %s186_s19 = scalar_lea.vmem %s1086_s0, %s1046_s13  ;;  %v775_v62 = vshrl.u32 %v774_v57, 7 }
   0xf   : > { %v205_v0 = vld [vmem:[%s192_s16] sm:$0xff]  ;;  %v206_v1 = vld [vmem:[%s192_s16 + $0x8] sm:$0xff]  ;;  %s201_s22 = scalar_lea.vmem %s1088_s2, %s1046_s13 }
  0x10   : > { %v730_v2 = vmul.f32 %v205_v0, %v205_v0  ;;  %v215_v3 = vsel %vm207_vm0, %v205_v0, 0  ;;  %v218_v4 = vsel %vm207_vm0, %v206_v1, 0  ;;  %v731_v5 = vmul.f32 %v206_v1, %v206_v1  ;;  %v203_v6 = vld [vmem:[%s186_s19] sm:$0xff]  ;;  %v204_v7 = vld [vmem:[%s186_s19 + $0x8] sm:$0xff] }
  0x11   : > { %v1058_v8 = vand.u32 4294901760, %v215_v3  ;;  %v249_v9 = vand.u32 4294901760, %v218_v4  ;;  %v209_v10 = vsel %vm207_vm0, %v203_v6, 0  ;;  %v212_v11 = vsel %vm207_vm0, %v204_v7, 0 }
  0x12   : > { %v732_v12 = vsel %vm207_vm0, %v730_v2, 0.0  ;;  %v287_v13 = vand.u32 4294901760, %v209_v10  ;;  %v297_v14 = vand.u32 4294901760, %v212_v11  ;;  %v722_v17 = vmul.f32 %v203_v6, %v203_v6 }
  0x13   : > { %733 = vadd.xlane.f32.xlu0 %v732_v12  ;;  %v344_v15 = vsub.f32 %v215_v3, %v1058_v8  ;;  %v337_v16 = vsub.f32 %v218_v4, %v249_v9  ;;  %922 = vmatprep.subr.mxu0 %v249_v9  ;;  %v735_v18 = vsel %vm207_vm0, %v731_v5, 0.0  ;;  %v723_v21 = vmul.f32 %v204_v7, %v204_v7 }
  0x14   : > { %923 = vmatpush3.xpose.msra.mxu0 %v249_v9  ;;  %v288_v19 = vsub.f32 %v209_v10, %v287_v13  ;;  %v298_v20 = vsub.f32 %v212_v11, %v297_v14  ;;  %933 = vmatprep.mubr.f32.mxu1 %v287_v13  ;;  %v724_v24 = vsel %vm207_vm0, %v722_v17, 0.0  ;;  %v776_v1 = vsub.s32 0, %v775_v62 }
  0x15   : > { %v338_v22 = vand.u32 4294901760, %v337_v16  ;;  %924 = vmatprep.subr.mxu0 %v1058_v8  ;;  %v345_v23 = vand.u32 4294901760, %v344_v15  ;;  %725 = vadd.xlane.f32.xlu1 %v724_v24  ;;  %v727_v29 = vsel %vm207_vm0, %v723_v21, 0.0 }
  0x16   : > { %v289_v25 = vand.u32 4294901760, %v288_v19  ;;  %v299_v26 = vand.u32 4294901760, %v298_v20 }
  0x17   : > { %736 = vadd.xlane.f32.xlu0 %v735_v18  ;;  %v339_v27 = vsub.f32 %v337_v16, %v338_v22  ;;  %v346_v28 = vsub.f32 %v344_v15, %v345_v23 }
  0x18   : > { %925 = vmatpush3.xpose.msra.mxu0 %v1058_v8  ;;  %v290_v30 = vsub.f32 %v288_v19, %v289_v25  ;;  %v300_v31 = vsub.f32 %v298_v20, %v299_v26 }
  0x19   : > { %v340_v32 = vand.u32 4294901760, %v339_v27  ;;  %v347_v33 = vand.u32 4294901760, %v346_v28  ;;  %936 = vmatprep.subr.mxu0 %v337_v16  ;;  %728 = vadd.xlane.f32.xlu1 %v727_v29 }
  0x1a   : > { %v291_v34 = vand.u32 4294901760, %v290_v30  ;;  %v301_v35 = vand.u32 4294901760, %v300_v31 }
  0x1b   : > { %929 = vmatprep.subr.mxu1 %v340_v32 }
  0x1c   : > { %930 = vmatpush3.xpose.msra.mxu1 %v340_v32  ;;  %926 = vmatprep.mubr.f32.mxu0 %v291_v34 }
  0x1d   : > { %931 = vmatprep.subr.mxu1 %v347_v33  ;;  %927 = vmatmul.mubr.f32.vlgmr.msra.gmra.mxu0 %v301_v35 }
  0x1e   : > { %937 = vmatpush3.xpose.msra.mxu0 %v337_v16  ;;  %940 = vmatprep.mubr.f32.mxu0 %v288_v19 }
  0x1f   : > { %938 = vmatprep.subr.mxu0 %v344_v15 }
  0x20   : > { %932 = vmatpush3.xpose.msra.mxu1 %v347_v33 }
  0x21   : > { %943 = vmatprep.subr.mxu1 %v249_v9 }
  0x22   : > { %939 = vmatpush3.xpose.msra.mxu0 %v344_v15 }
  0x23   : > { %934 = vmatmul.mubr.f32.vlgmr.msra.gmra.mxu1 %v297_v14  ;;  %950 = vmatprep.subr.mxu0 %v338_v22 }
  0x24   : > { %944 = vmatpush3.xpose.msra.mxu1 %v249_v9  ;;  %947 = vmatprep.mubr.f32.mxu1 %v289_v25 }
  0x25   : > { %945 = vmatprep.subr.mxu1 %v1058_v8  ;;  %941 = vmatmul.mubr.f32.vlgmr.msra.gmra.mxu0 %v298_v20 }
  0x26   : > { %951 = vmatpush3.xpose.msra.mxu0 %v338_v22  ;;  %954 = vmatprep.mubr.f32.mxu0 %v287_v13 }
  0x27   : > { %952 = vmatprep.subr.mxu0 %v345_v23 }
  0x28   : > { %946 = vmatpush3.xpose.msra.mxu1 %v1058_v8 }
  0x29   : > { %957 = vmatprep.subr.mxu1 %v249_v9 }
  0x2a   : > { %953 = vmatpush3.xpose.msra.mxu0 %v345_v23 }
  0x2b   : > { %948 = vmatmul.mubr.f32.vlgmr.msra.gmra.mxu1 %v299_v26 }
  0x2c   : > { %958 = vmatpush3.xpose.msra.mxu1 %v249_v9  ;;  %961 = vmatprep.mubr.f32.mxu1 %v287_v13 }
  0x2d   : > { %959 = vmatprep.subr.mxu1 %v1058_v8  ;;  %955 = vmatmul.mubr.f32.vlgmr.msra.gmra.mxu0 %v297_v14 }
  0x30   : > { %960 = vmatpush3.xpose.msra.mxu1 %v1058_v8 }
  0x33   : > { %962 = vmatmul.mubr.f32.vlgmr.msra.gmra.mxu1 %v297_v14 }
  0x9c   : > { %v734_v36 = vpop.xlane.xlu0 %733 }
  0x9d   : > { %742 = vxpose.xlu0.b32.start [1/2] (short) (narrow) %v734_v36, 8 }
  0x9e   : > { %v726_v59 = vpop.xlane.xlu1 %725 }
  0xa0   : > { %v737_v37 = vpop.xlane.xlu0 %736 }
  0xa1   : > { %743 = vxpose.xlu0.b32.end [2/2] (short) (narrow) %v737_v37, 8 }
  0xa2   : > { %v729_v2 = vpop.xlane.xlu1 %728 }
  0xdd   : > { %v928_v38 = vpop.f32.mrf.mxu0 }
  0xdf   : > { %v293_v39 = vpop.f32.mrf.mxu0 }
  0xe3   : > { %v935_v40 = vpop.f32.mrf.mxu1 }
  0xe4   : > { %v391_v43 = vadd.f32 %v935_v40, %v928_v38 }
  0xe5   : > { %v384_v41 = vpop.f32.mrf.mxu1  ;;  %v942_v42 = vpop.f32.mrf.mxu0 }
  0xe6   : > { %v385_v44 = vadd.f32 %v384_v41, %v293_v39  ;;  %v474_v47 = vadd.f32 %v942_v42, %v391_v43 }
  0xe7   : > { %v466_v45 = vpop.f32.mrf.mxu0 }
  0xe8   : > { %v467_v48 = vadd.f32 %v466_v45, %v385_v44 }
  0xeb   : > { %v949_v46 = vpop.f32.mrf.mxu1 }
  0xec   : > { %v557_v51 = vadd.f32 %v949_v46, %v474_v47 }
  0xed   : > { %v548_v49 = vpop.f32.mrf.mxu1  ;;  %v956_v50 = vpop.f32.mrf.mxu0 }
  0xee   : > { %v549_v52 = vadd.f32 %v548_v49, %v467_v48  ;;  %v640_v55 = vadd.f32 %v956_v50, %v557_v51 }
  0xef   : > { %v633_v53 = vpop.f32.mrf.mxu0 }
  0xf0   : > { %v634_v56 = vadd.f32 %v633_v53, %v549_v52 }
  0xf3   : > { %v963_v54 = vpop.f32.mrf.mxu1 }
  0xf4   : > { %v719_v60 = vadd.f32 %v963_v54, %v640_v55 }
  0xf5   : > { %v712_v58 = vpop.f32.mrf.mxu1 }
  0xf6   : > { %v713_v61 = vadd.f32 %v712_v58, %v634_v56  ;;  %v739_v63 = vmul.f32 2.0, %v719_v60 }
  0xf8   : > { %v738_v0 = vmul.f32 2.0, %v713_v61  ;;  %v741_v5 = vsub.f32 %v739_v63, %v729_v2 }
  0xfa   : > { %v740_v4 = vsub.f32 %v738_v0, %v726_v59 }
 0x119   : > { %v758_v3 = vpop.trf.xlu0 }
 0x11a   : > { %v777_v6 = vrot.slane %v758_v3, %v776_v1 }
 0x11c   : > { %v778_v7 = vsub.f32 %v740_v4, %v777_v6  ;;  %v779_v8 = vsub.f32 %v741_v5, %v777_v6 }
 0x11e   : > { %781 = vst.msk [vmem:[%s201_s22] sm:$0xff] %vm780_vm1, %v778_v7  ;;  %782 = vst.msk [vmem:[%s201_s22 + $0x8] sm:$0xff] %vm780_vm1, %v779_v8 }
 0x11f PF: > { %s12_s11 = sadd.s32 1, %s1011_s11   ;;  %s1089_s9 = smov %s1007_s10 }
 0x120   : > { %p9_p5 = scmp.ge.s32.totalorder %s12_s11, 4   ;;  %s1090_s10 = smov %s1092_s12 }
 0x122   :  { %11 = sbr.rel (!%p9_p5) target bundleno = 2 (0x2), region = 61 }

// kernel: _lambda_.5
= control target key start
LH: loop header
LB: loop body
LE: loop exit
PB: predicated region body
PF: predicated region fallthrough
CT: control target
= control target key end

     0   :  { %s1168_s30 = smov 0   ;;  %s1170_s10 = smov 0   ;;  %s1320_s0 = inlined_call_operand.vmem [shape: f32[2,16,3], index: 0, kind: input, shape index: {}]   ;;  %s1321_s1 = inlined_call_operand.vmem [shape: f32[2,16,3], index: 1, kind: input, shape index: {}]   ;;  %s1322_s2 = inlined_call_operand.vmem [shape: f32[2,16,3], index: 2, kind: input, shape index: {}]   ;;  %s1323_s3 = inlined_call_operand.vmem [shape: f32[12,64], index: 3, kind: input, shape index: {}]   ;;  %s1324_s4 = inlined_call_operand.vmem [shape: f32[1,64], index: 4, kind: input, shape index: {}]   ;;  %s1325_s5 = inlined_call_operand.vmem [shape: f32[64,64], index: 5, kind: input, shape index: {}]   ;;  %s1326_s6 = inlined_call_operand.vmem [shape: f32[1,64], index: 6, kind: input, shape index: {}]   ;;  %s1327_s7 = inlined_call_operand.vmem [shape: f32[64,64], index: 7, kind: input, shape index: {}]   ;;  %s1328_s8 = inlined_call_operand.vmem [shape: f32[1,64], index: 8, kind: input, shape index: {}]   ;;  %s1329_s9 = inlined_call_operand.vmem [shape: f32[2,16,64], index: 9, kind: output, shape index: {}]  }
   0x1   :  { %s1172_s11 = smov 0  }
   0x2 LB: > { %s31_s12 = sadd.s32 1, %s1103_s10  ;;  %p974_p0 = scmp.ge.s32.totalorder %s1107_s11, 1  ;;  %s1107_s11 = sphi %s1172_s11, %s19_s11   ;;  %s1103_s10 = sphi %s1170_s10, %s1331_s10   ;;  %s1099_s30 = sphi %s1168_s30, %s1330_s30  }
   0x3   : > { %p33_p1 = scmp.ge.s32.totalorder %s31_s12, 2  ;;  %p342_p2 = scmp.lt.s32.totalorder %s1107_s11, 3 }
   0x5   : > { %s1333_s12 = smov (%p33_p1, %s31_s12), 0  ;;  %p343_p3 = pnand %p974_p0, %p342_p2 }
   0x6   : > { %p405_p4 = scmp.lt.s32.totalorder (!%p343_p3), %s1099_s30, 1  ;;  %s1111_s17 = smov (!%p343_p3), 127  }
   0x7   : > { %346 = sbr.rel (%p343_p3) target bundleno = 700 (0x2bc), region = 56  ;;  %s1112_s18 = smov (!%p343_p3), 126  }
   0x8   : > { %s1113_s19 = smov (!%p343_p3), 1   ;;  %s1114_s23 = smov (!%p343_p3), 2  }
   0xc   : > { %v1109_v0 = vmov 0   ;;  %v1110_v1 = vmov 1   ;;  %s1335_s30 = smov (!%p405_p4, %s1099_s30), 1  ;;  %v1115_v8 = vmov 2   ;;  %v718_v26 = vld [vmem:[%s1325_s5 + $0x30] sm:$0xff]  ;;  %v719_v27 = vld [vmem:[%s1325_s5 + $0x38] sm:$0xff] }
   0xd   : > { %1073 = vset.pattern.permute.xlu1 %v1109_v0  ;;  %1075 = vset.pattern.permute.xlu0 %v1110_v1  ;;  %s1186_s13 = sshll.u32 %s1335_s30, 4  ;;  %v724_v28 = vpack.c.bf16 %v719_v27, %v718_v26  ;;  %v1116_v30 = vmov 0.0   ;;  %v716_v31 = vld [vmem:[%s1325_s5 + $0x20] sm:$0xff]  ;;  %v717_v32 = vld [vmem:[%s1325_s5 + $0x28] sm:$0xff]  ;;  %v714_v34 = vld [vmem:[%s1325_s5 + $0x10] sm:$0xff]  ;;  %vm1117_vm0 = vmmov 0  }
   0xe   : > { %s432_s16 = scalar_lea.vmem %s1322_s2, %s1186_s13  ;;  %s412_s22 = scalar_lea.vmem %s1320_s0, %s1186_s13  ;;  %1016 = vmatprep.subr.bf16.mxu0 %v1116_v30  ;;  %1028 = vmatprep.subr.bf16.mxu1 %v1116_v30  ;;  %v723_v33 = vpack.c.bf16 %v717_v32, %v716_v31  ;;  %v715_v35 = vld [vmem:[%s1325_s5 + $0x18] sm:$0xff]  ;;  %v712_v37 = vld [vmem:[%s1325_s5] sm:$0xff]  ;;  %v713_v38 = vld [vmem:[%s1325_s5 + $0x8] sm:$0xff]  ;;  %vm732_vm1 = vcmask 523264  }
   0xf   : > { %v449_v2 = vld [vmem:[%s432_s16] sm:$0xff]  ;;  %v450_v3 = vld [vmem:[%s432_s16 + $0x8] sm:$0xff]  ;;  %s422_s26 = scalar_lea.vmem %s1321_s1, %s1186_s13  ;;  %1017 = vmatpush3.bf16.msra.mxu0 %v724_v28  ;;  %v722_v36 = vpack.c.bf16 %v715_v35, %v714_v34  ;;  %v721_v39 = vpack.c.bf16 %v713_v38, %v712_v37  ;;  %1024 = vmatprep.mubr.msk.bf16.mxu0 %vm1117_vm0, %v1116_v30  ;;  %v785_v40 = vld [vmem:[%s1327_s7 + $0x30] sm:$0xff] }
  0x10   : > { %455 = vrot.lane.b32.xlu0 %v449_v2, %s1111_s17  ;;  %463 = vrot.lane.b32.xlu1 %v449_v2, %s1112_s18  ;;  %v446_v4 = vld [vmem:[%s412_s22 + $0x8] sm:$0xff]  ;;  %v445_v5 = vld [vmem:[%s412_s22] sm:$0xff] }
  0x11   : > { %v447_v6 = vld [vmem:[%s422_s26] sm:$0xff]  ;;  %v448_v9 = vld [vmem:[%s422_s26 + $0x8] sm:$0xff]  ;;  %1018 = vmatprep.subr.bf16.mxu0 %v1116_v30  ;;  %1036 = vmatprep.mubr.msk.bf16.mxu1 %vm1117_vm0, %v1116_v30  ;;  %v786_v41 = vld [vmem:[%s1327_s7 + $0x38] sm:$0xff] }
  0x12   : > { %v451_v7 = vmul.f32 %v449_v2, %v447_v6  ;;  %v452_v10 = vmul.f32 %v450_v3, %v448_v9  ;;  %v791_v42 = vpack.c.bf16 %v786_v41, %v785_v40  ;;  %v983_v50 = vld [vmem:[%s1323_s3] ss:$0 sm:$0xff]  ;;  %v985_v56 = vld [vmem:[%s1323_s3 + $0x1] ss:$0 sm:$0xff]  ;;  %v986_v61 = vld [vmem:[%s1323_s3 + $0x2] ss:$0 sm:$0xff] }
  0x13   : > { %1019 = vmatpush3.bf16.msra.mxu0 %v723_v33  ;;  %v984_v55 = vld [vmem:[%s1324_s4] ss:$0 sm:$0xff]  ;;  %v991_v31 = vld [vmem:[%s1323_s3 + $0x7] ss:$0 sm:$0xff]  ;;  %v992_v35 = vld [vmem:[%s1323_s3 + $0x8] ss:$0 sm:$0xff] }
  0x14   : > { %457 = vrot.lane.b32.xlu0 %v450_v3, %s1111_s17  ;;  %465 = vrot.lane.b32.xlu1 %v450_v3, %s1112_s18 }
  0x15   : > { %1020 = vmatprep.subr.bf16.mxu0 %v1116_v30  ;;  %1029 = vmatpush3.bf16.msra.mxu1 %v791_v42  ;;  %v993_v42 = vld [vmem:[%s1323_s3 + $0x9] ss:$0 sm:$0xff] }
  0x16   : > { %1030 = vmatprep.subr.bf16.mxu1 %v1116_v30 }
  0x17   : > { %1021 = vmatpush3.bf16.msra.mxu0 %v722_v36 }
  0x18   : > { %471 = vrot.lane.b32.xlu0 %v449_v2, %s1113_s19  ;;  %473 = vrot.lane.b32.xlu1 %v450_v3, %s1113_s19 }
  0x19   : > { %1022 = vmatprep.subr.bf16.mxu0 %v1116_v30 }
  0x1b   : > { %1023 = vmatpush3.bf16.msra.mxu0 %v721_v39 }
  0x1c   : > { %481 = vrot.lane.b32.xlu1 %v450_v3, %s1114_s23  ;;  %479 = vrot.lane.b32.xlu0 %v449_v2, %s1114_s23  ;;  %s442_s23 = scalar_lea.vmem %s1329_s9, %s1186_s13 }
  0x20   : > { %496 = vperm.xlu1 %1073, %v446_v4   ;;  %519 = vperm.xlu0 %1075, %v446_v4  }
  0x24   : > { %1074 = vset.pattern.permute.xlu1 %v1110_v1  ;;  %1076 = vset.pattern.permute.xlu0 %v1109_v0 }
  0x25   : > { %515 = vperm.xlu1 %1074, %v445_v5   ;;  %491 = vperm.xlu0 %1076, %v445_v5  }
  0x29   : > { %1077 = vset.pattern.permute.xlu1 %v1115_v8  ;;  %550 = vperm.xlu0 %1076, %v451_v7  }
  0x2a   : > { %532 = vperm.xlu1 %1077, %v445_v5  }
  0x2e   : > { %536 = vperm.xlu1 %1077, %v446_v4   ;;  %v987_v4 = vld [vmem:[%s1323_s3 + $0x3] ss:$0 sm:$0xff] }
  0x32   : > { %1078 = vset.pattern.permute.xlu1 %v1109_v0 }
  0x33   : > { %555 = vperm.xlu1 %1078, %v452_v10  }
  0x37   : > { %1079 = vset.pattern.permute.xlu1 %v1110_v1 }
  0x38   : > { %625 = vperm.xlu1 %1079, %v451_v7  }
  0x3c   : > { %629 = vperm.xlu1 %1079, %v452_v10  }
  0x40   : > { %1080 = vset.pattern.permute.xlu1 %v1109_v0 }
  0x82   : > { %v456_v11 = vpop.permute.xlu0 %455  ;;  %v464_v12 = vpop.permute.xlu1 %463 }
  0x83   : > { %v461_v13 = vmul.f32 %v456_v11, %v447_v6  ;;  %v469_v14 = vmul.f32 %v464_v12, %v447_v6  ;;  %v989_v12 = vld [vmem:[%s1323_s3 + $0x5] ss:$0 sm:$0xff] }
  0x85   : > { %569 = vperm.xlu1 %1080, %v461_v13  }
  0x86   : > { %v458_v15 = vpop.permute.xlu0 %457  ;;  %v466_v16 = vpop.permute.xlu1 %465 }
  0x87   : > { %v462_v17 = vmul.f32 %v458_v15, %v448_v9  ;;  %v470_v18 = vmul.f32 %v466_v16, %v448_v9 }
  0x89   : > { %574 = vperm.xlu0 %1076, %v462_v17   ;;  %588 = vperm.xlu1 %1080, %v469_v14  }
  0x8a   : > { %v472_v19 = vpop.permute.xlu0 %471  ;;  %v474_v20 = vpop.permute.xlu1 %473 }
  0x8b   : > { %v477_v21 = vmul.f32 %v472_v19, %v447_v6  ;;  %v478_v22 = vmul.f32 %v474_v20, %v448_v9 }
  0x8d   : > { %593 = vperm.xlu0 %1076, %v470_v18   ;;  %1081 = vset.pattern.permute.xlu1 %v1110_v1 }
  0x8e   : > { %607 = vperm.xlu1 %1081, %v477_v21   ;;  %v482_v23 = vpop.permute.xlu1 %481  ;;  %v480_v25 = vpop.permute.xlu0 %479 }
  0x8f   : > { %v486_v24 = vmul.f32 %v482_v23, %v448_v9  ;;  %v485_v29 = vmul.f32 %v480_v25, %v447_v6 }
  0x91   : > { %1082 = vset.pattern.permute.xlu0 %v1110_v1 }
  0x92   : > { %612 = vperm.xlu0 %1082, %v478_v22   ;;  %646 = vperm.xlu1 %1081, %v462_v17   ;;  %v990_v17 = vld [vmem:[%s1323_s3 + $0x6] ss:$0 sm:$0xff] }
  0x96   : > { %642 = vperm.xlu0 %1082, %v461_v13   ;;  %1084 = vset.pattern.permute.xlu1 %v1115_v8 }
  0x97   : > { %665 = vperm.xlu1 %1084, %v486_v24  }
  0x9a   : > { %1083 = vset.pattern.permute.xlu0 %v1115_v8 }
  0x9b   : > { %660 = vperm.xlu0 %1083, %v485_v29   ;;  %678 = vperm.xlu1 %1084, %v477_v21   ;;  %v497_v43 = vpop.permute.xlu1 %496  ;;  %v520_v48 = vpop.permute.xlu0 %519 }
  0x9c   : > { %v504_v53 = vmul.f32 %v983_v50, %v497_v43  ;;  %v527_v59 = vmul.f32 %v985_v56, %v520_v48 }
  0x9e   : > { %v512_v57 = vadd.f32 %v984_v55, %v504_v53 }
  0x9f   : > { %682 = vperm.xlu0 %1083, %v478_v22   ;;  %695 = vperm.xlu1 %1084, %v451_v7   ;;  %v988_v7 = vld [vmem:[%s1323_s3 + $0x4] ss:$0 sm:$0xff] }
  0xa0   : > { %v516_v44 = vpop.permute.xlu1 %515  ;;  %v492_v51 = vpop.permute.xlu0 %491  ;;  %v529_v1 = vadd.f32 %v527_v59, %v512_v57 }
  0xa1   : > { %v503_v54 = vmul.f32 %v983_v50, %v492_v51  ;;  %v526_v58 = vmul.f32 %v985_v56, %v516_v44  ;;  %v994_v44 = vld [vmem:[%s1323_s3 + $0xa] ss:$0 sm:$0xff] }
  0xa3   : > { %699 = vperm.xlu0 %1083, %v452_v10   ;;  %v511_v60 = vadd.f32 %v984_v55, %v503_v54 }
  0xa4   : > { %v551_v62 = vpop.permute.xlu0 %550 }
  0xa5   : > { %v533_v45 = vpop.permute.xlu1 %532  ;;  %v528_v3 = vadd.f32 %v526_v58, %v511_v60  ;;  %v562_v11 = vmul.f32 %v987_v4, %v551_v62 }
  0xa6   : > { %v543_v0 = vmul.f32 %v986_v61, %v533_v45 }
  0xa8   : > { %v545_v10 = vadd.f32 %v543_v0, %v528_v3 }
  0xa9   : > { %v537_v46 = vpop.permute.xlu1 %536 }
  0xaa   : > { %v544_v2 = vmul.f32 %v986_v61, %v537_v46  ;;  %v564_v19 = vadd.f32 %v562_v11, %v545_v10  ;;  %v779_v10 = vld [vmem:[%s1327_s7] sm:$0xff]  ;;  %v780_v11 = vld [vmem:[%s1327_s7 + $0x8] sm:$0xff] }
  0xac   : > { %v546_v8 = vadd.f32 %v544_v2, %v529_v1 }
  0xae   : > { %v556_v47 = vpop.permute.xlu1 %555 }
  0xaf   : > { %v563_v9 = vmul.f32 %v987_v4, %v556_v47  ;;  %v783_v4 = vld [vmem:[%s1327_s7 + $0x20] sm:$0xff] }
  0xb1   : > { %v565_v18 = vadd.f32 %v563_v9, %v546_v8  ;;  %v782_v8 = vld [vmem:[%s1327_s7 + $0x18] sm:$0xff] }
  0xb3   : > { %v626_v49 = vpop.permute.xlu1 %625 }
  0xb4   : > { %v636_v37 = vmul.f32 %v991_v31, %v626_v49  ;;  %v995_v49 = vld [vmem:[%s1323_s3 + $0xb] ss:$0 sm:$0xff] }
  0xb7   : > { %v630_v52 = vpop.permute.xlu1 %629 }
  0xb8   : > { %v637_v38 = vmul.f32 %v991_v31, %v630_v52 }
 0x100   : > { %v570_v63 = vpop.permute.xlu1 %569 }
 0x101   : > { %v581_v14 = vmul.f32 %v988_v7, %v570_v63 }
 0x103   : > { %v583_v22 = vadd.f32 %v581_v14, %v564_v19 }
 0x104   : > { %v575_v5 = vpop.permute.xlu0 %574  ;;  %v589_v6 = vpop.permute.xlu1 %588 }
 0x105   : > { %v582_v15 = vmul.f32 %v988_v7, %v575_v5  ;;  %v600_v20 = vmul.f32 %v989_v12, %v589_v6  ;;  %v784_v5 = vld [vmem:[%s1327_s7 + $0x28] sm:$0xff]  ;;  %v781_v7 = vld [vmem:[%s1327_s7 + $0x10] sm:$0xff] }
 0x106   : > { %v790_v6 = vpack.c.bf16 %v784_v5, %v783_v4  ;;  %v789_v9 = vpack.c.bf16 %v782_v8, %v781_v7 }
 0x107   : > { %v584_v23 = vadd.f32 %v582_v15, %v565_v18  ;;  %v602_v28 = vadd.f32 %v600_v20, %v583_v22  ;;  %v998_v22 = vld [vmem:[%s1328_s8] ss:$0 sm:$0xff] }
 0x108   : > { %v594_v13 = vpop.permute.xlu0 %593  ;;  %1031 = vmatpush3.bf16.msra.mxu1 %v790_v6 }
 0x109   : > { %v608_v16 = vpop.permute.xlu1 %607  ;;  %v601_v21 = vmul.f32 %v989_v12, %v594_v13  ;;  %1032 = vmatprep.subr.bf16.mxu1 %v1116_v30  ;;  %v788_v12 = vpack.c.bf16 %v780_v11, %v779_v10  ;;  %v996_v13 = vld [vmem:[%s1326_s6] ss:$0 sm:$0xff] }
 0x10a   : > { %v619_v24 = vmul.f32 %v990_v17, %v608_v16 }
 0x10b   : > { %v603_v29 = vadd.f32 %v601_v21, %v584_v23 }
 0x10c   : > { %v621_v32 = vadd.f32 %v619_v24, %v602_v28  ;;  %1033 = vmatpush3.bf16.msra.mxu1 %v789_v9 }
 0x10d   : > { %v613_v25 = vpop.permute.xlu0 %612  ;;  %v647_v26 = vpop.permute.xlu1 %646  ;;  %1034 = vmatprep.subr.bf16.mxu1 %v1116_v30 }
 0x10e   : > { %v620_v27 = vmul.f32 %v990_v17, %v613_v25  ;;  %v638_v41 = vadd.f32 %v636_v37, %v621_v32  ;;  %v654_v46 = vmul.f32 %v992_v35, %v647_v26 }
 0x110   : > { %v622_v33 = vadd.f32 %v620_v27, %v603_v29  ;;  %1035 = vmatpush3.bf16.msra.mxu1 %v788_v12 }
 0x111   : > { %v643_v34 = vpop.permute.xlu0 %642 }
 0x112   : > { %v666_v36 = vpop.permute.xlu1 %665  ;;  %v653_v39 = vmul.f32 %v992_v35, %v643_v34  ;;  %v639_v40 = vadd.f32 %v637_v38, %v622_v33 }
 0x113   : > { %v673_v51 = vmul.f32 %v993_v42, %v666_v36 }
 0x114   : > { %v655_v47 = vadd.f32 %v653_v39, %v638_v41  ;;  %v656_v50 = vadd.f32 %v654_v46, %v639_v40 }
 0x116   : > { %v661_v43 = vpop.permute.xlu0 %660  ;;  %v679_v45 = vpop.permute.xlu1 %678  ;;  %v675_v59 = vadd.f32 %v673_v51, %v656_v50 }
 0x117   : > { %v672_v48 = vmul.f32 %v993_v42, %v661_v43  ;;  %v689_v53 = vmul.f32 %v994_v44, %v679_v45 }
 0x119   : > { %v674_v52 = vadd.f32 %v672_v48, %v655_v47 }
 0x11a   : > { %v683_v54 = vpop.permute.xlu0 %682  ;;  %v696_v55 = vpop.permute.xlu1 %695 }
 0x11b   : > { %v691_v56 = vadd.f32 %v689_v53, %v674_v52  ;;  %v690_v57 = vmul.f32 %v994_v44, %v683_v54  ;;  %v706_v58 = vmul.f32 %v995_v49, %v696_v55 }
 0x11d   : > { %v692_v61 = vadd.f32 %v690_v57, %v675_v59  ;;  %v708_v62 = vadd.f32 %v706_v58, %v691_v56 }
 0x11e   : > { %v700_v60 = vpop.permute.xlu0 %699 }
 0x11f   : > { %v707_v63 = vmul.f32 %v995_v49, %v700_v60  ;;  %v710_v1 = vmax.f32 %v708_v62, 0.0 }
 0x121   : > { %v709_v0 = vadd.f32 %v707_v63, %v692_v61 }
 0x123   : > { %v711_v2 = vmax.f32 %v709_v0, 0.0 }
 0x125   : > { %v720_v3 = vpack.c.bf16 %v711_v2, %v710_v1 }
 0x127   : > { %1025 = vmatmul.mubr.msk.bf16.vlgmr.msra.gmra.mxu0 %vm732_vm1, %v720_v3 }
 0x1e7   : > { %v770_v14 = vpop.f32.mrf.mxu0 }
 0x1e8   : > { %v771_v16 = vadd.f32 %v996_v13, %v770_v14 }
 0x1e9   : > { %v1026_v15 = vpop.f32.mrf.mxu0 }
 0x1ea   : > { %v777_v19 = vmax.f32 %v771_v16, 0.0 }
 0x1eb   : > { %v773_v17 = vpop.f32.mrf.mxu0 }
 0x1ec   : > { %v774_v30 = vadd.f32 %v996_v13, %v773_v17 }
 0x1ed   : > { %v1027_v18 = vpop.f32.mrf.mxu0 }
 0x1ee   : > { %v778_v20 = vmax.f32 %v774_v30, 0.0 }
 0x1f0   : > { %v787_v21 = vpack.c.bf16 %v778_v20, %v777_v19 }
 0x1f2   : > { %1037 = vmatmul.mubr.msk.bf16.vlgmr.msra.gmra.mxu1 %vm732_vm1, %v787_v21 }
 0x2b2   : > { %v836_v23 = vpop.f32.mrf.mxu1 }
 0x2b3   : > { %v837_v24 = vadd.f32 %v998_v22, %v836_v23 }
 0x2b4   : > { %v1038_v25 = vpop.f32.mrf.mxu1 }
 0x2b5   : > { %v843_v26 = vmax.f32 %v837_v24, 0.0 }
 0x2b6   : > { %v839_v27 = vpop.f32.mrf.mxu1 }
 0x2b7   : > { %845 = vst.msk [vmem:[%s442_s23] sm:$0xff] %vm732_vm1, %v843_v26  ;;  %v840_v28 = vadd.f32 %v998_v22, %v839_v27 }
 0x2b8   : > { %v1039_v29 = vpop.f32.mrf.mxu1 }
 0x2b9   : > { %v844_v31 = vmax.f32 %v840_v28, 0.0 }
 0x2bb   : > { %846 = vst.msk [vmem:[%s442_s23 + $0x8] sm:$0xff] %vm732_vm1, %v844_v31 }
 0x2bc PF: > { %s19_s11 = sadd.s32 1, %s1107_s11   ;;  %s1330_s30 = smov %s1103_s10 }
 0x2bd   : > { %p16_p5 = scmp.ge.s32.totalorder %s19_s11, 4   ;;  %s1331_s10 = smov %s1333_s12 }
 0x2bf   :  { %18 = sbr.rel (!%p16_p5) target bundleno = 2 (0x2), region = 92 }

// kernel: _lambda_.6
= control target key start
LH: loop header
LB: loop body
LE: loop exit
PB: predicated region body
PF: predicated region fallthrough
CT: control target
= control target key end

     0   :  { %s816_s18 = smov 0   ;;  %s818_s19 = smov 0   ;;  %s997_s0 = inlined_call_operand.vmem [shape: f32[2,16,4,64], index: 0, kind: input, shape index: {}]   ;;  %s998_s1 = inlined_call_operand.vmem [shape: f32[64,64], index: 1, kind: input, shape index: {}]   ;;  %s999_s2 = inlined_call_operand.vmem [shape: f32[1,64], index: 2, kind: input, shape index: {}]   ;;  %s1000_s3 = inlined_call_operand.vmem [shape: f32[64,128], index: 3, kind: input, shape index: {}]   ;;  %s1001_s4 = inlined_call_operand.vmem [shape: f32[1,128], index: 4, kind: input, shape index: {}]   ;;  %s1002_s5 = inlined_call_operand.vmem [shape: f32[2,16,128], index: 5, kind: output, shape index: {}]  }
   0x1   :  { %s820_s20 = smov 0  }
   0x2 LB: > { %s27_s21 = sadd.s32 1, %s778_s19  ;;  %p687_p0 = scmp.ge.s32.totalorder %s782_s20, 1  ;;  %s782_s20 = sphi %s820_s20, %s15_s20   ;;  %s778_s19 = sphi %s818_s19, %s1004_s19   ;;  %s774_s18 = sphi %s816_s18, %s1003_s18  }
   0x3   : > { %p29_p1 = scmp.ge.s32.totalorder %s27_s21, 2  ;;  %p208_p2 = scmp.lt.s32.totalorder %s782_s20, 3 }
   0x5   : > { %s1006_s21 = smov (%p29_p1, %s27_s21), 0  ;;  %p209_p3 = pnand %p687_p0, %p208_p2 }
   0x6   : > { %p245_p4 = scmp.lt.s32.totalorder (!%p209_p3), %s774_s18, 1 }
   0x7   : > { %212 = sbr.rel (%p209_p3) target bundleno = 465 (0x1d1), region = 40 }
   0xc   : > { %v400_v0 = vld [vmem:[%s998_s1 + $0x30] sm:$0xff]  ;;  %v401_v1 = vld [vmem:[%s998_s1 + $0x38] sm:$0xff]  ;;  %v398_v2 = vld [vmem:[%s998_s1 + $0x20] sm:$0xff]  ;;  %v784_v3 = vmov 0.0   ;;  %vm785_vm0 = vmmov 0   ;;  %s1008_s18 = smov (!%p245_p4, %s774_s18), 1 }
   0xd   : > { %710 = vmatprep.subr.bf16.mxu0 %v784_v3  ;;  %v421_v4 = vpack.c.bf16 %v401_v1, %v400_v0  ;;  %v399_v5 = vld [vmem:[%s998_s1 + $0x28] sm:$0xff]  ;;  %718 = vmatprep.mubr.msk.bf16.mxu0 %vm785_vm0, %v784_v3  ;;  %v534_v6 = vld [vmem:[%s1000_s3 + $0x30] sm:$0xff]  ;;  %v535_v8 = vld [vmem:[%s1000_s3 + $0x38] sm:$0xff]  ;;  %s698_s17 = sshll.u32 %s1008_s18, 6  ;;  %vm281_vm1 = vcmask 519168   ;;  %vm461_vm2 = vcmask 1041409  }
   0xe   : > { %722 = vmatprep.subr.bf16.mxu1 %v784_v3  ;;  %730 = vmatprep.mubr.msk.bf16.mxu1 %vm785_vm0, %v784_v3  ;;  %v420_v7 = vpack.c.bf16 %v399_v5, %v398_v2  ;;  %v532_v9 = vld [vmem:[%s1000_s3 + $0x20] sm:$0xff]  ;;  %v533_v10 = vld [vmem:[%s1000_s3 + $0x28] sm:$0xff]  ;;  %v396_v11 = vld [vmem:[%s998_s1 + $0x10] sm:$0xff]  ;;  %v540_v13 = vpack.c.bf16 %v535_v8, %v534_v6  ;;  %s875_s24 = scalar_lea.vmem %s997_s0, %s698_s17  ;;  %vm463_vm3 = vcmask 1042434   ;;  %vm465_vm4 = vcmask 1043459   ;;  %s699_s16 = sshll.u32 %s1008_s18, 4 }
   0xf   : > { %711 = vmatpush3.bf16.msra.mxu0 %v421_v4  ;;  %v397_v12 = vld [vmem:[%s998_s1 + $0x18] sm:$0xff]  ;;  %v539_v14 = vpack.c.bf16 %v533_v10, %v532_v9  ;;  %v394_v16 = vld [vmem:[%s998_s1] sm:$0xff]  ;;  %v395_v17 = vld [vmem:[%s998_s1 + $0x8] sm:$0xff]  ;;  %vm467_vm5 = vcmask 1044484   ;;  %vm469_vm6 = vcmask 1045509   ;;  %vm471_vm7 = vcmask 1046534   ;;  %s262_s23 = scalar_lea.vmem %s1002_s5, %s699_s16 }
  0x10   : > { %712 = vmatprep.subr.bf16.mxu0 %v784_v3  ;;  %723 = vmatpush3.bf16.msra.mxu1 %v540_v13  ;;  %v419_v15 = vpack.c.bf16 %v397_v12, %v396_v11  ;;  %v265_v18 = vld [vmem:[%s875_s24] sm:$0xf]  ;;  %v266_v19 = vld [vmem:[%s875_s24 + $0x4] sm:$0xf]  ;;  %v267_v20 = vld [vmem:[%s875_s24 + $0x8] sm:$0xf]  ;;  %v418_v23 = vpack.c.bf16 %v395_v17, %v394_v16 }
  0x11   : > { %724 = vmatprep.subr.bf16.mxu1 %v784_v3  ;;  %v268_v21 = vld [vmem:[%s875_s24 + $0xc] sm:$0xf]  ;;  %v269_v22 = vld [vmem:[%s875_s24 + $0x10] sm:$0xf]  ;;  %v270_v24 = vld [vmem:[%s875_s24 + $0x14] sm:$0xf] }
  0x12   : > { %v271_v25 = vld [vmem:[%s875_s24 + $0x18] sm:$0xf]  ;;  %v272_v26 = vld [vmem:[%s875_s24 + $0x1c] sm:$0xf]  ;;  %v282_v27 = vsel %vm281_vm1, %v265_v18, -inf  ;;  %v289_v28 = vsel %vm281_vm1, %v266_v19, -inf }
  0x13   : > { %713 = vmatpush3.bf16.msra.mxu0 %v420_v7  ;;  %v296_v29 = vsel %vm281_vm1, %v267_v20, -inf  ;;  %v303_v30 = vsel %vm281_vm1, %v268_v21, -inf  ;;  %v283_v31 = vrot.slane %v282_v27, 4  ;;  %v290_v32 = vrot.slane %v289_v28, 4  ;;  %v273_v63 = vld [vmem:[%s875_s24 + $0x20] sm:$0xf] }
  0x14   : > { %714 = vmatprep.subr.bf16.mxu0 %v784_v3  ;;  %725 = vmatpush3.bf16.msra.mxu1 %v539_v14  ;;  %v297_v33 = vrot.slane %v296_v29, 4  ;;  %v304_v34 = vrot.slane %v303_v30, 4  ;;  %v310_v35 = vsel %vm281_vm1, %v269_v22, -inf  ;;  %v317_v36 = vsel %vm281_vm1, %v270_v24, -inf  ;;  %v274_v5 = vld [vmem:[%s875_s24 + $0x24] sm:$0xf] }
  0x15   : > { %726 = vmatprep.subr.bf16.mxu1 %v784_v3  ;;  %v324_v37 = vsel %vm281_vm1, %v271_v25, -inf  ;;  %v331_v38 = vsel %vm281_vm1, %v272_v26, -inf  ;;  %v284_v39 = vmax.f32 %v282_v27, %v283_v31  ;;  %v291_v40 = vmax.f32 %v289_v28, %v290_v32  ;;  %v275_v6 = vld [vmem:[%s875_s24 + $0x28] sm:$0xf]  ;;  %v276_v7 = vld [vmem:[%s875_s24 + $0x2c] sm:$0xf] }
  0x16   : > { %v298_v41 = vmax.f32 %v296_v29, %v297_v33  ;;  %v305_v42 = vmax.f32 %v303_v30, %v304_v34  ;;  %v311_v43 = vrot.slane %v310_v35, 4  ;;  %v318_v44 = vrot.slane %v317_v36, 4  ;;  %v277_v12 = vld [vmem:[%s875_s24 + $0x30] sm:$0xf]  ;;  %v278_v13 = vld [vmem:[%s875_s24 + $0x34] sm:$0xf] }
  0x17   : > { %715 = vmatpush3.bf16.msra.mxu0 %v419_v15  ;;  %v325_v45 = vrot.slane %v324_v37, 4  ;;  %v332_v46 = vrot.slane %v331_v38, 4  ;;  %v285_v47 = vrot.slane %v284_v39, 2  ;;  %v292_v48 = vrot.slane %v291_v40, 2  ;;  %v279_v14 = vld [vmem:[%s875_s24 + $0x38] sm:$0xf] }
  0x18   : > { %716 = vmatprep.subr.bf16.mxu0 %v784_v3  ;;  %v299_v49 = vrot.slane %v298_v41, 2  ;;  %v306_v50 = vrot.slane %v305_v42, 2  ;;  %v312_v51 = vmax.f32 %v310_v35, %v311_v43  ;;  %v319_v52 = vmax.f32 %v317_v36, %v318_v44  ;;  %v280_v19 = vld [vmem:[%s875_s24 + $0x3c] sm:$0xf] }
  0x19   : > { %v326_v53 = vmax.f32 %v324_v37, %v325_v45  ;;  %v333_v54 = vmax.f32 %v331_v38, %v332_v46  ;;  %v286_v55 = vmax.f32 %v284_v39, %v285_v47  ;;  %v293_v56 = vmax.f32 %v291_v40, %v292_v48 }
  0x1a   : > { %v300_v57 = vmax.f32 %v298_v41, %v299_v49  ;;  %v307_v58 = vmax.f32 %v305_v42, %v306_v50  ;;  %v313_v59 = vrot.slane %v312_v51, 2  ;;  %v320_v60 = vrot.slane %v319_v52, 2 }
  0x1b   : > { %717 = vmatpush3.bf16.msra.mxu0 %v418_v23  ;;  %v327_v61 = vrot.slane %v326_v53, 2  ;;  %v334_v62 = vrot.slane %v333_v54, 2  ;;  %v287_v0 = vrot.slane %v286_v55, 1  ;;  %v294_v1 = vrot.slane %v293_v56, 1 }
  0x1c   : > { %v301_v2 = vrot.slane %v300_v57, 1  ;;  %v308_v4 = vrot.slane %v307_v58, 1  ;;  %v907_v8 = vmax.f32 %v312_v51, %v313_v59  ;;  %v909_v9 = vmax.f32 %v319_v52, %v320_v60 }
  0x1d   : > { %v911_v10 = vmax.f32 %v326_v53, %v327_v61  ;;  %v913_v11 = vmax.f32 %v333_v54, %v334_v62  ;;  %v918_v15 = vmax.f32 %v286_v55, %v287_v0  ;;  %v920_v16 = vmax.f32 %v293_v56, %v294_v1 }
  0x1e   : > { %v922_v17 = vmax.f32 %v300_v57, %v301_v2  ;;  %v924_v18 = vmax.f32 %v307_v58, %v308_v4  ;;  %v338_v20 = vsel %vm281_vm1, %v273_v63, -inf  ;;  %v345_v21 = vsel %vm281_vm1, %v274_v5, -inf }
  0x1f   : > { %v352_v22 = vsel %vm281_vm1, %v275_v6, -inf  ;;  %v359_v23 = vsel %vm281_vm1, %v276_v7, -inf  ;;  %v315_v24 = vrot.slane %v907_v8, 1  ;;  %v322_v25 = vrot.slane %v909_v9, 1 }
  0x20   : > { %v329_v26 = vrot.slane %v911_v10, 1  ;;  %v336_v27 = vrot.slane %v913_v11, 1  ;;  %v339_v28 = vrot.slane %v338_v20, 4  ;;  %v346_v29 = vrot.slane %v345_v21, 4 }
  0x21   : > { %v353_v30 = vrot.slane %v352_v22, 4  ;;  %v360_v31 = vrot.slane %v359_v23, 4  ;;  %v366_v32 = vsel %vm281_vm1, %v277_v12, -inf  ;;  %v373_v33 = vsel %vm281_vm1, %v278_v13, -inf }
  0x22   : > { %v380_v34 = vsel %vm281_vm1, %v279_v14, -inf  ;;  %v387_v35 = vsel %vm281_vm1, %v280_v19, -inf  ;;  %v340_v36 = vmax.f32 %v338_v20, %v339_v28  ;;  %v347_v37 = vmax.f32 %v345_v21, %v346_v29 }
  0x23   : > { %v354_v38 = vmax.f32 %v352_v22, %v353_v30  ;;  %v361_v39 = vmax.f32 %v359_v23, %v360_v31  ;;  %v367_v40 = vrot.slane %v366_v32, 4  ;;  %v374_v41 = vrot.slane %v373_v33, 4 }
  0x24   : > { %v381_v42 = vrot.slane %v380_v34, 4  ;;  %v388_v43 = vrot.slane %v387_v35, 4  ;;  %v341_v44 = vrot.slane %v340_v36, 2  ;;  %v348_v45 = vrot.slane %v347_v37, 2 }
  0x25   : > { %v355_v46 = vrot.slane %v354_v38, 2  ;;  %v362_v47 = vrot.slane %v361_v39, 2  ;;  %v368_v48 = vmax.f32 %v366_v32, %v367_v40  ;;  %v375_v49 = vmax.f32 %v373_v33, %v374_v41 }
  0x26   : > { %v382_v50 = vmax.f32 %v380_v34, %v381_v42  ;;  %v389_v51 = vmax.f32 %v387_v35, %v388_v43  ;;  %v342_v52 = vmax.f32 %v340_v36, %v341_v44  ;;  %v349_v53 = vmax.f32 %v347_v37, %v348_v45 }
  0x27   : > { %v356_v54 = vmax.f32 %v354_v38, %v355_v46  ;;  %v363_v55 = vmax.f32 %v361_v39, %v362_v47  ;;  %v369_v56 = vrot.slane %v368_v48, 2  ;;  %v376_v57 = vrot.slane %v375_v49, 2 }
  0x28   : > { %v383_v58 = vrot.slane %v382_v50, 2  ;;  %v390_v59 = vrot.slane %v389_v51, 2  ;;  %v343_v60 = vrot.slane %v342_v52, 1  ;;  %v350_v61 = vrot.slane %v349_v53, 1 }
  0x29   : > { %v357_v62 = vrot.slane %v356_v54, 1  ;;  %v364_v63 = vrot.slane %v363_v55, 1  ;;  %v370_v0 = vmax.f32 %v368_v48, %v369_v56  ;;  %v377_v1 = vmax.f32 %v375_v49, %v376_v57 }
  0x2a   : > { %v384_v2 = vmax.f32 %v382_v50, %v383_v58  ;;  %v391_v4 = vmax.f32 %v389_v51, %v390_v59  ;;  %v344_v5 = vmax.f32 %v342_v52, %v343_v60  ;;  %v351_v6 = vmax.f32 %v349_v53, %v350_v61 }
  0x2b   : > { %v358_v7 = vmax.f32 %v356_v54, %v357_v62  ;;  %v365_v12 = vmax.f32 %v363_v55, %v364_v63  ;;  %v371_v13 = vrot.slane %v370_v0, 1  ;;  %v378_v14 = vrot.slane %v377_v1, 1 }
  0x2c   : > { %v385_v19 = vrot.slane %v384_v2, 1  ;;  %v392_v20 = vrot.slane %v391_v4, 1  ;;  %v316_v21 = vmax.f32 %v907_v8, %v315_v24  ;;  %v323_v22 = vmax.f32 %v909_v9, %v322_v25 }
  0x2d   : > { %v330_v23 = vmax.f32 %v911_v10, %v329_v26  ;;  %v337_v28 = vmax.f32 %v913_v11, %v336_v27  ;;  %v372_v29 = vmax.f32 %v370_v0, %v371_v13  ;;  %v379_v30 = vmax.f32 %v377_v1, %v378_v14  ;;  %v529_v13 = vld [vmem:[%s1000_s3 + $0x8] sm:$0xff] }
  0x2e   : > { %v402_v31 = vpack.c.bf16 %v918_v15, %v918_v15  ;;  %v403_v32 = vpack.c.bf16 %v920_v16, %v920_v16  ;;  %v386_v33 = vmax.f32 %v384_v2, %v385_v19  ;;  %v393_v34 = vmax.f32 %v391_v4, %v392_v20  ;;  %v692_v20 = vld [vmem:[%s999_s2] ss:$0 sm:$0xff] }
  0x2f   : > { %v404_v8 = vpack.c.bf16 %v922_v17, %v922_v17  ;;  %v405_v9 = vpack.c.bf16 %v924_v18, %v924_v18  ;;  %v410_v10 = vpack.c.bf16 %v344_v5, %v344_v5  ;;  %v411_v11 = vpack.c.bf16 %v351_v6, %v351_v6  ;;  %v530_v5 = vld [vmem:[%s1000_s3 + $0x10] sm:$0xff]  ;;  %v531_v6 = vld [vmem:[%s1000_s3 + $0x18] sm:$0xff] }
  0x30   : > { %v412_v24 = vpack.c.bf16 %v358_v7, %v358_v7  ;;  %v413_v25 = vpack.c.bf16 %v365_v12, %v365_v12  ;;  %v406_v26 = vpack.c.bf16 %v316_v21, %v316_v21  ;;  %v407_v27 = vpack.c.bf16 %v323_v22, %v323_v22  ;;  %v528_v12 = vld [vmem:[%s1000_s3] sm:$0xff] }
  0x31   : > { %v408_v35 = vpack.c.bf16 %v330_v23, %v330_v23  ;;  %v414_v15 = vpack.c.bf16 %v372_v29, %v372_v29  ;;  %v409_v36 = vpack.c.bf16 %v337_v28, %v337_v28  ;;  %v415_v37 = vpack.c.bf16 %v379_v30, %v379_v30  ;;  %v694_v30 = vld [vmem:[%s1001_s4] ss:$0 sm:$0xff] }
  0x32   : > { %v445_v16 = vunpack.c.l.b16 %v402_v31  ;;  %v446_v38 = vunpack.c.l.b16 %v403_v32  ;;  %v416_v39 = vpack.c.bf16 %v386_v33, %v386_v33  ;;  %v417_v40 = vpack.c.bf16 %v393_v34, %v393_v34 }
  0x33   : > { %v447_v41 = vunpack.c.l.b16 %v404_v8  ;;  %v448_v42 = vunpack.c.l.b16 %v405_v9  ;;  %v453_v17 = vunpack.c.l.b16 %v410_v10  ;;  %v454_v43 = vunpack.c.l.b16 %v411_v11 }
  0x34   : > { %v455_v44 = vunpack.c.l.b16 %v412_v24  ;;  %v456_v18 = vunpack.c.l.b16 %v413_v25  ;;  %v449_v45 = vunpack.c.l.b16 %v406_v26  ;;  %v457_v46 = vunpack.c.l.b16 %v414_v15 }
  0x35   : > { %v450_v47 = vunpack.c.l.b16 %v407_v27  ;;  %v458_v48 = vunpack.c.l.b16 %v415_v37  ;;  %v462_v49 = vsel %vm461_vm2, %v446_v38, %v445_v16  ;;  %v475_v50 = vsel %vm461_vm2, %v454_v43, %v453_v17 }
  0x36   : > { %v451_v51 = vunpack.c.l.b16 %v408_v35  ;;  %v459_v52 = vunpack.c.l.b16 %v416_v39  ;;  %v464_v53 = vsel %vm463_vm3, %v447_v41, %v462_v49  ;;  %v476_v54 = vsel %vm463_vm3, %v455_v44, %v475_v50 }
  0x37   : > { %v452_v55 = vunpack.c.l.b16 %v409_v36  ;;  %v460_v56 = vunpack.c.l.b16 %v417_v40  ;;  %v466_v57 = vsel %vm465_vm4, %v448_v42, %v464_v53  ;;  %v477_v58 = vsel %vm465_vm4, %v456_v18, %v476_v54 }
  0x38   : > { %v468_v59 = vsel %vm467_vm5, %v449_v45, %v466_v57  ;;  %vm473_vm8 = vcmask 1047559   ;;  %v478_v60 = vsel %vm467_vm5, %v457_v46, %v477_v58  ;;  %vm483_vm9 = vcmask 523264  }
  0x39   : > { %v470_v61 = vsel %vm469_vm6, %v450_v47, %v468_v59  ;;  %v479_v62 = vsel %vm469_vm6, %v458_v48, %v478_v60  ;;  %v538_v7 = vpack.c.bf16 %v531_v6, %v530_v5  ;;  %v537_v14 = vpack.c.bf16 %v529_v13, %v528_v12 }
  0x3a   : > { %v472_v63 = vsel %vm471_vm7, %v451_v51, %v470_v61  ;;  %v480_v0 = vsel %vm471_vm7, %v459_v52, %v479_v62 }
  0x3b   : > { %v474_v1 = vsel %vm473_vm8, %v452_v55, %v472_v63  ;;  %v481_v2 = vsel %vm473_vm8, %v460_v56, %v480_v0  ;;  %727 = vmatpush3.bf16.msra.mxu1 %v538_v7 }
  0x3c   : > { %v482_v4 = vpack.c.b16 %v481_v2, %v474_v1  ;;  %728 = vmatprep.subr.bf16.mxu1 %v784_v3 }
  0x3e   : > { %719 = vmatmul.mubr.msk.bf16.vlgmr.msra.gmra.mxu0 %vm483_vm9, %v482_v4 }
  0x3f   : > { %729 = vmatpush3.bf16.msra.mxu1 %v537_v14 }
  0xfe   : > { %v521_v19 = vpop.f32.mrf.mxu0 }
  0xff   : > { %v522_v23 = vadd.f32 %v692_v20, %v521_v19 }
 0x100   : > { %v720_v21 = vpop.f32.mrf.mxu0 }
 0x102   : > { %v524_v22 = vpop.f32.mrf.mxu0 }
 0x103   : > { %v525_v28 = vadd.f32 %v692_v20, %v524_v22 }
 0x104   : > { %v721_v3 = vpop.f32.mrf.mxu0 }
 0x105   : > { %v536_v29 = vpack.c.bf16 %v525_v28, %v522_v23 }
 0x107   : > { %731 = vmatmul.mubr.msk.bf16.vlgmr.msra.gmra.mxu1 %vm483_vm9, %v536_v29 }
 0x1c7   : > { %v585_v31 = vpop.f32.mrf.mxu1 }
 0x1c8   : > { %v586_v32 = vadd.f32 %v694_v30, %v585_v31 }
 0x1c9   : > { %v732_v33 = vpop.f32.mrf.mxu1 }
 0x1ca   : > { %v592_v34 = vmax.f32 %v586_v32, 0.0 }
 0x1cb   : > { %v588_v8 = vpop.f32.mrf.mxu1 }
 0x1cc   : > { %594 = vst [vmem:[%s262_s23] sm:$0xff] %v592_v34  ;;  %v589_v9 = vadd.f32 %v694_v30, %v588_v8 }
 0x1cd   : > { %v733_v10 = vpop.f32.mrf.mxu1 }
 0x1ce   : > { %v593_v11 = vmax.f32 %v589_v9, 0.0 }
 0x1d0   : > { %595 = vst [vmem:[%s262_s23 + $0x8] sm:$0xff] %v593_v11 }
 0x1d1 PF: > { %s15_s20 = sadd.s32 1, %s782_s20   ;;  %s1003_s18 = smov %s778_s19 }
 0x1d2   : > { %p12_p5 = scmp.ge.s32.totalorder %s15_s20, 4   ;;  %s1004_s19 = smov %s1006_s21 }
 0x1d4   :  { %14 = sbr.rel (!%p12_p5) target bundleno = 2 (0x2), region = 70 }

// kernel: _lambda_.7
= control target key start
LH: loop header
LB: loop body
LE: loop exit
PB: predicated region body
PF: predicated region fallthrough
CT: control target
= control target key end

     0   :  { %14 = vsyncpa [#allocation4], 0  ;;  %s3149_s0 = inlined_call_operand.vmem [shape: f32[2,16,4,128], index: 0, kind: input, shape index: {}]   ;;  %s3150_s1 = inlined_call_operand.vmem [shape: f32[128,128], index: 1, kind: input, shape index: {}]   ;;  %s3151_s2 = inlined_call_operand.vmem [shape: f32[1,128], index: 2, kind: input, shape index: {}]   ;;  %s3152_s3 = inlined_call_operand.vmem [shape: f32[128,1024], index: 3, kind: input, shape index: {}]   ;;  %s3153_s4 = inlined_call_operand.vmem [shape: f32[1,1024], index: 4, kind: input, shape index: {}]   ;;  %s3154_s5 = inlined_call_operand.vmem [shape: f32[1024,32], index: 5, kind: input, shape index: {}]   ;;  %s3155_s6 = inlined_call_operand.vmem [shape: f32[1,32], index: 6, kind: input, shape index: {}]   ;;  %s3156_s7 = inlined_call_operand.vmem [shape: f32[32,32], index: 7, kind: input, shape index: {}]   ;;  %s3157_s8 = inlined_call_operand.vmem [shape: f32[1,32], index: 8, kind: input, shape index: {}]   ;;  %s3158_s9 = inlined_call_operand.hbm [shape: f32[2,1,32], index: 9, kind: output, shape index: {}]  }
   0x1   :  { %16 = vsyncpa [#allocation4 + $0x1], 0  ;;  %s2036_s30 = smov 0   ;;  %s2038_s10 = smov 0  }
   0x2   :  { %s2040_s11 = smov 0   ;;  %s2042_s12 = smov 0  }
   0x3   :  { %s2044_s13 = smov 0   ;;  %s2046_s14 = smov 0  }
   0x4 LB: > { %3161 = sst [smem:[#allocation6_spill]] %s1975_s13  ;;  %s1703_s15 = sadd.s32 4294967295, %s1979_s14   ;;  %s1979_s14 = sphi %s2046_s14, %s22_s14   ;;  %s1975_s13 = sphi %s2044_s13, %s3166_s13   ;;  %s1971_s12 = sphi %s2042_s12, %s3165_s12   ;;  %s1967_s11 = sphi %s2040_s11, %s3169_s11   ;;  %s1963_s10 = sphi %s2038_s10, %s3168_s10   ;;  %s1959_s30 = sphi %s2036_s30, %s3167_s30  }
   0x5   : > { %s1704_s16 = sadd.s32 4294967294, %s1979_s14   ;;  %s34_s17 = sadd.s32 1, %s1975_s13 }
   0x6   : > { %s237_s18 = sadd.s32 1, %s1967_s11  ;;  %p36_p0 = scmp.ge.s32.totalorder %s34_s17, 2 }
   0x7   : > { %p247_p1 = scmp.ne.s32.totalorder %s1967_s11, %s1963_s10  ;;  %p248_p2 = scmp.eq.s32.totalorder %s1703_s15, 1 }
   0x8   : > { %p253_p3 = scmp.ne.s32.totalorder %s1963_s10, %s1959_s30  ;;  %s3171_s17 = smov (%p36_p0, %s34_s17), 0 }
   0x9   : > { %3162 = sst [smem:[#allocation7_spill]] %s3171_s17  ;;  %p2076_p4 = por %p248_p2, %p247_p1 }
   0xa   : > { %p254_p5 = scmp.eq.s32.totalorder %s1704_s16, 1  ;;  %s234_s20 = ssub.s32 %s1975_s13, %s3171_s17 }
   0xb   : > { %p1707_p6 = scmp.ge.s32.totalorder %s1979_s14, 1  ;;  %p235_p7 = scmp.eq.s32.totalorder %s234_s20, 0 }
   0xc   : > { %p2083_p8 = por %p254_p5, %p253_p3  ;;  %p309_p9 = scmp.lt.s32.totalorder %s1979_s14, 3 }
   0xd   : > { %s2089_s22 = scalar_select %p235_p7, %s1967_s11, %s237_s18  }
   0xe   : > { %p310_p10 = pnand %p1707_p6, %p309_p9 }
   0xf   : > { %p349_p11 = scmp.lt.s32.totalorder (!%p310_p10), %s1971_s12, 1  ;;  %s346_s27 = sand.u32 (!%p310_p10), 1, %s1963_s10  }
  0x10   : > { %313 = sbr.rel (%p310_p10) target bundleno = 982 (0x3d6), region = 56  ;;  %s1712_s18 = sshll.u32 (!%p310_p10), %s1971_s12, 4 }
  0x11   : > { %s347_s20 = scalar_lea.vmem (!%p310_p10), [#allocation3], %s346_s27  ;;  %s1622_s26 = scalar_lea.sflag (!%p310_p10), [#allocation4], %s346_s27 }
  0x12   : > { %s1985_s13 = smov (!%p310_p10), [#allocation3]  }
  0x15   : > { %v502_v0 = vld [vmem:[%s3150_s1 + $0x70] sm:$0xff]  ;;  %v503_v1 = vld [vmem:[%s3150_s1 + $0x78] sm:$0xff]  ;;  %v500_v2 = vld [vmem:[%s3150_s1 + $0x60] sm:$0xff]  ;;  %v1981_v3 = vmov 0.0   ;;  %vm1982_vm0 = vmmov 0   ;;  %s350_s16 = scalar_select %p349_p11, %s1971_s12, 1 }
  0x16   : > { %1816 = vmatprep.subr.bf16.mxu0 %v1981_v3  ;;  %v527_v4 = vpack.c.bf16 %v503_v1, %v502_v0  ;;  %v501_v5 = vld [vmem:[%s3150_s1 + $0x68] sm:$0xff]  ;;  %1832 = vmatprep.mubr.msk.bf16.mxu0 %vm1982_vm0, %v1981_v3  ;;  %v498_v7 = vld [vmem:[%s3150_s1 + $0x50] sm:$0xff]  ;;  %v499_v8 = vld [vmem:[%s3150_s1 + $0x58] sm:$0xff]  ;;  %vm375_vm1 = vcmask 1043456   ;;  %vm567_vm2 = vcmask 1041409   ;;  %vm569_vm3 = vcmask 1042434  }
  0x17   : > { %v526_v6 = vpack.c.bf16 %v501_v5, %v500_v2  ;;  %s1715_s25 = sshll.u32 %s350_s16, 6  ;;  %v496_v9 = vld [vmem:[%s3150_s1 + $0x40] sm:$0xff]  ;;  %v744_v10 = vld [vmem:[%s3152_s3 + $0x388] sm:$0xff]  ;;  %v494_v13 = vld [vmem:[%s3150_s1 + $0x30] sm:$0xff]  ;;  %v525_v16 = vpack.c.bf16 %v499_v8, %v498_v7  ;;  %vm571_vm4 = vcmask 1043459   ;;  %vm573_vm5 = vcmask 1044484  }
  0x18   : > { %1817 = vmatpush3.bf16.msra.mxu0 %v527_v4  ;;  %s2121_s15 = scalar_lea.vmem %s3149_s0, %s1715_s25  ;;  %v752_v11 = vld [vmem:[%s3152_s3 + $0x3c8] sm:$0xff]  ;;  %v495_v14 = vld [vmem:[%s3150_s1 + $0x38] sm:$0xff]  ;;  %v2141_v17 = vld [vmem:[%s3150_s1 + $0x20] sm:$0xff]  ;;  %vm575_vm6 = vcmask 1045509   ;;  %vm577_vm7 = vcmask 1046534   ;;  %vm579_vm8 = vcmask 1047559   ;;  %s3103_s25 = scalar_lea.hbm %s3158_s9, %s1712_s18 }
  0x19   : > { %1818 = vmatprep.subr.bf16.mxu0 %v1981_v3  ;;  %v497_v12 = vld [vmem:[%s3150_s1 + $0x48] sm:$0xff]  ;;  %v817_v15 = vpack.c.bf16 %v752_v11, %v744_v10  ;;  %v359_v19 = vld [vmem:[%s2121_s15] sm:$0xf]  ;;  %v360_v20 = vld [vmem:[%s2121_s15 + $0x4] sm:$0xf]  ;;  %v523_v25 = vpack.c.bf16 %v495_v14, %v494_v13  ;;  %vm1575_vm9 = vcmask 261120  }
  0x1a   : > { %v2146_v18 = vld [vmem:[%s3150_s1 + $0x28] sm:$0xff]  ;;  %v363_v23 = vld [vmem:[%s2121_s15 + $0x10] sm:$0xf]  ;;  %v524_v24 = vpack.c.bf16 %v497_v12, %v496_v9  ;;  %v364_v27 = vld [vmem:[%s2121_s15 + $0x14] sm:$0xf]  ;;  %v376_v30 = vsel %vm375_vm1, %v359_v19, -inf }
  0x1b   : > { %v361_v21 = vld [vmem:[%s2121_s15 + $0x8] sm:$0xf]  ;;  %v362_v22 = vld [vmem:[%s2121_s15 + $0xc] sm:$0xf]  ;;  %866 = vmatprep.subr.bf16.mxu1 %v817_v15  ;;  %v522_v26 = vpack.c.bf16 %v2146_v18, %v2141_v17  ;;  %v365_v28 = vld [vmem:[%s2121_s15 + $0x18] sm:$0xf] }
  0x1c   : > { %1819 = vmatpush3.bf16.msra.mxu0 %v526_v6  ;;  %v366_v29 = vld [vmem:[%s2121_s15 + $0x1c] sm:$0xf]  ;;  %v383_v31 = vsel %vm375_vm1, %v360_v20, -inf  ;;  %v390_v32 = vsel %vm375_vm1, %v361_v21, -inf  ;;  %v397_v33 = vsel %vm375_vm1, %v362_v22, -inf  ;;  %v377_v34 = vrot.slane %v376_v30, 4 }
  0x1d   : > { %1820 = vmatprep.subr.bf16.mxu0 %v1981_v3  ;;  %v384_v35 = vrot.slane %v383_v31, 4  ;;  %v391_v36 = vrot.slane %v390_v32, 4  ;;  %v398_v37 = vrot.slane %v397_v33, 4  ;;  %v404_v38 = vsel %vm375_vm1, %v363_v23, -inf  ;;  %v490_v58 = vld [vmem:[%s3150_s1 + $0x10] sm:$0xff]  ;;  %v491_v59 = vld [vmem:[%s3150_s1 + $0x18] sm:$0xff] }
  0x1e   : > { %v411_v39 = vsel %vm375_vm1, %v364_v27, -inf  ;;  %v418_v40 = vsel %vm375_vm1, %v365_v28, -inf  ;;  %v425_v41 = vsel %vm375_vm1, %v366_v29, -inf  ;;  %v378_v42 = vmax.f32 %v376_v30, %v377_v34  ;;  %v488_v0 = vld [vmem:[%s3150_s1] sm:$0xff]  ;;  %v489_v1 = vld [vmem:[%s3150_s1 + $0x8] sm:$0xff]  ;;  %s1634_s16 = sshll.u32 %s347_s20, 4  ;;  %s3105_s16 = int_to_ptr.vmem [resolvable:$true] %s1634_s16 }
  0x1f   : > { %v385_v43 = vmax.f32 %v383_v31, %v384_v35  ;;  %v392_v44 = vmax.f32 %v390_v32, %v391_v36  ;;  %v399_v45 = vmax.f32 %v397_v33, %v398_v37  ;;  %v405_v46 = vrot.slane %v404_v38, 4  ;;  %v367_v7 = vld [vmem:[%s2121_s15 + $0x20] sm:$0xf]  ;;  %v368_v12 = vld [vmem:[%s2121_s15 + $0x24] sm:$0xf]  ;;  %s1903_s12 = scalar_lea.vmem %s3105_s16, 16 }
  0x20   : > { %1821 = vmatpush3.bf16.msra.mxu0 %v525_v16  ;;  %v412_v47 = vrot.slane %v411_v39, 4  ;;  %v419_v48 = vrot.slane %v418_v40, 4  ;;  %v426_v49 = vrot.slane %v425_v41, 4  ;;  %v379_v50 = vrot.slane %v378_v42, 2  ;;  %v369_v13 = vld [vmem:[%s2121_s15 + $0x28] sm:$0xf]  ;;  %p1904_p12 = scmp.ne.s32.totalorder %s3105_s16, %s1903_s12 }
  0x21   : > { %1822 = vmatprep.subr.bf16.mxu0 %v1981_v3  ;;  %v386_v51 = vrot.slane %v385_v43, 2  ;;  %v393_v52 = vrot.slane %v392_v44, 2  ;;  %v400_v53 = vrot.slane %v399_v45, 2  ;;  %v406_v54 = vmax.f32 %v404_v38, %v405_v46  ;;  %v370_v14 = vld [vmem:[%s2121_s15 + $0x2c] sm:$0xf] }
  0x22   : > { %v413_v55 = vmax.f32 %v411_v39, %v412_v47  ;;  %v420_v56 = vmax.f32 %v418_v40, %v419_v48  ;;  %v427_v57 = vmax.f32 %v425_v41, %v426_v49  ;;  %v380_v60 = vmax.f32 %v378_v42, %v379_v50  ;;  %v371_v23 = vld [vmem:[%s2121_s15 + $0x30] sm:$0xf]  ;;  %v373_v27 = vld [vmem:[%s2121_s15 + $0x38] sm:$0xf]  ;;  %v374_v32 = vld [vmem:[%s2121_s15 + $0x3c] sm:$0xf]  ;;  %p1905_p13 = pnand %p1904_p12, %p2076_p4 }
  0x23   : > { %v387_v61 = vmax.f32 %v385_v43, %v386_v51  ;;  %v394_v62 = vmax.f32 %v392_v44, %v393_v52  ;;  %v401_v63 = vmax.f32 %v399_v45, %v400_v53  ;;  %v407_v2 = vrot.slane %v406_v54, 2 }
  0x24   : > { %1823 = vmatpush3.bf16.msra.mxu0 %v524_v24  ;;  %v414_v4 = vrot.slane %v413_v55, 2  ;;  %v421_v5 = vrot.slane %v420_v56, 2  ;;  %v428_v6 = vrot.slane %v427_v57, 2  ;;  %v381_v8 = vrot.slane %v380_v60, 1  ;;  %p1906_p0 = pneg %p1905_p13 }
  0x25   : > { %1824 = vmatprep.subr.bf16.mxu0 %v1981_v3  ;;  %v388_v9 = vrot.slane %v387_v61, 1  ;;  %v395_v10 = vrot.slane %v394_v62, 1  ;;  %v402_v11 = vrot.slane %v401_v63, 1  ;;  %v408_v15 = vmax.f32 %v406_v54, %v407_v2 }
  0x26   : > { %v2186_v16 = vmax.f32 %v413_v55, %v414_v4  ;;  %v2188_v19 = vmax.f32 %v420_v56, %v421_v5  ;;  %v2190_v20 = vmax.f32 %v427_v57, %v428_v6  ;;  %v521_v21 = vpack.c.bf16 %v491_v59, %v490_v58 }
  0x27   : > { %v520_v22 = vpack.c.bf16 %v489_v1, %v488_v0  ;;  %v2193_v24 = vmax.f32 %v380_v60, %v381_v8  ;;  %v2200_v28 = vmax.f32 %v387_v61, %v388_v9  ;;  %v2202_v29 = vmax.f32 %v394_v62, %v395_v10 }
  0x28   : > { %1825 = vmatpush3.bf16.msra.mxu0 %v523_v25  ;;  %v372_v25 = vld [vmem:[%s2121_s15 + $0x34] sm:$0xf]  ;;  %v2204_v30 = vmax.f32 %v401_v63, %v402_v11  ;;  %v409_v31 = vrot.slane %v408_v15, 1  ;;  %v432_v33 = vsel %vm375_vm1, %v367_v7, -inf  ;;  %v439_v34 = vsel %vm375_vm1, %v368_v12, -inf  ;;  %s1907_s15 = sshll.u32 %s1985_s13, 4  ;;  %s1908_s15 = int_to_ptr.vmem [resolvable:$false] %s1907_s15 }
  0x29   : > { %1826 = vmatprep.subr.bf16.mxu0 %v1981_v3  ;;  %v446_v35 = vsel %vm375_vm1, %v369_v13, -inf  ;;  %v453_v17 = vsel %vm375_vm1, %v370_v14, -inf  ;;  %v423_v36 = vrot.slane %v2188_v19, 1  ;;  %v430_v37 = vrot.slane %v2190_v20, 1  ;;  %s1909_s17 = scalar_lea.vmem %s1908_s15, 32  ;;  %p1910_p1 = scmp.lt.s32.totalorder %s3105_s16, %s1908_s15 }
  0x2a   : > { %v2212_v18 = vmax.f32 %v408_v15, %v409_v31  ;;  %v433_v38 = vrot.slane %v432_v33, 4  ;;  %v440_v39 = vrot.slane %v439_v34, 4  ;;  %v447_v40 = vrot.slane %v446_v35, 4  ;;  %p1911_p2 = scmp.lt.s32.totalorder %s1909_s17, %s1903_s12 }
  0x2b   : > { %v454_v41 = vrot.slane %v453_v17, 4  ;;  %v460_v42 = vsel %vm375_vm1, %v371_v23, -inf  ;;  %v467_v43 = vsel %vm375_vm1, %v372_v25, -inf  ;;  %v474_v44 = vsel %vm375_vm1, %v373_v27, -inf }
  0x2c   : > { %1827 = vmatpush3.bf16.msra.mxu0 %v522_v26  ;;  %v416_v26 = vrot.slane %v2186_v16, 1  ;;  %v481_v45 = vsel %vm375_vm1, %v374_v32, -inf  ;;  %v434_v46 = vmax.f32 %v432_v33, %v433_v38  ;;  %v441_v47 = vmax.f32 %v439_v34, %v440_v39  ;;  %p1912_p3 = por %p1911_p2, %p1910_p1 }
  0x2d   : > { %1828 = vmatprep.subr.bf16.mxu0 %v1981_v3  ;;  %v448_v48 = vmax.f32 %v446_v35, %v447_v40  ;;  %v455_v49 = vmax.f32 %v453_v17, %v454_v41  ;;  %v461_v50 = vrot.slane %v460_v42, 4  ;;  %v468_v51 = vrot.slane %v467_v43, 4 }
  0x2e   : > { %v475_v52 = vrot.slane %v474_v44, 4  ;;  %v482_v53 = vrot.slane %v481_v45, 4  ;;  %v435_v54 = vrot.slane %v434_v46, 2  ;;  %v442_v55 = vrot.slane %v441_v47, 2  ;;  %p1913_p5 = pnand %p1912_p3, %p1906_p0 }
  0x2f   : > { %v449_v56 = vrot.slane %v448_v48, 2  ;;  %v456_v57 = vrot.slane %v455_v49, 2  ;;  %v462_v58 = vmax.f32 %v460_v42, %v461_v50  ;;  %v469_v59 = vmax.f32 %v467_v43, %v468_v51 }
  0x30   : > { %1829 = vmatpush3.bf16.msra.mxu0 %v521_v21  ;;  %v476_v60 = vmax.f32 %v474_v44, %v475_v52  ;;  %v483_v61 = vmax.f32 %v481_v45, %v482_v53  ;;  %v436_v62 = vmax.f32 %v434_v46, %v435_v54  ;;  %v443_v63 = vmax.f32 %v441_v47, %v442_v55  ;;  %v754_v52 = vld [vmem:[%s3152_s3 + $0x3d8] sm:$0xff]  ;;  %v743_v53 = vld [vmem:[%s3152_s3 + $0x380] sm:$0xff] }
  0x31   : > { %1830 = vmatprep.subr.bf16.mxu0 %v1981_v3  ;;  %v450_v0 = vmax.f32 %v448_v48, %v449_v56  ;;  %v457_v1 = vmax.f32 %v455_v49, %v456_v57  ;;  %v463_v2 = vrot.slane %v462_v58, 2  ;;  %v470_v4 = vrot.slane %v469_v59, 2  ;;  %v751_v54 = vld [vmem:[%s3152_s3 + $0x3c0] sm:$0xff] }
  0x32   : > { %v477_v5 = vrot.slane %v476_v60, 2  ;;  %v484_v6 = vrot.slane %v483_v61, 2  ;;  %v437_v7 = vrot.slane %v436_v62, 1  ;;  %v444_v8 = vrot.slane %v443_v63, 1 }
  0x33   : > { %v451_v9 = vrot.slane %v450_v0, 1  ;;  %v458_v10 = vrot.slane %v457_v1, 1  ;;  %v464_v11 = vmax.f32 %v462_v58, %v463_v2  ;;  %v471_v12 = vmax.f32 %v469_v59, %v470_v4  ;;  %v728_v59 = vld [vmem:[%s3152_s3 + $0x308] sm:$0xff] }
  0x34   : > { %1831 = vmatpush3.bf16.msra.mxu0 %v520_v22  ;;  %v478_v13 = vmax.f32 %v476_v60, %v477_v5  ;;  %v485_v14 = vmax.f32 %v483_v61, %v484_v6  ;;  %v438_v15 = vmax.f32 %v436_v62, %v437_v7  ;;  %v445_v21 = vmax.f32 %v443_v63, %v444_v8  ;;  %v736_v60 = vld [vmem:[%s3152_s3 + $0x348] sm:$0xff]  ;;  %v727_v6 = vld [vmem:[%s3152_s3 + $0x300] sm:$0xff] }
  0x35   : > { %v452_v22 = vmax.f32 %v450_v0, %v451_v9  ;;  %v459_v23 = vmax.f32 %v457_v1, %v458_v10  ;;  %v465_v25 = vrot.slane %v464_v11, 1  ;;  %v472_v27 = vrot.slane %v471_v12, 1  ;;  %v735_v7 = vld [vmem:[%s3152_s3 + $0x340] sm:$0xff] }
  0x36   : > { %v479_v31 = vrot.slane %v478_v13, 1  ;;  %v486_v32 = vrot.slane %v485_v14, 1  ;;  %v417_v33 = vmax.f32 %v2186_v16, %v416_v26  ;;  %v424_v34 = vmax.f32 %v2188_v19, %v423_v36 }
  0x37   : > { %v431_v35 = vmax.f32 %v2190_v20, %v430_v37  ;;  %v504_v17 = vpack.c.bf16 %v2193_v24, %v2193_v24  ;;  %v466_v38 = vmax.f32 %v464_v11, %v465_v25  ;;  %v473_v39 = vmax.f32 %v471_v12, %v472_v27  ;;  %v712_v12 = vld [vmem:[%s3152_s3 + $0x288] sm:$0xff]  ;;  %v753_v25 = vld [vmem:[%s3152_s3 + $0x3d0] sm:$0xff] }
  0x38   : > { %v480_v40 = vmax.f32 %v478_v13, %v479_v31  ;;  %v505_v41 = vpack.c.bf16 %v2200_v28, %v2200_v28  ;;  %v487_v42 = vmax.f32 %v485_v14, %v486_v32  ;;  %v506_v43 = vpack.c.bf16 %v2202_v29, %v2202_v29  ;;  %v720_v13 = vld [vmem:[%s3152_s3 + $0x2c8] sm:$0xff]  ;;  %v730_v32 = vld [vmem:[%s3152_s3 + $0x318] sm:$0xff] }
  0x39   : > { %v507_v16 = vpack.c.bf16 %v2204_v30, %v2204_v30  ;;  %v508_v19 = vpack.c.bf16 %v2212_v18, %v2212_v18  ;;  %v512_v20 = vpack.c.bf16 %v438_v15, %v438_v15  ;;  %v513_v24 = vpack.c.bf16 %v445_v21, %v445_v21  ;;  %v746_v30 = vld [vmem:[%s3152_s3 + $0x398] sm:$0xff] }
  0x3a   : > { %v514_v26 = vpack.c.bf16 %v452_v22, %v452_v22  ;;  %v515_v36 = vpack.c.bf16 %v459_v23, %v459_v23  ;;  %v509_v37 = vpack.c.bf16 %v417_v33, %v417_v33  ;;  %v510_v44 = vpack.c.bf16 %v424_v34, %v424_v34  ;;  %v745_v23 = vld [vmem:[%s3152_s3 + $0x390] sm:$0xff]  ;;  %v711_v34 = vld [vmem:[%s3152_s3 + $0x280] sm:$0xff] }
  0x3b   : > { %v516_v28 = vpack.c.bf16 %v466_v38, %v466_v38  ;;  %v517_v45 = vpack.c.bf16 %v473_v39, %v473_v39  ;;  %v511_v46 = vpack.c.bf16 %v431_v35, %v431_v35  ;;  %v518_v47 = vpack.c.bf16 %v480_v40, %v480_v40  ;;  %v719_v35 = vld [vmem:[%s3152_s3 + $0x2c0] sm:$0xff]  ;;  %v738_v39 = vld [vmem:[%s3152_s3 + $0x358] sm:$0xff] }
  0x3c   : > { %v551_v48 = vunpack.c.l.b16 %v504_v17  ;;  %v552_v29 = vunpack.c.l.b16 %v505_v41  ;;  %v519_v49 = vpack.c.bf16 %v487_v42, %v487_v42  ;;  %v553_v18 = vunpack.c.l.b16 %v506_v43  ;;  %v696_v41 = vld [vmem:[%s3152_s3 + $0x208] sm:$0xff] }
  0x3d   : > { %v554_v50 = vunpack.c.l.b16 %v507_v16  ;;  %v555_v51 = vunpack.c.l.b16 %v508_v19  ;;  %v559_v55 = vunpack.c.l.b16 %v512_v20  ;;  %v560_v56 = vunpack.c.l.b16 %v513_v24  ;;  %v704_v42 = vld [vmem:[%s3152_s3 + $0x248] sm:$0xff] }
  0x3e   : > { %v561_v57 = vunpack.c.l.b16 %v514_v26  ;;  %v562_v58 = vunpack.c.l.b16 %v515_v36  ;;  %v556_v61 = vunpack.c.l.b16 %v509_v37  ;;  %v557_v62 = vunpack.c.l.b16 %v510_v44  ;;  %v729_v26 = vld [vmem:[%s3152_s3 + $0x310] sm:$0xff] }
  0x3f   : > { %v563_v63 = vunpack.c.l.b16 %v516_v28  ;;  %v564_v0 = vunpack.c.l.b16 %v517_v45  ;;  %v568_v1 = vsel %vm567_vm2, %v552_v29, %v551_v48  ;;  %v581_v2 = vsel %vm567_vm2, %v560_v56, %v559_v55  ;;  %v737_v36 = vld [vmem:[%s3152_s3 + $0x350] sm:$0xff]  ;;  %v714_v45 = vld [vmem:[%s3152_s3 + $0x298] sm:$0xff]  ;;  %v703_v48 = vld [vmem:[%s3152_s3 + $0x240] sm:$0xff] }
  0x40   : > { %v819_v4 = vpack.c.bf16 %v754_v52, %v746_v30  ;;  %v816_v5 = vpack.c.bf16 %v751_v54, %v743_v53  ;;  %v565_v8 = vunpack.c.l.b16 %v518_v47  ;;  %v570_v9 = vsel %vm569_vm3, %v553_v18, %v568_v1  ;;  %v695_v47 = vld [vmem:[%s3152_s3 + $0x200] sm:$0xff]  ;;  %v722_v29 = vld [vmem:[%s3152_s3 + $0x2d8] sm:$0xff]  ;;  %v680_v30 = vld [vmem:[%s3152_s3 + $0x188] sm:$0xff] }
  0x41   : > { %v582_v10 = vsel %vm569_vm3, %v561_v57, %v581_v2  ;;  %v809_v11 = vpack.c.bf16 %v736_v60, %v728_v59  ;;  %v558_v14 = vunpack.c.l.b16 %v511_v46  ;;  %v566_v15 = vunpack.c.l.b16 %v519_v49  ;;  %v688_v49 = vld [vmem:[%s3152_s3 + $0x1c8] sm:$0xff]  ;;  %v698_v54 = vld [vmem:[%s3152_s3 + $0x218] sm:$0xff]  ;;  %v679_v56 = vld [vmem:[%s3152_s3 + $0x180] sm:$0xff] }
  0x42   : > { %v572_v21 = vsel %vm571_vm4, %v554_v50, %v570_v9  ;;  %v583_v22 = vsel %vm571_vm4, %v562_v58, %v582_v10  ;;  %909 = vmatprep.subr.bf16.mxu0 %v819_v4  ;;  %867 = vmatpush1.bf16.msra.mxu1 %v816_v5  ;;  %v808_v33 = vpack.c.bf16 %v735_v7, %v727_v6  ;;  %v713_v50 = vld [vmem:[%s3152_s3 + $0x290] sm:$0xff]  ;;  %v687_v57 = vld [vmem:[%s3152_s3 + $0x1c0] sm:$0xff]  ;;  %v706_v58 = vld [vmem:[%s3152_s3 + $0x258] sm:$0xff]  ;;  %vm1619_vm10 = vcmask 253952  }
  0x43   : > { %v574_v27 = vsel %vm573_vm5, %v555_v51, %v572_v21  ;;  %v584_v31 = vsel %vm573_vm5, %v563_v63, %v583_v22  ;;  %868 = vmatprep.subr.bf16.mxu1 %v809_v11  ;;  %v801_v40 = vpack.c.bf16 %v720_v13, %v712_v12  ;;  %v818_v24 = vpack.c.bf16 %v753_v25, %v745_v23  ;;  %v721_v51 = vld [vmem:[%s3152_s3 + $0x2d0] sm:$0xff]  ;;  %v664_v59 = vld [vmem:[%s3152_s3 + $0x108] sm:$0xff]  ;;  %v663_v4 = vld [vmem:[%s3152_s3 + $0x100] sm:$0xff] }
  0x44   : > { %v576_v17 = vsel %vm575_vm6, %v556_v61, %v574_v27  ;;  %v585_v38 = vsel %vm575_vm6, %v564_v0, %v584_v31  ;;  %v800_v37 = vpack.c.bf16 %v719_v35, %v711_v34  ;;  %v811_v28 = vpack.c.bf16 %v738_v39, %v730_v32  ;;  %v672_v60 = vld [vmem:[%s3152_s3 + $0x148] sm:$0xff]  ;;  %v705_v1 = vld [vmem:[%s3152_s3 + $0x250] sm:$0xff]  ;;  %v671_v5 = vld [vmem:[%s3152_s3 + $0x140] sm:$0xff] }
  0x45   : > { %v578_v43 = vsel %vm577_vm7, %v557_v62, %v576_v17  ;;  %v586_v16 = vsel %vm577_vm7, %v565_v8, %v585_v38  ;;  %v793_v46 = vpack.c.bf16 %v704_v42, %v696_v41  ;;  %v810_v18 = vpack.c.bf16 %v737_v36, %v729_v26  ;;  %v697_v62 = vld [vmem:[%s3152_s3 + $0x210] sm:$0xff]  ;;  %v682_v6 = vld [vmem:[%s3152_s3 + $0x198] sm:$0xff]  ;;  %v648_v27 = vld [vmem:[%s3152_s3 + $0x88] sm:$0xff] }
  0x46   : > { %v580_v19 = vsel %vm579_vm8, %v558_v14, %v578_v43  ;;  %v587_v20 = vsel %vm579_vm8, %v566_v15, %v586_v16  ;;  %869 = vmatpush1.bf16.msra.mxu1 %v808_v33  ;;  %v792_v52 = vpack.c.bf16 %v703_v48, %v695_v47  ;;  %v803_v53 = vpack.c.bf16 %v722_v29, %v714_v45  ;;  %v690_v7 = vld [vmem:[%s3152_s3 + $0x1d8] sm:$0xff]  ;;  %v681_v11 = vld [vmem:[%s3152_s3 + $0x190] sm:$0xff]  ;;  %v656_v31 = vld [vmem:[%s3152_s3 + $0xc8] sm:$0xff] }
  0x47   : > { %v588_v44 = vpack.c.b16 %v587_v20, %v580_v19  ;;  %870 = vmatprep.subr.bf16.mxu1 %v801_v40  ;;  %v785_v55 = vpack.c.bf16 %v688_v49, %v680_v30  ;;  %v802_v61 = vpack.c.bf16 %v721_v51, %v713_v50  ;;  %v784_v63 = vpack.c.bf16 %v687_v57, %v679_v56  ;;  %v689_v12 = vld [vmem:[%s3152_s3 + $0x1d0] sm:$0xff]  ;;  %v666_v13 = vld [vmem:[%s3152_s3 + $0x118] sm:$0xff]  ;;  %v647_v35 = vld [vmem:[%s3152_s3 + $0x80] sm:$0xff] }
  0x48   : > { %v795_v0 = vpack.c.bf16 %v706_v58, %v698_v54  ;;  %v777_v2 = vpack.c.bf16 %v672_v60, %v664_v59  ;;  %v794_v8 = vpack.c.bf16 %v705_v1, %v697_v62  ;;  %v776_v9 = vpack.c.bf16 %v671_v5, %v663_v4  ;;  %v674_v14 = vld [vmem:[%s3152_s3 + $0x158] sm:$0xff]  ;;  %v665_v22 = vld [vmem:[%s3152_s3 + $0x110] sm:$0xff]  ;;  %v655_v17 = vld [vmem:[%s3152_s3 + $0xc0] sm:$0xff] }
  0x49   : > { %1833 = vmatmul.mubr.bf16.vlgmr.msra.gmra.mxu0 %v588_v44  ;;  %v787_v10 = vpack.c.bf16 %v690_v7, %v682_v6  ;;  %v786_v15 = vpack.c.bf16 %v689_v12, %v681_v11  ;;  %v779_v21 = vpack.c.bf16 %v674_v14, %v666_v13  ;;  %v673_v23 = vld [vmem:[%s3152_s3 + $0x150] sm:$0xff]  ;;  %v650_v32 = vld [vmem:[%s3152_s3 + $0x98] sm:$0xff]  ;;  %v769_v33 = vpack.c.bf16 %v656_v31, %v648_v27  ;;  %v632_v43 = vld [vmem:[%s3152_s3 + $0x8] sm:$0xff] }
  0x4a   : > { %910 = vmatpush1.bf16.msra.mxu0 %v818_v24  ;;  %871 = vmatpush1.bf16.msra.mxu1 %v800_v37  ;;  %v778_v25 = vpack.c.bf16 %v673_v23, %v665_v22  ;;  %v658_v34 = vld [vmem:[%s3152_s3 + $0xd8] sm:$0xff]  ;;  %v768_v39 = vpack.c.bf16 %v655_v17, %v647_v35  ;;  %v649_v40 = vld [vmem:[%s3152_s3 + $0x90] sm:$0xff]  ;;  %v640_v16 = vld [vmem:[%s3152_s3 + $0x48] sm:$0xff]  ;;  %v1983_v50 = vmov 0  }
  0x4b   : > { %911 = vmatprep.subr.bf16.mxu0 %v811_v28  ;;  %872 = vmatprep.subr.bf16.mxu1 %v793_v46  ;;  %v771_v38 = vpack.c.bf16 %v658_v34, %v650_v32  ;;  %v657_v41 = vld [vmem:[%s3152_s3 + $0xd0] sm:$0xff]  ;;  %v634_v19 = vld [vmem:[%s3152_s3 + $0x18] sm:$0xff]  ;;  %v761_v20 = vpack.c.bf16 %v640_v16, %v632_v43  ;;  %v631_v26 = vld [vmem:[%s3152_s3] sm:$0xff] }
  0x4c   : > { %v770_v42 = vpack.c.bf16 %v657_v41, %v649_v40  ;;  %v642_v24 = vld [vmem:[%s3152_s3 + $0x58] sm:$0xff]  ;;  %v639_v36 = vld [vmem:[%s3152_s3 + $0x40] sm:$0xff]  ;;  %v633_v28 = vld [vmem:[%s3152_s3 + $0x10] sm:$0xff]  ;;  %898 = vmatprep.mubr.bf16.mxu1 %v1983_v50  ;;  %941 = vmatprep.mubr.bf16.mxu0 %v1983_v50 }
  0x4d   : > { %v763_v37 = vpack.c.bf16 %v642_v24, %v634_v19  ;;  %v760_v44 = vpack.c.bf16 %v639_v36, %v631_v26  ;;  %v641_v45 = vld [vmem:[%s3152_s3 + $0x50] sm:$0xff]  ;;  %v748_v47 = vld [vmem:[%s3152_s3 + $0x3a8] sm:$0xff]  ;;  %v750_v29 = vld [vmem:[%s3152_s3 + $0x3b8] sm:$0xff] }
  0x4e   : > { %912 = vmatpush1.bf16.msra.mxu0 %v810_v18  ;;  %873 = vmatpush1.bf16.msra.mxu1 %v792_v52  ;;  %v762_v46 = vpack.c.bf16 %v641_v45, %v633_v28  ;;  %v756_v48 = vld [vmem:[%s3152_s3 + $0x3e8] sm:$0xff]  ;;  %v758_v49 = vld [vmem:[%s3152_s3 + $0x3f8] sm:$0xff]  ;;  %v1710_v52 = vld [vmem:[%s3151_s2] ss:$0 sm:$0xff] }
  0x4f   : > { %913 = vmatprep.subr.bf16.mxu0 %v803_v53  ;;  %874 = vmatprep.subr.bf16.mxu1 %v785_v55  ;;  %v821_v30 = vpack.c.bf16 %v756_v48, %v748_v47  ;;  %v823_v18 = vpack.c.bf16 %v758_v49, %v750_v29  ;;  %v747_v54 = vld [vmem:[%s3152_s3 + $0x3a0] sm:$0xff]  ;;  %v749_v56 = vld [vmem:[%s3152_s3 + $0x3b0] sm:$0xff]  ;;  %v732_v58 = vld [vmem:[%s3152_s3 + $0x328] sm:$0xff] }
  0x50   : > { %v755_v55 = vld [vmem:[%s3152_s3 + $0x3e0] sm:$0xff]  ;;  %v757_v57 = vld [vmem:[%s3152_s3 + $0x3f0] sm:$0xff]  ;;  %v740_v60 = vld [vmem:[%s3152_s3 + $0x368] sm:$0xff] }
  0x51   : > { %v742_v62 = vld [vmem:[%s3152_s3 + $0x378] sm:$0xff]  ;;  %v822_v4 = vpack.c.bf16 %v757_v57, %v749_v56  ;;  %v731_v5 = vld [vmem:[%s3152_s3 + $0x320] sm:$0xff]  ;;  %v741_v11 = vld [vmem:[%s3152_s3 + $0x370] sm:$0xff] }
  0x52   : > { %914 = vmatpush1.bf16.msra.mxu0 %v802_v61  ;;  %875 = vmatpush1.bf16.msra.mxu1 %v784_v63  ;;  %v734_v61 = vld [vmem:[%s3152_s3 + $0x338] sm:$0xff]  ;;  %v739_v6 = vld [vmem:[%s3152_s3 + $0x360] sm:$0xff]  ;;  %v716_v12 = vld [vmem:[%s3152_s3 + $0x2a8] sm:$0xff] }
  0x53   : > { %915 = vmatprep.subr.bf16.mxu0 %v795_v0  ;;  %876 = vmatprep.subr.bf16.mxu1 %v777_v2  ;;  %v820_v2 = vpack.c.bf16 %v755_v55, %v747_v54  ;;  %v724_v13 = vld [vmem:[%s3152_s3 + $0x2e8] sm:$0xff]  ;;  %v718_v14 = vld [vmem:[%s3152_s3 + $0x2b8] sm:$0xff]  ;;  %v715_v23 = vld [vmem:[%s3152_s3 + $0x2a0] sm:$0xff] }
  0x54   : > { %v805_v27 = vpack.c.bf16 %v724_v13, %v716_v12  ;;  %v717_v32 = vld [vmem:[%s3152_s3 + $0x2b0] sm:$0xff]  ;;  %v700_v34 = vld [vmem:[%s3152_s3 + $0x228] sm:$0xff]  ;;  %v702_v17 = vld [vmem:[%s3152_s3 + $0x238] sm:$0xff] }
  0x55   : > { %v708_v35 = vld [vmem:[%s3152_s3 + $0x268] sm:$0xff]  ;;  %v699_v41 = vld [vmem:[%s3152_s3 + $0x220] sm:$0xff]  ;;  %v701_v19 = vld [vmem:[%s3152_s3 + $0x230] sm:$0xff] }
  0x56   : > { %916 = vmatpush1.bf16.msra.mxu0 %v794_v8  ;;  %877 = vmatpush1.bf16.msra.mxu1 %v776_v9  ;;  %v813_v8 = vpack.c.bf16 %v740_v60, %v732_v58  ;;  %v815_v9 = vpack.c.bf16 %v742_v62, %v734_v61  ;;  %v797_v43 = vpack.c.bf16 %v708_v35, %v700_v34  ;;  %v684_v24 = vld [vmem:[%s3152_s3 + $0x1a8] sm:$0xff]  ;;  %v686_v36 = vld [vmem:[%s3152_s3 + $0x1b8] sm:$0xff]  ;;  %v683_v45 = vld [vmem:[%s3152_s3 + $0x1a0] sm:$0xff] }
  0x57   : > { %917 = vmatprep.subr.bf16.mxu0 %v787_v10  ;;  %878 = vmatprep.subr.bf16.mxu1 %v769_v33  ;;  %v733_v10 = vld [vmem:[%s3152_s3 + $0x330] sm:$0xff]  ;;  %v692_v26 = vld [vmem:[%s3152_s3 + $0x1e8] sm:$0xff]  ;;  %v667_v54 = vld [vmem:[%s3152_s3 + $0x120] sm:$0xff] }
  0x58   : > { %v814_v22 = vpack.c.bf16 %v741_v11, %v733_v10  ;;  %v725_v33 = vld [vmem:[%s3152_s3 + $0x2f0] sm:$0xff]  ;;  %v789_v47 = vpack.c.bf16 %v692_v26, %v684_v24  ;;  %v668_v49 = vld [vmem:[%s3152_s3 + $0x128] sm:$0xff]  ;;  %v675_v55 = vld [vmem:[%s3152_s3 + $0x160] sm:$0xff] }
  0x59   : > { %v806_v40 = vpack.c.bf16 %v725_v33, %v717_v32  ;;  %v685_v29 = vld [vmem:[%s3152_s3 + $0x1b0] sm:$0xff]  ;;  %v652_v60 = vld [vmem:[%s3152_s3 + $0xa8] sm:$0xff]  ;;  %v654_v62 = vld [vmem:[%s3152_s3 + $0xb8] sm:$0xff] }
  0x5a   : > { %918 = vmatpush1.bf16.msra.mxu0 %v786_v15  ;;  %879 = vmatpush1.bf16.msra.mxu1 %v768_v39  ;;  %v726_v15 = vld [vmem:[%s3152_s3 + $0x2f8] sm:$0xff]  ;;  %v669_v58 = vld [vmem:[%s3152_s3 + $0x130] sm:$0xff]  ;;  %v660_v61 = vld [vmem:[%s3152_s3 + $0xe8] sm:$0xff] }
  0x5b   : > { %919 = vmatprep.subr.bf16.mxu0 %v779_v21  ;;  %880 = vmatprep.subr.bf16.mxu1 %v761_v20  ;;  %v812_v21 = vpack.c.bf16 %v739_v6, %v731_v5  ;;  %v807_v31 = vpack.c.bf16 %v726_v15, %v718_v14  ;;  %v709_v20 = vld [vmem:[%s3152_s3 + $0x270] sm:$0xff]  ;;  %v773_v5 = vpack.c.bf16 %v660_v61, %v652_v60  ;;  %v636_v10 = vld [vmem:[%s3152_s3 + $0x28] sm:$0xff]  ;;  %v638_v12 = vld [vmem:[%s3152_s3 + $0x38] sm:$0xff] }
  0x5c   : > { %v798_v28 = vpack.c.bf16 %v709_v20, %v701_v19  ;;  %v644_v11 = vld [vmem:[%s3152_s3 + $0x68] sm:$0xff]  ;;  %v646_v13 = vld [vmem:[%s3152_s3 + $0x78] sm:$0xff]  ;;  %v1194_v34 = vld [vmem:[%s3154_s5 + $0xf0] sm:$0xff] }
  0x5d   : > { %v1195_v35 = vld [vmem:[%s3154_s5 + $0xf8] sm:$0xff]  ;;  %v1192_v20 = vld [vmem:[%s3154_s5 + $0xe0] sm:$0xff]  ;;  %v1193_v24 = vld [vmem:[%s3154_s5 + $0xe8] sm:$0xff] }
  0x5e   : > { %920 = vmatpush1.bf16.msra.mxu0 %v778_v25  ;;  %881 = vmatpush1.bf16.msra.mxu1 %v760_v44  ;;  %v723_v25 = vld [vmem:[%s3152_s3 + $0x2e0] sm:$0xff]  ;;  %v1189_v60 = vld [vmem:[%s3154_s5 + $0xc8] sm:$0xff] }
  0x5f   : > { %921 = vmatprep.subr.bf16.mxu0 %v771_v38  ;;  %952 = vmatprep.subr.bf16.mxu1 %v821_v30  ;;  %v710_v38 = vld [vmem:[%s3152_s3 + $0x278] sm:$0xff]  ;;  %v804_v39 = vpack.c.bf16 %v723_v25, %v715_v23  ;;  %v693_v30 = vld [vmem:[%s3152_s3 + $0x1f0] sm:$0xff]  ;;  %v767_v23 = vpack.c.bf16 %v646_v13, %v638_v12  ;;  %v643_v25 = vld [vmem:[%s3152_s3 + $0x60] sm:$0xff] }
  0x60   : > { %v799_v16 = vpack.c.bf16 %v710_v38, %v702_v17  ;;  %v1226_v17 = vld [vmem:[%s3154_s5 + $0x1f0] sm:$0xff]  ;;  %v1356_v38 = vpack.c.bf16 %v1195_v35, %v1194_v34  ;;  %v1224_v26 = vld [vmem:[%s3154_s5 + $0x1e0] sm:$0xff]  ;;  %v1219_v13 = vld [vmem:[%s3154_s5 + $0x1b8] sm:$0xff] }
  0x61   : > { %v1220_v61 = vld [vmem:[%s3154_s5 + $0x1c0] sm:$0xff]  ;;  %v1217_v35 = vld [vmem:[%s3154_s5 + $0x1a8] sm:$0xff] }
  0x62   : > { %922 = vmatpush1.bf16.msra.mxu0 %v770_v42  ;;  %v707_v42 = vld [vmem:[%s3152_s3 + $0x260] sm:$0xff] }
  0x63   : > { %923 = vmatprep.subr.bf16.mxu0 %v763_v37  ;;  %v694_v37 = vld [vmem:[%s3152_s3 + $0x1f8] sm:$0xff]  ;;  %v796_v44 = vpack.c.bf16 %v707_v42, %v699_v41 }
  0x64   : > { %v791_v48 = vpack.c.bf16 %v694_v37, %v686_v36  ;;  %v1355_v36 = vpack.c.bf16 %v1193_v24, %v1192_v20  ;;  %v1225_v37 = vld [vmem:[%s3154_s5 + $0x1e8] sm:$0xff]  ;;  %v1215_v24 = vld [vmem:[%s3154_s5 + $0x198] sm:$0xff] }
  0x66   : > { %924 = vmatpush1.bf16.msra.mxu0 %v762_v46  ;;  %v691_v46 = vld [vmem:[%s3152_s3 + $0x1e0] sm:$0xff] }
  0x67   : > { %995 = vmatprep.subr.bf16.mxu0 %v823_v18  ;;  %v676_v18 = vld [vmem:[%s3152_s3 + $0x168] sm:$0xff] }
  0x68   : > { %v781_v56 = vpack.c.bf16 %v676_v18, %v668_v49  ;;  %v1191_v49 = vld [vmem:[%s3154_s5 + $0xd8] sm:$0xff]  ;;  %v1222_v18 = vld [vmem:[%s3154_s5 + $0x1d0] sm:$0xff] }
 0x109   : > { %v624_v51 = vpop.f32.mrf.mxu0 }
 0x10a   : > { %v625_v63 = vadd.f32 %v1710_v52, %v624_v51  ;;  %v678_v51 = vld [vmem:[%s3152_s3 + $0x178] sm:$0xff] }
 0x10b   : > { %v1834_v53 = vpop.f32.mrf.mxu0 }
 0x10c   : > { %v790_v53 = vpack.c.bf16 %v693_v30, %v685_v29  ;;  %v1190_v30 = vld [vmem:[%s3154_s5 + $0xd0] sm:$0xff] }
 0x10d   : > { %v627_v59 = vpop.f32.mrf.mxu0 }
 0x10e   : > { %v628_v0 = vadd.f32 %v1710_v52, %v627_v59  ;;  %v788_v52 = vpack.c.bf16 %v691_v46, %v683_v45  ;;  %v677_v59 = vld [vmem:[%s3152_s3 + $0x170] sm:$0xff]  ;;  %v1371_v45 = vpack.c.bf16 %v1225_v37, %v1224_v26 }
 0x10f   : > { %v1835_v1 = vpop.f32.mrf.mxu0  ;;  %v1166_v26 = vld [vmem:[%s3154_s5 + $0x10] sm:$0xff] }
 0x110   : > { %v2480_v7 = vpack.c.bf16 %v628_v0, %v625_v63  ;;  %v662_v63 = vld [vmem:[%s3152_s3 + $0xf8] sm:$0xff]  ;;  %v780_v0 = vpack.c.bf16 %v675_v55, %v667_v54  ;;  %v782_v1 = vpack.c.bf16 %v677_v59, %v669_v58  ;;  %v1188_v59 = vld [vmem:[%s3154_s5 + $0xc0] sm:$0xff] }
 0x111   : > { %v775_v6 = vpack.c.bf16 %v662_v63, %v654_v62  ;;  %v1353_v62 = vpack.c.bf16 %v1189_v60, %v1188_v59  ;;  %v1221_v63 = vld [vmem:[%s3154_s5 + $0x1c8] sm:$0xff]  ;;  %v1291_v60 = vld [vmem:[%s3154_s5 + $0x3f8] sm:$0xff] }
 0x112   : > { %899 = vmatmul.mubr.bf16.vlgmr.msra.gmra.mxu1 %v2480_v7  ;;  %942 = vmatmul.mubr.bf16.vlgmr.msra.gmra.mxu0 %v2480_v7 }
 0x113   : > { %953 = vmatpush1.bf16.msra.mxu1 %v820_v2  ;;  %996 = vmatpush1.bf16.msra.mxu0 %v822_v4  ;;  %v651_v2 = vld [vmem:[%s3152_s3 + $0xa0] sm:$0xff] }
 0x114   : > { %954 = vmatprep.subr.bf16.mxu1 %v813_v8  ;;  %997 = vmatprep.subr.bf16.mxu0 %v815_v9  ;;  %v659_v4 = vld [vmem:[%s3152_s3 + $0xe0] sm:$0xff]  ;;  %v653_v8 = vld [vmem:[%s3152_s3 + $0xb0] sm:$0xff] }
 0x115   : > { %984 = vmatprep.mubr.bf16.mxu1 %v1983_v50  ;;  %1027 = vmatprep.mubr.bf16.mxu0 %v1983_v50  ;;  %v670_v50 = vld [vmem:[%s3152_s3 + $0x138] sm:$0xff]  ;;  %v661_v9 = vld [vmem:[%s3152_s3 + $0xf0] sm:$0xff]  ;;  %v772_v14 = vpack.c.bf16 %v659_v4, %v651_v2  ;;  %v1369_v2 = vpack.c.bf16 %v1221_v63, %v1220_v61 }
 0x116   : > { %v783_v57 = vpack.c.bf16 %v678_v51, %v670_v50  ;;  %v774_v15 = vpack.c.bf16 %v661_v9, %v653_v8  ;;  %v1354_v50 = vpack.c.bf16 %v1191_v49, %v1190_v30  ;;  %v1223_v51 = vld [vmem:[%s3154_s5 + $0x1d8] sm:$0xff]  ;;  %v1186_v9 = vld [vmem:[%s3154_s5 + $0xb0] sm:$0xff]  ;;  %v1213_v49 = vld [vmem:[%s3154_s5 + $0x188] sm:$0xff] }
 0x117   : > { %955 = vmatpush1.bf16.msra.mxu1 %v812_v21  ;;  %998 = vmatpush1.bf16.msra.mxu0 %v814_v22  ;;  %v635_v21 = vld [vmem:[%s3152_s3 + $0x20] sm:$0xff]  ;;  %v765_v22 = vpack.c.bf16 %v644_v11, %v636_v10  ;;  %v1370_v54 = vpack.c.bf16 %v1223_v51, %v1222_v18  ;;  %v1187_v10 = vld [vmem:[%s3154_s5 + $0xb8] sm:$0xff]  ;;  %v1218_v11 = vld [vmem:[%s3154_s5 + $0x1b0] sm:$0xff] }
 0x118   : > { %956 = vmatprep.subr.bf16.mxu1 %v805_v27  ;;  %999 = vmatprep.subr.bf16.mxu0 %v807_v31  ;;  %v637_v27 = vld [vmem:[%s3152_s3 + $0x30] sm:$0xff]  ;;  %v764_v32 = vpack.c.bf16 %v643_v25, %v635_v21  ;;  %v1352_v12 = vpack.c.bf16 %v1187_v10, %v1186_v9  ;;  %v1368_v21 = vpack.c.bf16 %v1219_v13, %v1218_v11  ;;  %v1203_v25 = vld [vmem:[%s3154_s5 + $0x138] sm:$0xff]  ;;  %v1164_v18 = vld [vmem:[%s3154_s5] sm:$0xff] }
 0x119   : > { %v645_v31 = vld [vmem:[%s3152_s3 + $0x70] sm:$0xff] }
 0x11a   : > { %v766_v33 = vpack.c.bf16 %v645_v31, %v637_v27  ;;  %v1184_v31 = vld [vmem:[%s3154_s5 + $0xa0] sm:$0xff] }
 0x11b   : > { %957 = vmatpush1.bf16.msra.mxu1 %v804_v39  ;;  %1000 = vmatpush1.bf16.msra.mxu0 %v806_v40  ;;  %v1227_v39 = vld [vmem:[%s3154_s5 + $0x1f8] sm:$0xff] }
 0x11c   : > { %958 = vmatprep.subr.bf16.mxu1 %v797_v43  ;;  %1001 = vmatprep.subr.bf16.mxu0 %v799_v16  ;;  %v1179_v40 = vld [vmem:[%s3154_s5 + $0x78] sm:$0xff]  ;;  %v1372_v41 = vpack.c.bf16 %v1227_v39, %v1226_v17  ;;  %v1210_v43 = vld [vmem:[%s3154_s5 + $0x170] sm:$0xff]  ;;  %v1168_v17 = vld [vmem:[%s3154_s5 + $0x20] sm:$0xff] }
 0x11d   : > { %v1211_v16 = vld [vmem:[%s3154_s5 + $0x178] sm:$0xff] }
 0x11e   : > { %v1364_v19 = vpack.c.bf16 %v1211_v16, %v1210_v43  ;;  %v1182_v43 = vld [vmem:[%s3154_s5 + $0x90] sm:$0xff]  ;;  %v1183_v16 = vld [vmem:[%s3154_s5 + $0x98] sm:$0xff] }
 0x11f   : > { %959 = vmatpush1.bf16.msra.mxu1 %v796_v44  ;;  %1002 = vmatpush1.bf16.msra.mxu0 %v798_v28  ;;  %v1176_v44 = vld [vmem:[%s3154_s5 + $0x60] sm:$0xff]  ;;  %v1177_v28 = vld [vmem:[%s3154_s5 + $0x68] sm:$0xff]  ;;  %v1350_v20 = vpack.c.bf16 %v1183_v16, %v1182_v43 }
 0x120   : > { %960 = vmatprep.subr.bf16.mxu1 %v789_v47  ;;  %1003 = vmatprep.subr.bf16.mxu0 %v791_v48  ;;  %v1347_v46 = vpack.c.bf16 %v1177_v28, %v1176_v44  ;;  %v1208_v47 = vld [vmem:[%s3154_s5 + $0x160] sm:$0xff]  ;;  %v1209_v48 = vld [vmem:[%s3154_s5 + $0x168] sm:$0xff]  ;;  %v1198_v28 = vld [vmem:[%s3154_s5 + $0x110] sm:$0xff] }
 0x121   : > { %v1363_v29 = vpack.c.bf16 %v1209_v48, %v1208_v47  ;;  %v1180_v47 = vld [vmem:[%s3154_s5 + $0x80] sm:$0xff]  ;;  %v1181_v48 = vld [vmem:[%s3154_s5 + $0x88] sm:$0xff] }
 0x122   : > { %v1349_v30 = vpack.c.bf16 %v1181_v48, %v1180_v47 }
 0x123   : > { %961 = vmatpush1.bf16.msra.mxu1 %v788_v52  ;;  %1004 = vmatpush1.bf16.msra.mxu0 %v790_v53  ;;  %v1174_v52 = vld [vmem:[%s3154_s5 + $0x50] sm:$0xff]  ;;  %v1175_v53 = vld [vmem:[%s3154_s5 + $0x58] sm:$0xff] }
 0x124   : > { %962 = vmatprep.subr.bf16.mxu1 %v781_v56  ;;  %1005 = vmatprep.subr.bf16.mxu0 %v783_v57  ;;  %v1346_v55 = vpack.c.bf16 %v1175_v53, %v1174_v52  ;;  %v1206_v56 = vld [vmem:[%s3154_s5 + $0x150] sm:$0xff]  ;;  %v1207_v57 = vld [vmem:[%s3154_s5 + $0x158] sm:$0xff]  ;;  %v1196_v53 = vld [vmem:[%s3154_s5 + $0x100] sm:$0xff] }
 0x125   : > { %v1362_v58 = vpack.c.bf16 %v1207_v57, %v1206_v56  ;;  %v1258_v56 = vld [vmem:[%s3154_s5 + $0x2f0] sm:$0xff]  ;;  %v1259_v57 = vld [vmem:[%s3154_s5 + $0x2f8] sm:$0xff] }
 0x126   : > { %v1388_v59 = vpack.c.bf16 %v1259_v57, %v1258_v56 }
 0x127   : > { %963 = vmatpush1.bf16.msra.mxu1 %v780_v0  ;;  %1006 = vmatpush1.bf16.msra.mxu0 %v782_v1  ;;  %v1172_v0 = vld [vmem:[%s3154_s5 + $0x40] sm:$0xff]  ;;  %v1173_v1 = vld [vmem:[%s3154_s5 + $0x48] sm:$0xff] }
 0x128   : > { %964 = vmatprep.subr.bf16.mxu1 %v773_v5  ;;  %1007 = vmatprep.subr.bf16.mxu0 %v775_v6  ;;  %v1345_v4 = vpack.c.bf16 %v1173_v1, %v1172_v0  ;;  %v1204_v5 = vld [vmem:[%s3154_s5 + $0x140] sm:$0xff]  ;;  %v1205_v6 = vld [vmem:[%s3154_s5 + $0x148] sm:$0xff]  ;;  %v826_v0 = vlaneseq }
 0x129   : > { %v1361_v8 = vpack.c.bf16 %v1205_v6, %v1204_v5 }
 0x12b   : > { %965 = vmatpush1.bf16.msra.mxu1 %v772_v14  ;;  %1008 = vmatpush1.bf16.msra.mxu0 %v774_v15  ;;  %v1170_v14 = vld [vmem:[%s3154_s5 + $0x30] sm:$0xff]  ;;  %v1171_v15 = vld [vmem:[%s3154_s5 + $0x38] sm:$0xff] }
 0x12c   : > { %966 = vmatprep.subr.bf16.mxu1 %v765_v22  ;;  %1009 = vmatprep.subr.bf16.mxu0 %v767_v23  ;;  %v1344_v22 = vpack.c.bf16 %v1171_v15, %v1170_v14  ;;  %v1202_v23 = vld [vmem:[%s3154_s5 + $0x130] sm:$0xff] }
 0x12d   : > { %v1360_v27 = vpack.c.bf16 %v1203_v25, %v1202_v23 }
 0x12f   : > { %967 = vmatpush1.bf16.msra.mxu1 %v764_v32  ;;  %1010 = vmatpush1.bf16.msra.mxu0 %v766_v33  ;;  %v1185_v32 = vld [vmem:[%s3154_s5 + $0xa8] sm:$0xff]  ;;  %v1216_v33 = vld [vmem:[%s3154_s5 + $0x1a0] sm:$0xff] }
 0x130   : > { %1725 = vmatprep.subr.bf16.mxu1 %v1356_v38  ;;  %1747 = vmatprep.subr.bf16.mxu0 %v1372_v41  ;;  %v1351_v34 = vpack.c.bf16 %v1185_v32, %v1184_v31  ;;  %v1169_v38 = vld [vmem:[%s3154_s5 + $0x28] sm:$0xff]  ;;  %v1367_v39 = vpack.c.bf16 %v1217_v35, %v1216_v33 }
 0x131   : > { %v1201_v41 = vld [vmem:[%s3154_s5 + $0x128] sm:$0xff] }
 0x132   : > { %985 = vmatmul.mubr.bf16.vlgmr.msra.gmra.mxu1 %v2480_v7  ;;  %1028 = vmatmul.mubr.bf16.vlgmr.msra.gmra.mxu0 %v2480_v7  ;;  %v1178_v7 = vld [vmem:[%s3154_s5 + $0x70] sm:$0xff] }
 0x133   : > { %v1348_v42 = vpack.c.bf16 %v1179_v40, %v1178_v7  ;;  %1748 = vmatpush3.bf16.msra.mxu0 %v1364_v19  ;;  %v1343_v7 = vpack.c.bf16 %v1169_v38, %v1168_v17  ;;  %v1200_v40 = vld [vmem:[%s3154_s5 + $0x120] sm:$0xff]  ;;  %v1214_v19 = vld [vmem:[%s3154_s5 + $0x190] sm:$0xff] }
 0x134   : > { %1749 = vmatprep.subr.bf16.mxu0 %v1371_v45  ;;  %v1366_v37 = vpack.c.bf16 %v1215_v24, %v1214_v19  ;;  %v1199_v45 = vld [vmem:[%s3154_s5 + $0x118] sm:$0xff] }
 0x135   : > { %1726 = vmatpush3.bf16.msra.mxu1 %v1348_v42  ;;  %v1359_v42 = vpack.c.bf16 %v1201_v41, %v1200_v40 }
 0x136   : > { %1727 = vmatprep.subr.bf16.mxu1 %v1355_v36  ;;  %v1167_v36 = vld [vmem:[%s3154_s5 + $0x18] sm:$0xff] }
 0x137   : > { %1750 = vmatpush3.bf16.msra.mxu0 %v1363_v29  ;;  %v1342_v44 = vpack.c.bf16 %v1167_v36, %v1166_v26  ;;  %v1212_v29 = vld [vmem:[%s3154_s5 + $0x180] sm:$0xff] }
 0x138   : > { %1751 = vmatprep.subr.bf16.mxu0 %v1370_v54  ;;  %v1365_v51 = vpack.c.bf16 %v1213_v49, %v1212_v29  ;;  %v1197_v54 = vld [vmem:[%s3154_s5 + $0x108] sm:$0xff] }
 0x139   : > { %1728 = vmatpush3.bf16.msra.mxu1 %v1347_v46  ;;  %v1358_v46 = vpack.c.bf16 %v1199_v45, %v1198_v28 }
 0x13a   : > { %1729 = vmatprep.subr.bf16.mxu1 %v1354_v50  ;;  %v1165_v50 = vld [vmem:[%s3154_s5 + $0x8] sm:$0xff] }
 0x13b   : > { %1752 = vmatpush3.bf16.msra.mxu0 %v1362_v58  ;;  %v1341_v52 = vpack.c.bf16 %v1165_v50, %v1164_v18  ;;  %v1290_v58 = vld [vmem:[%s3154_s5 + $0x3f0] sm:$0xff] }
 0x13c   : > { %1753 = vmatprep.subr.bf16.mxu0 %v1369_v2  ;;  %v1404_v61 = vpack.c.bf16 %v1291_v60, %v1290_v58 }
 0x13d   : > { %1730 = vmatpush3.bf16.msra.mxu1 %v1346_v55  ;;  %v1357_v55 = vpack.c.bf16 %v1197_v54, %v1196_v53 }
 0x13e   : > { %1731 = vmatprep.subr.bf16.mxu1 %v1353_v62 }
 0x13f   : > { %1754 = vmatpush3.bf16.msra.mxu0 %v1361_v8 }
 0x140   : > { %1755 = vmatprep.subr.bf16.mxu0 %v1368_v21 }
 0x141   : > { %1732 = vmatpush3.bf16.msra.mxu1 %v1345_v4  ;;  %v2840_v4 = vshrl.u32 %v826_v0, 7 }
 0x142   : > { %1733 = vmatprep.subr.bf16.mxu1 %v1352_v12  ;;  %v824_v12 = vld [vmem:[%s3153_s4] sm:$0xff] }
 0x143   : > { %1756 = vmatpush3.bf16.msra.mxu0 %v1360_v27  ;;  %v832_v8 = vsub.s32 1, %v2840_v4  ;;  %v840_v9 = vsub.s32 3, %v2840_v4  ;;  %v828_v10 = vsub.s32 0, %v2840_v4  ;;  %v836_v11 = vsub.s32 2, %v2840_v4 }
 0x144   : > { %1757 = vmatprep.subr.bf16.mxu0 %v1367_v39  ;;  %v844_v24 = vsub.s32 4, %v2840_v4  ;;  %v852_v26 = vsub.s32 6, %v2840_v4  ;;  %v856_v28 = vsub.s32 7, %v2840_v4 }
 0x145   : > { %1734 = vmatpush3.bf16.msra.mxu1 %v1344_v22  ;;  %v833_v15 = vrot.slane %v824_v12, %v832_v8  ;;  %v841_v21 = vrot.slane %v824_v12, %v840_v9  ;;  %v829_v22 = vrot.slane %v824_v12, %v828_v10  ;;  %v837_v23 = vrot.slane %v824_v12, %v836_v11 }
 0x146   : > { %1735 = vmatprep.subr.bf16.mxu1 %v1351_v34  ;;  %v845_v29 = vrot.slane %v824_v12, %v844_v24 }
 0x147   : > { %1758 = vmatpush3.bf16.msra.mxu0 %v1359_v42 }
 0x148   : > { %1759 = vmatprep.subr.bf16.mxu0 %v1366_v37 }
 0x149   : > { %1736 = vmatpush3.bf16.msra.mxu1 %v1343_v7 }
 0x14a   : > { %1737 = vmatprep.subr.bf16.mxu1 %v1350_v20 }
 0x14b   : > { %1760 = vmatpush3.bf16.msra.mxu0 %v1358_v46 }
 0x14c   : > { %1761 = vmatprep.subr.bf16.mxu0 %v1365_v51 }
 0x14d   : > { %1738 = vmatpush3.bf16.msra.mxu1 %v1342_v44  ;;  %v848_v44 = vsub.s32 5, %v2840_v4 }
 0x14e   : > { %1739 = vmatprep.subr.bf16.mxu1 %v1349_v30  ;;  %v853_v30 = vrot.slane %v824_v12, %v852_v26 }
 0x14f   : > { %1762 = vmatpush3.bf16.msra.mxu0 %v1357_v55  ;;  %v849_v50 = vrot.slane %v824_v12, %v848_v44 }
 0x150   : > { %1791 = vmatprep.subr.bf16.mxu0 %v1404_v61 }
 0x151   : > { %1740 = vmatpush3.bf16.msra.mxu1 %v1341_v52  ;;  %v857_v52 = vrot.slane %v824_v12, %v856_v28 }
 0x152   : > { %1769 = vmatprep.subr.bf16.mxu1 %v1388_v59 }
 0x1d2   : > { %v900_v62 = vpop.f32.mrf.mxu1  ;;  %v943_v63 = vpop.f32.mrf.mxu0 }
 0x1d3   : > { %v901_v35 = vadd.f32 %v900_v62, %v829_v22  ;;  %v944_v17 = vadd.f32 %v943_v63, %v837_v23 }
 0x1d4   : > { %v902_v1 = vpop.f32.mrf.mxu1  ;;  %v945_v2 = vpop.f32.mrf.mxu0 }
 0x1d5   : > { %v903_v31 = vadd.f32 %v902_v1, %v833_v15  ;;  %v946_v32 = vadd.f32 %v945_v2, %v841_v21 }
 0x1d6   : > { %v904_v5 = vpop.f32.mrf.mxu1  ;;  %v947_v6 = vpop.f32.mrf.mxu0 }
 0x1d7   : > { %v905_v33 = vadd.f32 %v904_v5, %v829_v22  ;;  %v948_v34 = vadd.f32 %v947_v6, %v837_v23 }
 0x1d8   : > { %v906_v13 = vpop.f32.mrf.mxu1  ;;  %v949_v14 = vpop.f32.mrf.mxu0 }
 0x1d9   : > { %v907_v25 = vadd.f32 %v906_v13, %v833_v15  ;;  %v950_v27 = vadd.f32 %v949_v14, %v841_v21  ;;  %v1038_v7 = vmax.f32 %v901_v35, %v905_v33  ;;  %v1052_v40 = vmax.f32 %v944_v17, %v948_v34 }
 0x1da   : > { %v1984_v21 = vmov 1966171168  }
 0x1db   : > { %v1045_v38 = vmax.f32 %v903_v31, %v907_v25  ;;  %v1059_v39 = vmax.f32 %v946_v32, %v950_v27  ;;  %v1039_v43 = vrot.slane %v1038_v7, 4  ;;  %v1053_v16 = vrot.slane %v1052_v40, 4 }
 0x1dc   : > { %v1113_v22 = vunpack.c.l.s4 %v1984_v21 }
 0x1dd   : > { %v1046_v41 = vrot.slane %v1045_v38, 4  ;;  %v1060_v42 = vrot.slane %v1059_v39, 4  ;;  %v1040_v36 = vmax.f32 %v1038_v7, %v1039_v43  ;;  %v1054_v37 = vmax.f32 %v1052_v40, %v1053_v16 }
 0x1de   : > { %v1114_v40 = vunpack.c.0.s8 %v1113_v22 }
 0x1df   : > { %v1047_v19 = vmax.f32 %v1045_v38, %v1046_v41  ;;  %v1061_v20 = vmax.f32 %v1059_v39, %v1060_v42  ;;  %v1041_v49 = vrot.slane %v1040_v36, 2  ;;  %v1055_v18 = vrot.slane %v1054_v37, 2 }
 0x1e1   : > { %v1048_v45 = vrot.slane %v1047_v19, 2  ;;  %v1062_v46 = vrot.slane %v1061_v20, 2  ;;  %v1042_v62 = vmax.f32 %v1040_v36, %v1041_v49  ;;  %v1056_v63 = vmax.f32 %v1054_v37, %v1055_v18 }
 0x1e3   : > { %v1049_v54 = vmax.f32 %v1047_v19, %v1048_v45  ;;  %v1063_v55 = vmax.f32 %v1061_v20, %v1062_v46  ;;  %v1043_v33 = vrot.slane %v1042_v62, 1  ;;  %v1057_v34 = vrot.slane %v1056_v63, 1 }
 0x1e5   : > { %v1050_v12 = vrot.slane %v1049_v54, 1  ;;  %v1064_v23 = vrot.slane %v1063_v55, 1  ;;  %v1044_v20 = vmax.f32 %v1042_v62, %v1043_v33  ;;  %v1058_v36 = vmax.f32 %v1056_v63, %v1057_v34  ;;  %v1289_v33 = vld [vmem:[%s3154_s5 + $0x3e8] sm:$0xff] }
 0x1e7   : > { %v1051_v7 = vmax.f32 %v1049_v54, %v1050_v12  ;;  %v1065_v41 = vmax.f32 %v1063_v55, %v1064_v23  ;;  %v1275_v12 = vld [vmem:[%s3154_s5 + $0x378] sm:$0xff] }
 0x1f2   : > { %v986_v47 = vpop.f32.mrf.mxu1  ;;  %v1029_v48 = vpop.f32.mrf.mxu0 }
 0x1f3   : > { %v987_v58 = vadd.f32 %v986_v47, %v845_v29  ;;  %v1030_v59 = vadd.f32 %v1029_v48, %v853_v30  ;;  %v1108_v48 = vcombine.low %v1044_v20, %v1051_v7  ;;  %v1273_v7 = vld [vmem:[%s3154_s5 + $0x368] sm:$0xff] }
 0x1f4   : > { %v988_v51 = vpop.f32.mrf.mxu1  ;;  %v1031_v53 = vpop.f32.mrf.mxu0 }
 0x1f5   : > { %v989_v0 = vadd.f32 %v988_v51, %v849_v50  ;;  %v1032_v1 = vadd.f32 %v1031_v53, %v857_v52 }
 0x1f6   : > { %v990_v56 = vpop.f32.mrf.mxu1  ;;  %v1033_v57 = vpop.f32.mrf.mxu0 }
 0x1f7   : > { %v991_v60 = vadd.f32 %v990_v56, %v845_v29  ;;  %v1034_v61 = vadd.f32 %v1033_v57, %v853_v30  ;;  %v1117_v29 = vsub.s32 %v1114_v40, %v2840_v4  ;;  %v1109_v30 = vcombine.low %v1058_v36, %v1065_v41  ;;  %v1254_v40 = vld [vmem:[%s3154_s5 + $0x2d0] sm:$0xff]  ;;  %v1570_v4 = vld [vmem:[%s3156_s7 + $0x18] sm:$0xff] }
 0x1f8   : > { %v992_v2 = vpop.f32.mrf.mxu1  ;;  %v1035_v5 = vpop.f32.mrf.mxu0 }
 0x1f9   : > { %v1066_v6 = vmax.f32 %v987_v58, %v991_v60  ;;  %v1080_v13 = vmax.f32 %v1030_v59, %v1034_v61  ;;  %v993_v14 = vadd.f32 %v992_v2, %v849_v50  ;;  %v1036_v15 = vadd.f32 %v1035_v5, %v857_v52 }
 0x1fa   : > { %v1118_v54 = vrot.slane %v1108_v48, %v1117_v29  ;;  %v1125_v55 = vrot.slane %v1109_v30, %v1117_v29  ;;  %v1270_v30 = vld [vmem:[%s3154_s5 + $0x350] sm:$0xff] }
 0x1fb   : > { %v1067_v25 = vrot.slane %v1066_v6, 4  ;;  %v1081_v27 = vrot.slane %v1080_v13, 4  ;;  %v1073_v31 = vmax.f32 %v989_v0, %v993_v14  ;;  %v1087_v32 = vmax.f32 %v1032_v1, %v1036_v15  ;;  %v1243_v14 = vld [vmem:[%s3154_s5 + $0x278] sm:$0xff]  ;;  %v1274_v15 = vld [vmem:[%s3154_s5 + $0x370] sm:$0xff] }
 0x1fc   : > { %v1140_v62 = vcombine.low %v1118_v54, %v1125_v55  ;;  %v1236_v55 = vld [vmem:[%s3154_s5 + $0x240] sm:$0xff] }
 0x1fd   : > { %v1068_v35 = vmax.f32 %v1066_v6, %v1067_v25  ;;  %v1082_v17 = vmax.f32 %v1080_v13, %v1081_v27  ;;  %v1074_v38 = vrot.slane %v1073_v31, 4  ;;  %v1088_v39 = vrot.slane %v1087_v32, 4  ;;  %v1242_v6 = vld [vmem:[%s3154_s5 + $0x270] sm:$0xff]  ;;  %v1256_v27 = vld [vmem:[%s3154_s5 + $0x2e0] sm:$0xff] }
 0x1fe   : > { %v1148_v2 = vrot.slane %v1140_v62, %v1117_v29  ;;  %v1251_v62 = vld [vmem:[%s3154_s5 + $0x2b8] sm:$0xff] }
 0x1ff   : > { %v1069_v42 = vrot.slane %v1068_v35, 2  ;;  %v1083_v43 = vrot.slane %v1082_v17, 2  ;;  %v1075_v16 = vmax.f32 %v1073_v31, %v1074_v38  ;;  %v1089_v19 = vmax.f32 %v1087_v32, %v1088_v39  ;;  %v1241_v38 = vld [vmem:[%s3154_s5 + $0x268] sm:$0xff]  ;;  %v1272_v39 = vld [vmem:[%s3154_s5 + $0x360] sm:$0xff] }
 0x200   : > { %v1380_v31 = vpack.c.bf16 %v1243_v14, %v1242_v6  ;;  %v1396_v32 = vpack.c.bf16 %v1275_v12, %v1274_v15  ;;  %v1235_v6 = vld [vmem:[%s3154_s5 + $0x238] sm:$0xff]  ;;  %v1266_v12 = vld [vmem:[%s3154_s5 + $0x330] sm:$0xff] }
 0x201   : > { %v1070_v37 = vmax.f32 %v1068_v35, %v1069_v42  ;;  %v1084_v45 = vmax.f32 %v1082_v17, %v1083_v43  ;;  %v1076_v46 = vrot.slane %v1075_v16, 2  ;;  %v1090_v47 = vrot.slane %v1089_v19, 2  ;;  %v1255_v43 = vld [vmem:[%s3154_s5 + $0x2d8] sm:$0xff] }
 0x202   : > { %v1386_v48 = vpack.c.bf16 %v1255_v43, %v1254_v40  ;;  %v1231_v40 = vld [vmem:[%s3154_s5 + $0x218] sm:$0xff]  ;;  %v1262_v43 = vld [vmem:[%s3154_s5 + $0x310] sm:$0xff] }
 0x203   : > { %v1071_v49 = vrot.slane %v1070_v37, 1  ;;  %v1085_v18 = vrot.slane %v1084_v45, 1  ;;  %v1077_v50 = vmax.f32 %v1075_v16, %v1076_v46  ;;  %v1091_v51 = vmax.f32 %v1089_v19, %v1090_v47  ;;  %v1286_v16 = vld [vmem:[%s3154_s5 + $0x3d0] sm:$0xff]  ;;  %v1287_v19 = vld [vmem:[%s3154_s5 + $0x3d8] sm:$0xff] }
 0x204   : > { %v1238_v46 = vld [vmem:[%s3154_s5 + $0x250] sm:$0xff]  ;;  %v1239_v47 = vld [vmem:[%s3154_s5 + $0x258] sm:$0xff] }
 0x205   : > { %v1078_v52 = vrot.slane %v1077_v50, 1  ;;  %v1092_v53 = vrot.slane %v1091_v51, 1  ;;  %v1072_v56 = vmax.f32 %v1070_v37, %v1071_v49  ;;  %v1086_v57 = vmax.f32 %v1084_v45, %v1085_v18  ;;  %v1271_v49 = vld [vmem:[%s3154_s5 + $0x358] sm:$0xff]  ;;  %v1252_v18 = vld [vmem:[%s3154_s5 + $0x2c0] sm:$0xff] }
 0x206   : > { %v1395_v45 = vpack.c.bf16 %v1273_v7, %v1272_v39  ;;  %v1394_v54 = vpack.c.bf16 %v1271_v49, %v1270_v30  ;;  %v1230_v7 = vld [vmem:[%s3154_s5 + $0x210] sm:$0xff]  ;;  %v1229_v30 = vld [vmem:[%s3154_s5 + $0x208] sm:$0xff]  ;;  %v1260_v49 = vld [vmem:[%s3154_s5 + $0x300] sm:$0xff] }
 0x207   : > { %v1079_v58 = vmax.f32 %v1077_v50, %v1078_v52  ;;  %v1093_v59 = vmax.f32 %v1091_v51, %v1092_v53  ;;  %v1253_v50 = vld [vmem:[%s3154_s5 + $0x2c8] sm:$0xff]  ;;  %v1284_v51 = vld [vmem:[%s3154_s5 + $0x3c0] sm:$0xff]  ;;  %v1378_v53 = vpack.c.bf16 %v1239_v47, %v1238_v46 }
 0x208   : > { %v1285_v52 = vld [vmem:[%s3154_s5 + $0x3c8] sm:$0xff]  ;;  %v1228_v47 = vld [vmem:[%s3154_s5 + $0x200] sm:$0xff] }
 0x209   : > { %v1110_v60 = vcombine.low %v1072_v56, %v1079_v58  ;;  %v1111_v61 = vcombine.low %v1086_v57, %v1093_v59  ;;  %v1237_v56 = vld [vmem:[%s3154_s5 + $0x248] sm:$0xff]  ;;  %v1385_v57 = vpack.c.bf16 %v1253_v50, %v1252_v18  ;;  %v1401_v58 = vpack.c.bf16 %v1285_v52, %v1284_v51  ;;  %v1268_v59 = vld [vmem:[%s3154_s5 + $0x340] sm:$0xff] }
 0x20a   : > { %v1261_v18 = vld [vmem:[%s3154_s5 + $0x308] sm:$0xff]  ;;  %v1373_v50 = vpack.c.bf16 %v1229_v30, %v1228_v47 }
 0x20b   : > { %v1132_v63 = vrot.slane %v1110_v60, %v1117_v29  ;;  %v1139_v0 = vrot.slane %v1111_v61, %v1117_v29  ;;  %v1269_v60 = vld [vmem:[%s3154_s5 + $0x348] sm:$0xff]  ;;  %v1250_v61 = vld [vmem:[%s3154_s5 + $0x2b0] sm:$0xff]  ;;  %v1389_v51 = vpack.c.bf16 %v1261_v18, %v1260_v49 }
 0x20c   : > { %v1384_v14 = vpack.c.bf16 %v1251_v62, %v1250_v61 }
 0x20d   : > { %v1141_v1 = vcombine.low %v1132_v63, %v1139_v0  ;;  %v1282_v63 = vld [vmem:[%s3154_s5 + $0x3b0] sm:$0xff]  ;;  %v1283_v0 = vld [vmem:[%s3154_s5 + $0x3b8] sm:$0xff] }
 0x20e   : > { %v1400_v15 = vpack.c.bf16 %v1283_v0, %v1282_v63 }
 0x20f   : > { %v1155_v5 = vrot.slane %v1141_v1, %v1117_v29  ;;  %v1402_v29 = vpack.c.bf16 %v1287_v19, %v1286_v16  ;;  %v1377_v1 = vpack.c.bf16 %v1237_v56, %v1236_v55  ;;  %v1263_v16 = vld [vmem:[%s3154_s5 + $0x318] sm:$0xff]  ;;  %v1244_v19 = vld [vmem:[%s3154_s5 + $0x280] sm:$0xff]  ;;  %v1569_v56 = vld [vmem:[%s3156_s7 + $0x10] sm:$0xff] }
 0x210   : > { %v1390_v46 = vpack.c.bf16 %v1263_v16, %v1262_v43 }
 0x211   : > { %v2873_v13 = vcombine.low %v1148_v2, %v1155_v5  ;;  %v1393_v2 = vpack.c.bf16 %v1269_v60, %v1268_v59  ;;  %v1234_v5 = vld [vmem:[%s3154_s5 + $0x230] sm:$0xff] }
 0x213   : > { %v1300_v21 = vrot.slane %v2873_v13, %v832_v8  ;;  %v1308_v22 = vrot.slane %v2873_v13, %v840_v9  ;;  %v1296_v23 = vrot.slane %v2873_v13, %v828_v10  ;;  %v1304_v25 = vrot.slane %v2873_v13, %v836_v11  ;;  %v1257_v10 = vld [vmem:[%s3154_s5 + $0x2e8] sm:$0xff]  ;;  %v1288_v11 = vld [vmem:[%s3154_s5 + $0x3e0] sm:$0xff] }
 0x214   : > { %v1316_v8 = vrot.slane %v2873_v13, %v848_v44  ;;  %v1324_v9 = vrot.slane %v2873_v13, %v856_v28  ;;  %v1240_v28 = vld [vmem:[%s3154_s5 + $0x260] sm:$0xff]  ;;  %v1387_v41 = vpack.c.bf16 %v1257_v10, %v1256_v27  ;;  %v1403_v42 = vpack.c.bf16 %v1289_v33, %v1288_v11  ;;  %v1281_v27 = vld [vmem:[%s3154_s5 + $0x3a8] sm:$0xff] }
 0x215   : > { %v1334_v34 = vpack.c.bf16 %v1300_v21, %v1300_v21  ;;  %v1336_v35 = vpack.c.bf16 %v1308_v22, %v1308_v22  ;;  %v1333_v17 = vpack.c.bf16 %v1296_v23, %v1296_v23  ;;  %v1335_v44 = vpack.c.bf16 %v1304_v25, %v1304_v25  ;;  %v1267_v21 = vld [vmem:[%s3154_s5 + $0x338] sm:$0xff]  ;;  %v1248_v22 = vld [vmem:[%s3154_s5 + $0x2a0] sm:$0xff]  ;;  %v1249_v23 = vld [vmem:[%s3154_s5 + $0x2a8] sm:$0xff] }
 0x216   : > { %v1338_v20 = vpack.c.bf16 %v1316_v8, %v1316_v8  ;;  %v1340_v36 = vpack.c.bf16 %v1324_v9, %v1324_v9  ;;  %v1379_v37 = vpack.c.bf16 %v1241_v38, %v1240_v28  ;;  %v1280_v25 = vld [vmem:[%s3154_s5 + $0x3a0] sm:$0xff]  ;;  %v1233_v9 = vld [vmem:[%s3154_s5 + $0x228] sm:$0xff]  ;;  %v1383_v10 = vpack.c.bf16 %v1249_v23, %v1248_v22  ;;  %v1279_v28 = vld [vmem:[%s3154_s5 + $0x398] sm:$0xff] }
 0x217   : > { %1438 = vmatprep.mubr.bf16.mxu1 %v1334_v34  ;;  %1478 = vmatprep.mubr.bf16.mxu0 %v1336_v35  ;;  %v1232_v8 = vld [vmem:[%s3154_s5 + $0x220] sm:$0xff]  ;;  %v1399_v11 = vpack.c.bf16 %v1281_v27, %v1280_v25  ;;  %v1265_v34 = vld [vmem:[%s3154_s5 + $0x328] sm:$0xff]  ;;  %v1246_v35 = vld [vmem:[%s3154_s5 + $0x290] sm:$0xff]  ;;  %v1312_v52 = vrot.slane %v2873_v13, %v844_v24  ;;  %v1573_v24 = vpack.c.bf16 %v1570_v4, %v1569_v56 }
 0x218   : > { %1439 = vmatmul.mubr.bf16.vlgmr.msra.gmra.mxu1 %v1333_v17  ;;  %1479 = vmatmul.mubr.bf16.vlgmr.msra.gmra.mxu0 %v1335_v44  ;;  %v1264_v33 = vld [vmem:[%s3154_s5 + $0x320] sm:$0xff]  ;;  %v1247_v17 = vld [vmem:[%s3154_s5 + $0x298] sm:$0xff]  ;;  %v1278_v44 = vld [vmem:[%s3154_s5 + $0x390] sm:$0xff]  ;;  %v1375_v38 = vpack.c.bf16 %v1233_v9, %v1232_v8 }
 0x219   : > { %1770 = vmatpush3.bf16.msra.mxu1 %v1380_v31  ;;  %1792 = vmatpush3.bf16.msra.mxu0 %v1396_v32  ;;  %v1376_v31 = vpack.c.bf16 %v1235_v6, %v1234_v5  ;;  %v1392_v32 = vpack.c.bf16 %v1267_v21, %v1266_v12  ;;  %v1391_v39 = vpack.c.bf16 %v1265_v34, %v1264_v33  ;;  %v1574_v34 = vld [vmem:[%s3157_s8] sm:$0x1] }
 0x21a   : > { %1518 = vmatprep.mubr.bf16.mxu1 %v1338_v20  ;;  %1558 = vmatprep.mubr.bf16.mxu0 %v1340_v36  ;;  %v1245_v20 = vld [vmem:[%s3154_s5 + $0x288] sm:$0xff]  ;;  %v1276_v36 = vld [vmem:[%s3154_s5 + $0x380] sm:$0xff] }
 0x21b   : > { %1771 = vmatprep.subr.bf16.mxu1 %v1387_v41  ;;  %1793 = vmatprep.subr.bf16.mxu0 %v1403_v42  ;;  %v1382_v41 = vpack.c.bf16 %v1247_v17, %v1246_v35  ;;  %v1398_v42 = vpack.c.bf16 %v1279_v28, %v1278_v44 }
 0x21d   : > { %1772 = vmatpush3.bf16.msra.mxu1 %v1379_v37  ;;  %1794 = vmatpush3.bf16.msra.mxu0 %v1395_v45  ;;  %v1277_v37 = vld [vmem:[%s3154_s5 + $0x388] sm:$0xff]  ;;  %v1374_v45 = vpack.c.bf16 %v1231_v40, %v1230_v7 }
 0x21e   : > { %1773 = vmatprep.subr.bf16.mxu1 %v1386_v48  ;;  %1795 = vmatprep.subr.bf16.mxu0 %v1402_v29  ;;  %v1381_v48 = vpack.c.bf16 %v1245_v20, %v1244_v19  ;;  %v1397_v29 = vpack.c.bf16 %v1277_v37, %v1276_v36 }
 0x221   : > { %1774 = vmatpush3.bf16.msra.mxu1 %v1378_v53  ;;  %1796 = vmatpush3.bf16.msra.mxu0 %v1394_v54  ;;  %v1320_v53 = vrot.slane %v2873_v13, %v852_v26  ;;  %v1337_v54 = vpack.c.bf16 %v1312_v52, %v1312_v52  ;;  %v1567_v26 = vld [vmem:[%s3156_s7] sm:$0xff]  ;;  %v1568_v13 = vld [vmem:[%s3156_s7 + $0x8] sm:$0xff] }
 0x222   : > { %1775 = vmatprep.subr.bf16.mxu1 %v1385_v57  ;;  %1797 = vmatprep.subr.bf16.mxu0 %v1401_v58  ;;  %v1572_v57 = vpack.c.bf16 %v1568_v13, %v1567_v26 }
 0x223   : > { %v1339_v55 = vpack.c.bf16 %v1320_v53, %v1320_v53 }
 0x225   : > { %1776 = vmatpush3.bf16.msra.mxu1 %v1377_v1  ;;  %1798 = vmatpush3.bf16.msra.mxu0 %v1393_v2 }
 0x226   : > { %1777 = vmatprep.subr.bf16.mxu1 %v1384_v14  ;;  %1799 = vmatprep.subr.bf16.mxu0 %v1400_v15 }
 0x229   : > { %1778 = vmatpush3.bf16.msra.mxu1 %v1376_v31  ;;  %1800 = vmatpush3.bf16.msra.mxu0 %v1392_v32 }
 0x22a   : > { %1779 = vmatprep.subr.bf16.mxu1 %v1383_v10  ;;  %1801 = vmatprep.subr.bf16.mxu0 %v1399_v11 }
 0x22d   : > { %1780 = vmatpush3.bf16.msra.mxu1 %v1375_v38  ;;  %1802 = vmatpush3.bf16.msra.mxu0 %v1391_v39 }
 0x22e   : > { %1781 = vmatprep.subr.bf16.mxu1 %v1382_v41  ;;  %1803 = vmatprep.subr.bf16.mxu0 %v1398_v42 }
 0x231   : > { %1782 = vmatpush3.bf16.msra.mxu1 %v1374_v45  ;;  %1804 = vmatpush3.bf16.msra.mxu0 %v1390_v46 }
 0x232   : > { %1783 = vmatprep.subr.bf16.mxu1 %v1381_v48  ;;  %1805 = vmatprep.subr.bf16.mxu0 %v1397_v29 }
 0x235   : > { %1784 = vmatpush3.bf16.msra.mxu1 %v1373_v50  ;;  %1806 = vmatpush3.bf16.msra.mxu0 %v1389_v51 }
 0x236   : > { %1836 = vmatprep.subr.bf16.mxu1 %v1981_v3 }
 0x238   : > { %1519 = vmatmul.mubr.bf16.vlgmr.msra.gmra.mxu1 %v1337_v54  ;;  %1559 = vmatmul.mubr.bf16.vlgmr.msra.gmra.mxu0 %v1339_v55 }
 0x239   : > { %1840 = vmatprep.mubr.msk.bf16.mxu1 %vm1982_vm0, %v1981_v3  ;;  %1837 = vmatpush3.bf16.msra.mxu1 %v1573_v24 }
 0x23a   : > { %1838 = vmatprep.subr.bf16.mxu1 %v1981_v3  ;;  %v1405_v3 = vld [vmem:[%s3155_s6] sm:$0x1] }
 0x23d   : > { %1839 = vmatpush3.bf16.msra.mxu1 %v1572_v57 }
 0x2d8   : > { %v1741_v58 = vpop.f32.mrf.mxu1  ;;  %v1763_v59 = vpop.f32.mrf.mxu0 }
 0x2da   : > { %v1742_v60 = vpop.f32.mrf.mxu1  ;;  %v1764_v61 = vpop.f32.mrf.mxu0 }
 0x2db   : > { %v1743_v2 = vadd.f32 %v1742_v60, %v1741_v58  ;;  %v1765_v15 = vadd.f32 %v1764_v61, %v1763_v59 }
 0x2dc   : > { %v1744_v62 = vpop.f32.mrf.mxu1  ;;  %v1766_v63 = vpop.f32.mrf.mxu0 }
 0x2dd   : > { %v1441_v5 = vadd.f32 %v1743_v2, %v1405_v3 }
 0x2de   : > { %v1745_v0 = vpop.f32.mrf.mxu1  ;;  %v1767_v1 = vpop.f32.mrf.mxu0 }
 0x2df   : > { %v1481_v22 = vadd.f32 %v1765_v15, %v1441_v5 }
 0x2f8   : > { %v1785_v6 = vpop.f32.mrf.mxu1  ;;  %v1807_v14 = vpop.f32.mrf.mxu0 }
 0x2fa   : > { %v1786_v12 = vpop.f32.mrf.mxu1  ;;  %v1808_v21 = vpop.f32.mrf.mxu0 }
 0x2fb   : > { %v1787_v23 = vadd.f32 %v1786_v12, %v1785_v6  ;;  %v1809_v32 = vadd.f32 %v1808_v21, %v1807_v14 }
 0x2fc   : > { %v1788_v25 = vpop.f32.mrf.mxu1  ;;  %v1810_v27 = vpop.f32.mrf.mxu0 }
 0x2fd   : > { %v1521_v31 = vadd.f32 %v1787_v23, %v1481_v22 }
 0x2fe   : > { %v1789_v8 = vpop.f32.mrf.mxu1  ;;  %v1811_v9 = vpop.f32.mrf.mxu0 }
 0x2ff   : > { %v1561_v10 = vadd.f32 %v1809_v32, %v1521_v31 }
 0x301   : > { %v1566_v11 = vmax.f32 %v1561_v10, 0.0 }
 0x303   : > { %v1571_v33 = vpack.c.bf16 %v1566_v11, %v1566_v11 }
 0x305   : > { %1841 = vmatmul.mubr.msk.bf16.vlgmr.msra.gmra.mxu1 %vm1575_vm9, %v1571_v33 }
 0x3c5   : > { %v1613_v35 = vpop.f32.mrf.mxu1 }
 0x3c6   : > { %v1614_v17 = vadd.f32 %v1613_v35, %v1574_v34 }
 0x3c7   : > { %v1842_v44 = vpop.f32.mrf.mxu1 }
 0x3c8   : > { %1620 = vst.msk [vmem:[%s347_s20] sm:$0x1] %vm1619_vm10, %v1614_v17 }
 0x3c9   : > { %v1616_v28 = vpop.f32.mrf.mxu1 }
 0x3ca   : > { %1916 = shalt.err (!%p1913_p5)
}
 0x3cb   : > { %s1917_s28 = scalar_lea.hbm %s3103_s25, 16  ;;  %s1921_s18 = scalar_lea.hbm %s3158_s9, 32 }
 0x3cc   : > { %p1918_p6 = scmp.ne.s32.totalorder %s3103_s25, %s1917_s28  ;;  %p1922_p10 = scmp.lt.s32.totalorder %s3103_s25, %s3158_s9 }
 0x3cd   : > { %p1923_p11 = scmp.lt.s32.totalorder %s1921_s18, %s1917_s28 }
 0x3ce   : > { %p1919_p7 = pnand %p1918_p6, %p2076_p4 }
 0x3cf   : > { %p1924_p12 = por %p1923_p11, %p1922_p10 }
 0x3d0   : > { %p1920_p9 = pneg %p1919_p7 }
 0x3d2   : > { %p1925_p13 = pnand %p1924_p12, %p1920_p9 }
 0x3d4   : > { %1928 = shalt.err (!%p1925_p13)
}
 0x3d5   : > { %1844 = dma.vmem_to_hbm [thread:$0]  (%p2076_p4), %s3105_s16, 16, %s3103_s25, %s1622_s26   ;;  %v1843_v38 = vpop.f32.mrf.mxu1 }
 0x3d6 PF: > { %p1850_p0 = scmp.ge.s32.totalorder %s1979_s14, 2  ;;  %s1646_s24 = sand.u32 1, %s1959_s30  }
 0x3d7   : > { %s1647_s12 = scalar_lea.sflag [#allocation4], %s1646_s24 }
 0x3d8   : > { %p1847_p1 = pnand %p1850_p0, %p2083_p8 }
 0x3da   : > { %p1848_p2 = pneg %p1847_p1 }
 0x3dc   : > { %1954 = dma.done.wait (%p1848_p2), %s1647_s12, 16  }
 0x3dd   : > { %1956 = vsyncadd (%p1848_p2), %s1647_s12, 4294967280  ;;  %s22_s14 = sadd.s32 1, %s1979_s14   ;;  %s3165_s12 = sld [smem:[#allocation6_spill]] }
 0x3de   : > { %p19_p3 = scmp.ge.s32.totalorder %s22_s14, 4   ;;  %s3166_s13 = sld [smem:[#allocation7_spill]] }
 0x3df   : > { %s3167_s30 = smov %s1963_s10  ;;  %s3168_s10 = smov %s1967_s11 }
 0x3e0   : > { %s3169_s11 = smov %s2089_s22  ;;  %21 = sbr.rel (!%p19_p3) target bundleno = 4 (0x4), region = 99 }
 0x3e5   :  { %1651 = vsyncpa [#allocation4], 1 }
 0x3e6   :  { %1653 = vsyncpa [#allocation4 + $0x1], 1 }

</bundles_post_ra>
